<compile_context>
chip_gen: v6e
topology: v6e:2x2x1
jax: 0.10.0
libtpu: 0.0.40
codegen_flags: <defaults>
</compile_context>

<pallas_src>
import functools
import math

import jax
import jax.numpy as jnp
from jax.experimental import pallas as pl
from jax.experimental.pallas import tpu as pltpu

EPS = 1e-6          # RMSNorm epsilon (reference RMSNorm module not shown)
NEG_INF = -1e30     # finite mask value: avoids (-inf) - (-inf) = NaN in online softmax
PAD_BIAS = -1e9     # bias for padded vocab entries (masked in-kernel)


def _tile(n, pref, align=128):
    """Largest divisor of n that is a multiple of `align` and <= pref.

    Falls back to the full extent only when n already fits in `pref` or no
    aligned divisor exists (toy dims); real model dims always get a lane/
    sublane-aligned tile instead of a full-slab block.
    """
    if n <= pref:
        return n
    k = (pref // align) * align
    while k >= align:
        if n % k == 0:
            return k
        k -= align
    return n


@functools.lru_cache(maxsize=None)
def _vmem_limit_bytes():
    """~3/4 of physical VMEM, capped at 96 MiB (v5e/v6e: 96 MiB, v7x: 48 MiB)."""
    try:
        cap = int(pltpu.get_tpu_info().vmem_capacity_bytes)
        return min((cap * 3) // 4, 96 * 1024 * 1024)
    except Exception:                     # conservative fallback, fits all gens
        return 48 * 1024 * 1024


def _cparams(*dims):
    return pltpu.CompilerParams(dimension_semantics=dims,
                                vmem_limit_bytes=_vmem_limit_bytes())


# ----------------------------- Pallas kernels ------------------------------ #

def _rmsnorm_qkv_kernel(x_ref, g_ref, w_ref, o_ref, xn_sc):
    # x: (1, tq, D) bf16 residual tile; w: (D, tn) bf16 slice of [Wq|Wk|Wv].
    # RMSNorm computed once per row tile, cached across the output-column axis.
    nn = pl.program_id(2)

    @pl.when(nn == 0)
    def _norm():
        x = x_ref[0].astype(jnp.float32)
        xn_sc[...] = (x * jax.lax.rsqrt(jnp.mean(x * x, axis=-1, keepdims=True)
                                        + EPS) * g_ref[...]).astype(jnp.bfloat16)

    o_ref[0] = jnp.dot(xn_sc[...], w_ref[...],
                       preferred_element_type=jnp.float32).astype(o_ref.dtype)


def _flash_attn_kernel(q_ref, k_ref, v_ref, o_ref, m_sc, l_sc, acc_sc,
                       *, tq, tkv, scale):
    iq = pl.program_id(2)
    ikv = pl.program_id(3)

    @pl.when(ikv == 0)
    def _init():
        m_sc[...] = jnp.full_like(m_sc, NEG_INF)
        l_sc[...] = jnp.zeros_like(l_sc)
        acc_sc[...] = jnp.zeros_like(acc_sc)

    # Causal tile skip.  The K/V BlockSpec index maps clamp skipped tiles to
    # the already-resident block (jnp.minimum(ikv, iq)), so the skipped steps
    # below also incur no K/V HBM DMA.
    @pl.when(ikv * tkv <= iq * tq + (tq - 1))
    def _compute():
        q = q_ref[0]                                  # (tq, dh) bf16
        k = k_ref[0]                                  # (tkv, dh) bf16
        v = v_ref[0]                                  # (tkv, dh) bf16
        # Contract last dims -> MXU consumes K without an explicit transpose.
        s = jax.lax.dot_general(q, k, (((1,), (1,)), ((), ())),
                                preferred_element_type=jnp.float32) * scale
        rows = iq * tq + jax.lax.broadcasted_iota(jnp.int32, (tq, tkv), 0)
        cols = ikv * tkv + jax.lax.broadcasted_iota(jnp.int32, (tq, tkv), 1)
        s = jnp.where(cols <= rows, s, NEG_INF)
        m_prev = m_sc[...]
        m_new = jnp.maximum(m_prev, jnp.max(s, axis=-1, keepdims=True))
        alpha = jnp.exp(m_prev - m_new)
        p = jnp.exp(s - m_new)
        l_sc[...] = alpha * l_sc[...] + jnp.sum(p, axis=-1, keepdims=True)
        acc_sc[...] = alpha * acc_sc[...] + jnp.dot(
            p.astype(jnp.bfloat16), v, preferred_element_type=jnp.float32)
        m_sc[...] = m_new

    @pl.when(ikv == pl.num_programs(3) - 1)
    def _finalize():
        o_ref[0] = (acc_sc[...] *
                    pl.reciprocal(l_sc[...], approx=True)).astype(o_ref.dtype)


def _outproj_residual_kernel(a_ref, w_ref, r_ref, o_ref, acc_ref):
    # Output projection accumulated over >=256-wide chunks of the H*Dh
    # contraction axis; residual add fused into the accumulator init.
    kk = pl.program_id(2)

    @pl.when(kk == 0)
    def _init():
        acc_ref[...] = r_ref[0].astype(jnp.float32)

    acc_ref[...] += jnp.dot(a_ref[0], w_ref[...],
                            preferred_element_type=jnp.float32)

    @pl.when(kk == pl.num_programs(2) - 1)
    def _finalize():
        o_ref[0] = acc_ref[...].astype(o_ref.dtype)


def _rmsnorm_swiglu_kernel(x_ref, g_ref, w1a_ref, w1b_ref, w2_ref, o_ref,
                           xn_sc, acc_ref):
    # Fused pre-norm + SwiGLU FFN + residual, accumulating over F tiles.
    # RMSNorm computed once per row tile and cached across the F axis.
    fi = pl.program_id(1)

    @pl.when(fi == 0)
    def _init():
        x = x_ref[...].astype(jnp.float32)
        acc_ref[...] = x                              # residual folded in
        xn_sc[...] = (x * jax.lax.rsqrt(jnp.mean(x * x, axis=-1, keepdims=True)
                                        + EPS) * g_ref[...]).astype(jnp.bfloat16)

    xn = xn_sc[...]
    a = jnp.dot(xn, w1a_ref[...], preferred_element_type=jnp.float32)
    bgate = jnp.dot(xn, w1b_ref[...], preferred_element_type=jnp.float32)
    g = (a * jax.nn.sigmoid(a) * bgate).astype(jnp.bfloat16)      # SwiGLU
    acc_ref[...] += jnp.dot(g, w2_ref[...], preferred_element_type=jnp.float32)

    @pl.when(fi == pl.num_programs(1) - 1)
    def _finalize():
        o_ref[...] = acc_ref[...].astype(o_ref.dtype)


def _rmsnorm_lmhead_kernel(x_ref, g_ref, w_ref, b_ref, o_ref, xn_sc):
    # Fused final RMSNorm + tied projection head.  Norm cached across vocab
    # tiles; w block is (tv, D) -> contract last dims (no emb.T materialized).
    j = pl.program_id(1)

    @pl.when(j == 0)
    def _norm():
        x = x_ref[...].astype(jnp.float32)
        xn_sc[...] = (x * jax.lax.rsqrt(jnp.mean(x * x, axis=-1, keepdims=True)
                                        + EPS) * g_ref[...]).astype(jnp.bfloat16)

    acc = jax.lax.dot_general(xn_sc[...], w_ref[...], (((1,), (1,)), ((), ())),
                              preferred_element_type=jnp.float32)
    o_ref[...] = (acc + b_ref[...]).astype(o_ref.dtype)


# ------------------------------ wrappers ----------------------------------- #

def fused_rmsnorm_qkv(x, gain, wqkv, *, tq_pref=256, tn_pref=512):
    """x: (B, T, D) bf16 -> packed qkv: (B, T, 3D) bf16 (pre-norm fused)."""
    b, t, d = x.shape
    d3 = wqkv.shape[1]
    tq = _tile(t, tq_pref, align=8)
    tn = _tile(d3, tn_pref)
    return pl.pallas_call(
        _rmsnorm_qkv_kernel,
        out_shape=jax.ShapeDtypeStruct((b, t, d3), jnp.bfloat16),
        grid=(b, t // tq, d3 // tn),
        in_specs=[pl.BlockSpec((1, tq, d), lambda bb, tt, nn: (bb, tt, 0)),
                  pl.BlockSpec((1, d), lambda bb, tt, nn: (0, 0)),
                  pl.BlockSpec((d, tn), lambda bb, tt, nn: (0, nn))],
        out_specs=pl.BlockSpec((1, tq, tn), lambda bb, tt, nn: (bb, tt, nn)),
        scratch_shapes=[pltpu.VMEM((tq, d), jnp.bfloat16)],
        compiler_params=_cparams("parallel", "parallel", "arbitrary"),
    )(x, gain.reshape(1, d), wqkv)


def flash_attention(qkv, num_heads, *, t_pref=512):
    """Causal flash attention over packed qkv (B, T, 3D) -> (B, T, H*Dh) bf16."""
    b, t, d3 = qkv.shape
    d = d3 // 3
    h = num_heads
    dh = d // h
    tq = _tile(t, t_pref, align=8)
    tkv = tq                    # equal tiles required by the causal-skip remap
    scale = 1.0 / math.sqrt(dh)

    q_spec = pl.BlockSpec((1, tq, dh), lambda bb, hh, iq, ikv: (bb, iq, hh))
    k_spec = pl.BlockSpec(
        (1, tkv, dh),
        lambda bb, hh, iq, ikv: (bb, jnp.minimum(ikv, iq), h + hh))
    v_spec = pl.BlockSpec(
        (1, tkv, dh),
        lambda bb, hh, iq, ikv: (bb, jnp.minimum(ikv, iq), 2 * h + hh))
    o_spec = pl.BlockSpec((1, tq, dh), lambda bb, hh, iq, ikv: (bb, iq, hh))

    kern = functools.partial(_flash_attn_kernel, tq=tq, tkv=tkv, scale=scale)
    return pl.pallas_call(
        kern,
        out_shape=jax.ShapeDtypeStruct((b, t, d), jnp.bfloat16),
        grid=(b, h, t // tq, t // tkv),
        in_specs=[q_spec, k_spec, v_spec],
        out_specs=o_spec,
        scratch_shapes=[pltpu.VMEM((tq, 1), jnp.float32),
                        pltpu.VMEM((tq, 1), jnp.float32),
                        pltpu.VMEM((tq, dh), jnp.float32)],
        compiler_params=_cparams("parallel", "parallel", "parallel", "arbitrary"),
    )(qkv, qkv, qkv)


def fused_outproj_residual(attn, w_out, resid, *, tq_pref=256, tk_pref=512):
    """attn: (B, T, H*Dh) bf16; w_out: (H*Dh, D) bf16; resid: (B, T, D) bf16."""
    b, t, d = resid.shape
    tq = _tile(t, tq_pref, align=8)
    tk = _tile(d, tk_pref)
    return pl.pallas_call(
        _outproj_residual_kernel,
        out_shape=jax.ShapeDtypeStruct((b, t, d), jnp.bfloat16),
        grid=(b, t // tq, d // tk),
        in_specs=[pl.BlockSpec((1, tq, tk), lambda bb, tt, kk: (bb, tt, kk)),
                  pl.BlockSpec((tk, d), lambda bb, tt, kk: (kk, 0)),
                  pl.BlockSpec((1, tq, d), lambda bb, tt, kk: (bb, tt, 0))],
        out_specs=pl.BlockSpec((1, tq, d), lambda bb, tt, kk: (bb, tt, 0)),
        scratch_shapes=[pltpu.VMEM((tq, d), jnp.float32)],
        compiler_params=_cparams("parallel", "parallel", "arbitrary"),
    )(attn, w_out, resid)


def fused_rmsnorm_swiglu_residual(x, gain, w1a, w1b, w2, *, tm_pref=256, tf_pref=512):
    """x: (M, D) bf16 -> x + FFN(RMSNorm(x)), accumulated over F tiles."""
    m, d = x.shape
    f = w1a.shape[1]
    tm = _tile(m, tm_pref, align=8)
    tf = _tile(f, tf_pref)
    return pl.pallas_call(
        _rmsnorm_swiglu_kernel,
        out_shape=jax.ShapeDtypeStruct((m, d), jnp.bfloat16),
        grid=(m // tm, f // tf),
        in_specs=[pl.BlockSpec((tm, d), lambda i, j: (i, 0)),
                  pl.BlockSpec((1, d), lambda i, j: (0, 0)),
                  pl.BlockSpec((d, tf), lambda i, j: (0, j)),
                  pl.BlockSpec((d, tf), lambda i, j: (0, j)),
                  pl.BlockSpec((tf, d), lambda i, j: (j, 0))],
        out_specs=pl.BlockSpec((tm, d), lambda i, j: (i, 0)),
        scratch_shapes=[pltpu.VMEM((tm, d), jnp.bfloat16),
                        pltpu.VMEM((tm, d), jnp.float32)],
        compiler_params=_cparams("parallel", "arbitrary"),
    )(x, gain.reshape(1, d), w1a, w1b, w2)


def fused_rmsnorm_lmhead(x, gain, emb, bias, *, tm_pref=256, tv_pref=512):
    """x: (M, D) bf16; emb: (Vp, D) bf16 (tied); bias: (Vp,) f32 -> (M, Vp) bf16."""
    m, d = x.shape
    vp = emb.shape[0]
    tm = _tile(m, tm_pref, align=8)
    tv = _tile(vp, tv_pref)
    return pl.pallas_call(
        _rmsnorm_lmhead_kernel,
        out_shape=jax.ShapeDtypeStruct((m, vp), jnp.bfloat16),
        grid=(m // tm, vp // tv),
        in_specs=[pl.BlockSpec((tm, d), lambda i, j: (i, 0)),
                  pl.BlockSpec((1, d), lambda i, j: (0, 0)),
                  pl.BlockSpec((tv, d), lambda i, j: (j, 0)),
                  pl.BlockSpec((1, tv), lambda i, j: (0, j))],
        out_specs=pl.BlockSpec((tm, tv), lambda i, j: (i, j)),
        scratch_shapes=[pltpu.VMEM((tm, d), jnp.bfloat16)],
        compiler_params=_cparams("parallel", "arbitrary"),
    )(x, gain.reshape(1, d), emb, bias.reshape(1, vp))


# --------------------------- model definition ------------------------------ #

def init_params(key, vocab_size, dim_emb, num_layers, num_heads, ffn_hidden_dim):
    assert dim_emb % num_heads == 0
    dh = dim_emb // num_heads
    # Packed-head QKV / attention / out-proj layouts need lane-aligned heads.
    assert dh % 128 == 0, "head_dim must be a multiple of 128 for packed-head layout"
    vp = ((vocab_size + 127) // 128) * 128            # pad vocab for lane-dense tiles
    scale = 0.02
    keys = jax.random.split(key, 1 + 5 * num_layers)
    kit = iter(keys)

    def w(shape):
        return (jax.random.normal(next(kit), shape, jnp.float32) * scale
                ).astype(jnp.bfloat16)

    emb = jax.random.normal(next(kit), (vp, dim_emb), jnp.float32) * scale
    emb = emb.at[vocab_size:].set(0.0)                # padded rows unused
    proj_b = jnp.zeros((vp,), jnp.float32)
    proj_b = proj_b.at[vocab_size:].set(PAD_BIAS)     # mask padded vocab in-kernel
    params = {
        "emb": emb.astype(jnp.bfloat16),              # tied embedding / LM-head weight
        "proj_b": proj_b,                             # projection-head bias
        "norm_g": jnp.ones((dim_emb,), jnp.float32),
        "layers": [],
    }
    for _ in range(num_layers):
        params["layers"].append({
            "norm_attn_g": jnp.ones((dim_emb,), jnp.float32),
            # Fused [Wq | Wk | Wv] -> one (D, 3D) GEMM operand.  Head h of Q is
            # columns [h*dh:(h+1)*dh], K at D + h*dh, V at 2D + h*dh.
            "wqkv": w((dim_emb, 3 * dim_emb)),
            # Out-proj rows are the concatenated heads (matches (B,T,H*Dh) attn).
            "w_out": w((dim_emb, dim_emb)),
            "norm_ffn_g": jnp.ones((dim_emb,), jnp.float32),
            "w1a": w((dim_emb, ffn_hidden_dim)),
            "w1b": w((dim_emb, ffn_hidden_dim)),
            "w2": w((ffn_hidden_dim, dim_emb)),
        })
    return params


def llm_forward(params, tokens, *, num_heads, vocab_size):
    b, t = tokens.shape
    vp, d = params["emb"].shape

    # Token embedding (XLA gather); emb_dropout(p=0.0) == identity.
    # Residual stream is bf16 between kernels; f32 only inside VMEM accumulators.
    x = jnp.take(params["emb"], tokens, axis=0)                   # (B, T, D) bf16

    for layer in params["layers"]:
        # pre-norm + fused QKV projection -> packed (B, T, 3D)
        qkv = fused_rmsnorm_qkv(x, layer["norm_attn_g"], layer["wqkv"])
        # causal flash attention, output in (B, T, H*Dh) layout
        attn = flash_attention(qkv, num_heads)
        # output projection (accumulated over H*Dh chunks) + residual, fused
        x = fused_outproj_residual(attn, layer["w_out"], x)       # (B, T, D)
        # pre-norm + SwiGLU FFN + residual, fused; rows tiled over M = B*T
        x = fused_rmsnorm_swiglu_residual(
            x.reshape(b * t, d), layer["norm_ffn_g"],
            layer["w1a"], layer["w1b"], layer["w2"]).reshape(b, t, d)

    # final norm + tied projection head (weight = emb, bias); vocab padded to Vp,
    # padded entries carry a -1e9 bias so a fused softmax would also be correct.
    logits = fused_rmsnorm_lmhead(x.reshape(b * t, d), params["norm_g"],
                                  params["emb"], params["proj_b"])
    logits = logits.reshape(b, t, vp)
    if vp != vocab_size:
        logits = logits[..., :vocab_size]
    return logits


# --------------------------------- main ------------------------------------ #

if __name__ == "__main__":
    VOCAB = 256
    SEQ_LEN = 16
    DIM_EMB = 256          # 2 heads x head_dim 128 (packed-head layout needs dh % 128 == 0)
    NUM_LAYERS = 2
    NUM_HEADS = 2
    FFN_HIDDEN = 512
    BATCH = 2

    key = jax.random.PRNGKey(0)
    pkey, tkey = jax.random.split(key)
    params = init_params(pkey, VOCAB, DIM_EMB, NUM_LAYERS, NUM_HEADS, FFN_HIDDEN)
    tokens = jax.random.randint(tkey, (BATCH, SEQ_LEN), 0, VOCAB, dtype=jnp.int32)

    fwd = jax.jit(functools.partial(llm_forward, num_heads=NUM_HEADS,
                                    vocab_size=VOCAB))
    logits = jax.block_until_ready(fwd(params, tokens))

    assert logits.shape == (BATCH, SEQ_LEN, VOCAB)
    assert bool(jnp.all(jnp.isfinite(logits.astype(jnp.float32))))
    print("KERNEL_OK")
</pallas_src>

<mosaic_0001>
module attributes {stable_mosaic.version = 11 : i64} {
  func.func @_rmsnorm_qkv_kernel(%arg0: i32, %arg1: i32, %arg2: i32, %arg3: memref<1x16x256xbf16, #tpu.memory_space<vmem>>, %arg4: memref<1x256xf32, #tpu.memory_space<vmem>>, %arg5: memref<256x384xbf16, #tpu.memory_space<vmem>>, %arg6: memref<1x16x384xbf16, #tpu.memory_space<vmem>>, %arg7: memref<16x256xbf16, #tpu.memory_space<vmem>>) attributes {dimension_semantics = [#tpu.dimension_semantics<parallel>, #tpu.dimension_semantics<parallel>, #tpu.dimension_semantics<arbitrary>], iteration_bounds = array<i64: 2, 1, 2>, scalar_prefetch = 0 : i64, scratch_operands = 1 : i64, tpu.core_type = #tpu.core_type<tc>, window_params = [{transform_indices = @transform_0, window_bounds = array<i64: 1, 16, 256>}, {pipeline_mode = #tpu.pipeline_mode<synchronous>, transform_indices = @transform_1, window_bounds = array<i64: 1, 256>}, {transform_indices = @transform_2, window_bounds = array<i64: 256, 384>}, {transform_indices = @transform_3, window_bounds = array<i64: 1, 16, 384>}]} {
    %c0_i32 = arith.constant 0 : i32
    %0 = arith.cmpi eq, %arg2, %c0_i32 : i32
    %1 = arith.extui %0 : i1 to i32
    %c0_i32_0 = arith.constant 0 : i32
    %2 = arith.cmpi ne, %1, %c0_i32_0 : i32
    scf.if %2 {
      %c0_7 = arith.constant 0 : index
      %c0_8 = arith.constant 0 : index
      %c0_9 = arith.constant 0 : index
      %10 = vector.load %arg3[%c0_7, %c0_8, %c0_9] : memref<1x16x256xbf16, #tpu.memory_space<vmem>>, vector<1x16x256xbf16>
      %11 = vector.shape_cast %10 : vector<1x16x256xbf16> to vector<16x256xbf16>
      %12 = arith.extf %11 : vector<16x256xbf16> to vector<16x256xf32>
      %13 = arith.mulf %12, %12 : vector<16x256xf32>
      %cst_10 = arith.constant dense<0.000000e+00> : vector<16xf32>
      %14 = vector.multi_reduction <add>, %13, %cst_10 [1] : vector<16x256xf32> to vector<16xf32>
      %15 = vector.shape_cast %14 : vector<16xf32> to vector<16x1xf32>
      %cst_11 = arith.constant 2.560000e+02 : f32
      %16 = vector.broadcast %cst_11 : f32 to vector<16x1xf32>
      %17 = arith.divf %15, %16 : vector<16x1xf32>
      %cst_12 = arith.constant 9.99999997E-7 : f32
      %18 = vector.broadcast %cst_12 : f32 to vector<16x1xf32>
      %19 = arith.addf %17, %18 : vector<16x1xf32>
      %20 = math.rsqrt %19 : vector<16x1xf32>
      %21 = vector.broadcast %20 : vector<16x1xf32> to vector<16x256xf32>
      %22 = arith.mulf %12, %21 : vector<16x256xf32>
      %c0_13 = arith.constant 0 : index
      %c0_14 = arith.constant 0 : index
      %23 = vector.load %arg4[%c0_13, %c0_14] : memref<1x256xf32, #tpu.memory_space<vmem>>, vector<1x256xf32>
      %24 = vector.broadcast %23 : vector<1x256xf32> to vector<16x256xf32>
      %25 = arith.mulf %22, %24 : vector<16x256xf32>
      %26 = arith.truncf %25 : vector<16x256xf32> to vector<16x256xbf16>
      %c0_15 = arith.constant 0 : index
      %c0_16 = arith.constant 0 : index
      %27 = vector.load %arg7[%c0_15, %c0_16] : memref<16x256xbf16, #tpu.memory_space<vmem>>, vector<16x256xbf16>
      tpu.vector_store %arg7[%c0_15, %c0_16], %26 {strides = array<i32>} : memref<16x256xbf16, #tpu.memory_space<vmem>>, vector<16x256xbf16>,
    } else {
    }
    %c0 = arith.constant 0 : index
    %c0_1 = arith.constant 0 : index
    %3 = vector.load %arg7[%c0, %c0_1] : memref<16x256xbf16, #tpu.memory_space<vmem>>, vector<16x256xbf16>
    %c0_2 = arith.constant 0 : index
    %c0_3 = arith.constant 0 : index
    %4 = vector.load %arg5[%c0_2, %c0_3] : memref<256x384xbf16, #tpu.memory_space<vmem>>, vector<256x384xbf16>
    %cst = arith.constant dense<0.000000e+00> : vector<16x384xf32>
    %5 = tpu.matmul %3, %4, %cst {dimension_numbers = #tpu.dot_dimension_numbers<[1], [0], [0], [1], [0, 0, 1, 1], [], []>} : vector<16x256xbf16>, vector<256x384xbf16>, vector<16x384xf32> -> vector<16x384xf32>
    %6 = arith.truncf %5 : vector<16x384xf32> to vector<16x384xbf16>
    %c0_4 = arith.constant 0 : index
    %c0_5 = arith.constant 0 : index
    %c0_6 = arith.constant 0 : index
    %7 = vector.load %arg6[%c0_4, %c0_5, %c0_6] : memref<1x16x384xbf16, #tpu.memory_space<vmem>>, vector<1x16x384xbf16>
    %8 = vector.shape_cast %7 : vector<1x16x384xbf16> to vector<16x384xbf16>
    %9 = vector.shape_cast %6 : vector<16x384xbf16> to vector<1x16x384xbf16>
    tpu.vector_store %arg6[%c0_4, %c0_5, %c0_6], %9 {strides = array<i32>} : memref<1x16x384xbf16, #tpu.memory_space<vmem>>, vector<1x16x384xbf16>,
    return
  }
  func.func @transform_0(%arg0: i32, %arg1: i32, %arg2: i32) -> (i32, i32, i32) {
    %c0_i32 = arith.constant 0 : i32
    %c0_i32_0 = arith.constant 0 : i32
    return %arg0, %arg1, %c0_i32 : i32, i32, i32
  }
  func.func @transform_1(%arg0: i32, %arg1: i32, %arg2: i32) -> (i32, i32) {
    %c0_i32 = arith.constant 0 : i32
    %c0_i32_0 = arith.constant 0 : i32
    %c0_i32_1 = arith.constant 0 : i32
    return %c0_i32, %c0_i32_0 : i32, i32
  }
  func.func @transform_2(%arg0: i32, %arg1: i32, %arg2: i32) -> (i32, i32) {
    %c0_i32 = arith.constant 0 : i32
    %c0_i32_0 = arith.constant 0 : i32
    return %c0_i32, %arg2 : i32, i32
  }
  func.func @transform_3(%arg0: i32, %arg1: i32, %arg2: i32) -> (i32, i32, i32) {
    %c0_i32 = arith.constant 0 : i32
    return %arg0, %arg1, %arg2 : i32, i32, i32
  }
}

module attributes {stable_mosaic.version = 11 : i64} {
  func.func @_flash_attn_kernel(%arg0: i32, %arg1: i32, %arg2: i32, %arg3: i32, %arg4: memref<1x16x128xbf16, #tpu.memory_space<vmem>>, %arg5: memref<1x16x128xbf16, #tpu.memory_space<vmem>>, %arg6: memref<1x16x128xbf16, #tpu.memory_space<vmem>>, %arg7: memref<1x16x128xbf16, #tpu.memory_space<vmem>>, %arg8: memref<16x1xf32, #tpu.memory_space<vmem>>, %arg9: memref<16x1xf32, #tpu.memory_space<vmem>>, %arg10: memref<16x128xf32, #tpu.memory_space<vmem>>) attributes {dimension_semantics = [#tpu.dimension_semantics<parallel>, #tpu.dimension_semantics<parallel>, #tpu.dimension_semantics<parallel>, #tpu.dimension_semantics<arbitrary>], iteration_bounds = array<i64: 2, 2, 1, 1>, scalar_prefetch = 0 : i64, scratch_operands = 3 : i64, tpu.core_type = #tpu.core_type<tc>, window_params = [{transform_indices = @transform_0, window_bounds = array<i64: 1, 16, 128>}, {transform_indices = @transform_1, window_bounds = array<i64: 1, 16, 128>}, {transform_indices = @transform_2, window_bounds = array<i64: 1, 16, 128>}, {transform_indices = @transform_3, window_bounds = array<i64: 1, 16, 128>}]} {
    %c0_i32 = arith.constant 0 : i32
    %0 = arith.cmpi eq, %arg3, %c0_i32 : i32
    %1 = arith.extui %0 : i1 to i32
    %c0_i32_0 = arith.constant 0 : i32
    %2 = arith.cmpi ne, %1, %c0_i32_0 : i32
    scf.if %2 {
      %cst = arith.constant -1.000000e+30 : f32
      %12 = vector.broadcast %cst : f32 to vector<16x1xf32>
      %c0 = arith.constant 0 : index
      %c0_5 = arith.constant 0 : index
      %13 = vector.load %arg8[%c0, %c0_5] : memref<16x1xf32, #tpu.memory_space<vmem>>, vector<16x1xf32>
      tpu.vector_store %arg8[%c0, %c0_5], %12 {strides = array<i32>} : memref<16x1xf32, #tpu.memory_space<vmem>>, vector<16x1xf32>,
      %cst_6 = arith.constant 0.000000e+00 : f32
      %14 = vector.broadcast %cst_6 : f32 to vector<16x1xf32>
      %c0_7 = arith.constant 0 : index
      %c0_8 = arith.constant 0 : index
      %15 = vector.load %arg9[%c0_7, %c0_8] : memref<16x1xf32, #tpu.memory_space<vmem>>, vector<16x1xf32>
      tpu.vector_store %arg9[%c0_7, %c0_8], %14 {strides = array<i32>} : memref<16x1xf32, #tpu.memory_space<vmem>>, vector<16x1xf32>,
      %cst_9 = arith.constant 0.000000e+00 : f32
      %16 = vector.broadcast %cst_9 : f32 to vector<16x128xf32>
      %c0_10 = arith.constant 0 : index
      %c0_11 = arith.constant 0 : index
      %17 = vector.load %arg10[%c0_10, %c0_11] : memref<16x128xf32, #tpu.memory_space<vmem>>, vector<16x128xf32>
      tpu.vector_store %arg10[%c0_10, %c0_11], %16 {strides = array<i32>} : memref<16x128xf32, #tpu.memory_space<vmem>>, vector<16x128xf32>,
    } else {
    }
    %c16_i32 = arith.constant 16 : i32
    %3 = arith.muli %arg3, %c16_i32 : i32
    %c16_i32_1 = arith.constant 16 : i32
    %4 = arith.muli %arg2, %c16_i32_1 : i32
    %c15_i32 = arith.constant 15 : i32
    %5 = arith.addi %4, %c15_i32 : i32
    %6 = arith.cmpi sle, %3, %5 : i32
    %7 = arith.extui %6 : i1 to i32
    %c0_i32_2 = arith.constant 0 : i32
    %8 = arith.cmpi ne, %7, %c0_i32_2 : i32
    scf.if %8 {
      %c0 = arith.constant 0 : index
      %c0_5 = arith.constant 0 : index
      %c0_6 = arith.constant 0 : index
      %12 = vector.load %arg4[%c0, %c0_5, %c0_6] : memref<1x16x128xbf16, #tpu.memory_space<vmem>>, vector<1x16x128xbf16>
      %13 = vector.shape_cast %12 : vector<1x16x128xbf16> to vector<16x128xbf16>
      %c0_7 = arith.constant 0 : index
      %c0_8 = arith.constant 0 : index
      %c0_9 = arith.constant 0 : index
      %14 = vector.load %arg5[%c0_7, %c0_8, %c0_9] : memref<1x16x128xbf16, #tpu.memory_space<vmem>>, vector<1x16x128xbf16>
      %15 = vector.shape_cast %14 : vector<1x16x128xbf16> to vector<16x128xbf16>
      %c0_10 = arith.constant 0 : index
      %c0_11 = arith.constant 0 : index
      %c0_12 = arith.constant 0 : index
      %16 = vector.load %arg6[%c0_10, %c0_11, %c0_12] : memref<1x16x128xbf16, #tpu.memory_space<vmem>>, vector<1x16x128xbf16>
      %17 = vector.shape_cast %16 : vector<1x16x128xbf16> to vector<16x128xbf16>
      %cst = arith.constant dense<0.000000e+00> : vector<16x16xf32>
      %18 = tpu.matmul %13, %15, %cst {dimension_numbers = #tpu.dot_dimension_numbers<[1], [1], [0], [0], [0, 0, 1, 0], [], []>} : vector<16x128xbf16>, vector<16x128xbf16>, vector<16x16xf32> -> vector<16x16xf32>
      %cst_13 = arith.constant 0.0883883461 : f32
      %19 = vector.broadcast %cst_13 : f32 to vector<16x16xf32>
      %20 = arith.mulf %18, %19 : vector<16x16xf32>
      %c16_i32_14 = arith.constant 16 : i32
      %21 = arith.muli %arg2, %c16_i32_14 : i32
      %22 = tpu.iota {dimensions = array<i32: 0>} : vector<16x16xi32>
      %23 = vector.broadcast %21 : i32 to vector<16x16xi32>
      %24 = arith.addi %23, %22 : vector<16x16xi32>
      %c16_i32_15 = arith.constant 16 : i32
      %25 = arith.muli %arg3, %c16_i32_15 : i32
      %26 = tpu.iota {dimensions = array<i32: 1>} : vector<16x16xi32>
      %27 = vector.broadcast %25 : i32 to vector<16x16xi32>
      %28 = arith.addi %27, %26 : vector<16x16xi32>
      %29 = arith.cmpi sle, %28, %24 : vector<16x16xi32>
      %cst_16 = arith.constant -1.000000e+30 : f32
      %30 = vector.broadcast %cst_16 : f32 to vector<16x16xf32>
      %31 = arith.select %29, %20, %30 : vector<16x16xi1>, vector<16x16xf32>
      %c0_17 = arith.constant 0 : index
      %c0_18 = arith.constant 0 : index
      %32 = vector.load %arg8[%c0_17, %c0_18] : memref<16x1xf32, #tpu.memory_space<vmem>>, vector<16x1xf32>
      %cst_19 = arith.constant dense<0xFF800000> : vector<16xf32>
      %33 = vector.multi_reduction <maximumf>, %31, %cst_19 [1] : vector<16x16xf32> to vector<16xf32>
      %34 = vector.shape_cast %33 : vector<16xf32> to vector<16x1xf32>
      %35 = arith.maximumf %32, %34 : vector<16x1xf32>
      %36 = arith.subf %32, %35 : vector<16x1xf32>
      %37 = math.exp %36 : vector<16x1xf32>
      %38 = vector.broadcast %35 : vector<16x1xf32> to vector<16x16xf32>
      %39 = arith.subf %31, %38 : vector<16x16xf32>
      %40 = math.exp %39 : vector<16x16xf32>
      %c0_20 = arith.constant 0 : index
      %c0_21 = arith.constant 0 : index
      %41 = vector.load %arg9[%c0_20, %c0_21] : memref<16x1xf32, #tpu.memory_space<vmem>>, vector<16x1xf32>
      %42 = arith.mulf %37, %41 : vector<16x1xf32>
      %cst_22 = arith.constant dense<0.000000e+00> : vector<16xf32>
      %43 = vector.multi_reduction <add>, %40, %cst_22 [1] : vector<16x16xf32> to vector<16xf32>
      %44 = vector.shape_cast %43 : vector<16xf32> to vector<16x1xf32>
      %45 = arith.addf %42, %44 : vector<16x1xf32>
      %c0_23 = arith.constant 0 : index
      %c0_24 = arith.constant 0 : index
      %46 = vector.load %arg9[%c0_23, %c0_24] : memref<16x1xf32, #tpu.memory_space<vmem>>, vector<16x1xf32>
      tpu.vector_store %arg9[%c0_23, %c0_24], %45 {strides = array<i32>} : memref<16x1xf32, #tpu.memory_space<vmem>>, vector<16x1xf32>,
      %c0_25 = arith.constant 0 : index
      %c0_26 = arith.constant 0 : index
      %47 = vector.load %arg10[%c0_25, %c0_26] : memref<16x128xf32, #tpu.memory_space<vmem>>, vector<16x128xf32>
      %48 = vector.broadcast %37 : vector<16x1xf32> to vector<16x128xf32>
      %49 = arith.mulf %48, %47 : vector<16x128xf32>
      %50 = arith.truncf %40 : vector<16x16xf32> to vector<16x16xbf16>
      %cst_27 = arith.constant dense<0.000000e+00> : vector<16x128xf32>
      %51 = tpu.matmul %50, %17, %cst_27 {dimension_numbers = #tpu.dot_dimension_numbers<[1], [0], [0], [1], [0, 0, 1, 1], [], []>} : vector<16x16xbf16>, vector<16x128xbf16>, vector<16x128xf32> -> vector<16x128xf32>
      %52 = arith.addf %49, %51 : vector<16x128xf32>
      %c0_28 = arith.constant 0 : index
      %c0_29 = arith.constant 0 : index
      %53 = vector.load %arg10[%c0_28, %c0_29] : memref<16x128xf32, #tpu.memory_space<vmem>>, vector<16x128xf32>
      tpu.vector_store %arg10[%c0_28, %c0_29], %52 {strides = array<i32>} : memref<16x128xf32, #tpu.memory_space<vmem>>, vector<16x128xf32>,
      %c0_30 = arith.constant 0 : index
      %c0_31 = arith.constant 0 : index
      %54 = vector.load %arg8[%c0_30, %c0_31] : memref<16x1xf32, #tpu.memory_space<vmem>>, vector<16x1xf32>
      tpu.vector_store %arg8[%c0_30, %c0_31], %35 {strides = array<i32>} : memref<16x1xf32, #tpu.memory_space<vmem>>, vector<16x1xf32>,
    } else {
    }
    %c0_i32_3 = arith.constant 0 : i32
    %9 = arith.cmpi eq, %arg3, %c0_i32_3 : i32
    %10 = arith.extui %9 : i1 to i32
    %c0_i32_4 = arith.constant 0 : i32
    %11 = arith.cmpi ne, %10, %c0_i32_4 : i32
    scf.if %11 {
      %c0 = arith.constant 0 : index
      %c0_5 = arith.constant 0 : index
      %12 = vector.load %arg10[%c0, %c0_5] : memref<16x128xf32, #tpu.memory_space<vmem>>, vector<16x128xf32>
      %c0_6 = arith.constant 0 : index
      %c0_7 = arith.constant 0 : index
      %13 = vector.load %arg9[%c0_6, %c0_7] : memref<16x1xf32, #tpu.memory_space<vmem>>, vector<16x1xf32>
      %14 = tpu.reciprocal %13 {approx = true} : vector<16x1xf32> -> vector<16x1xf32>
      %15 = vector.broadcast %14 : vector<16x1xf32> to vector<16x128xf32>
      %16 = arith.mulf %12, %15 : vector<16x128xf32>
      %17 = arith.truncf %16 : vector<16x128xf32> to vector<16x128xbf16>
      %c0_8 = arith.constant 0 : index
      %c0_9 = arith.constant 0 : index
      %c0_10 = arith.constant 0 : index
      %18 = vector.load %arg7[%c0_8, %c0_9, %c0_10] : memref<1x16x128xbf16, #tpu.memory_space<vmem>>, vector<1x16x128xbf16>
      %19 = vector.shape_cast %18 : vector<1x16x128xbf16> to vector<16x128xbf16>
      %20 = vector.shape_cast %17 : vector<16x128xbf16> to vector<1x16x128xbf16>
      tpu.vector_store %arg7[%c0_8, %c0_9, %c0_10], %20 {strides = array<i32>} : memref<1x16x128xbf16, #tpu.memory_space<vmem>>, vector<1x16x128xbf16>,
    } else {
    }
    return
  }
  func.func @transform_0(%arg0: i32, %arg1: i32, %arg2: i32, %arg3: i32) -> (i32, i32, i32) {
    %c0_i32 = arith.constant 0 : i32
    return %arg0, %arg2, %arg1 : i32, i32, i32
  }
  func.func @transform_1(%arg0: i32, %arg1: i32, %arg2: i32, %arg3: i32) -> (i32, i32, i32) {
    %0 = arith.minsi %arg3, %arg2 : i32
    %c2_i32 = arith.constant 2 : i32
    %1 = arith.addi %c2_i32, %arg1 : i32
    %c0_i32 = arith.constant 0 : i32
    return %arg0, %0, %1 : i32, i32, i32
  }
  func.func @transform_2(%arg0: i32, %arg1: i32, %arg2: i32, %arg3: i32) -> (i32, i32, i32) {
    %0 = arith.minsi %arg3, %arg2 : i32
    %c4_i32 = arith.constant 4 : i32
    %1 = arith.addi %c4_i32, %arg1 : i32
    %c0_i32 = arith.constant 0 : i32
    return %arg0, %0, %1 : i32, i32, i32
  }
  func.func @transform_3(%arg0: i32, %arg1: i32, %arg2: i32, %arg3: i32) -> (i32, i32, i32) {
    %c0_i32 = arith.constant 0 : i32
    return %arg0, %arg2, %arg1 : i32, i32, i32
  }
}

module attributes {stable_mosaic.version = 11 : i64} {
  func.func @_outproj_residual_kernel(%arg0: i32, %arg1: i32, %arg2: i32, %arg3: memref<1x16x256xbf16, #tpu.memory_space<vmem>>, %arg4: memref<256x256xbf16, #tpu.memory_space<vmem>>, %arg5: memref<1x16x256xbf16, #tpu.memory_space<vmem>>, %arg6: memref<1x16x256xbf16, #tpu.memory_space<vmem>>, %arg7: memref<16x256xf32, #tpu.memory_space<vmem>>) attributes {dimension_semantics = [#tpu.dimension_semantics<parallel>, #tpu.dimension_semantics<parallel>, #tpu.dimension_semantics<arbitrary>], iteration_bounds = array<i64: 2, 1, 1>, scalar_prefetch = 0 : i64, scratch_operands = 1 : i64, tpu.core_type = #tpu.core_type<tc>, window_params = [{transform_indices = @transform_0, window_bounds = array<i64: 1, 16, 256>}, {transform_indices = @transform_1, window_bounds = array<i64: 256, 256>}, {transform_indices = @transform_2, window_bounds = array<i64: 1, 16, 256>}, {transform_indices = @transform_3, window_bounds = array<i64: 1, 16, 256>}]} {
    %c0_i32 = arith.constant 0 : i32
    %0 = arith.cmpi eq, %arg2, %c0_i32 : i32
    %1 = arith.extui %0 : i1 to i32
    %c0_i32_0 = arith.constant 0 : i32
    %2 = arith.cmpi ne, %1, %c0_i32_0 : i32
    scf.if %2 {
      %c0_11 = arith.constant 0 : index
      %c0_12 = arith.constant 0 : index
      %c0_13 = arith.constant 0 : index
      %13 = vector.load %arg5[%c0_11, %c0_12, %c0_13] : memref<1x16x256xbf16, #tpu.memory_space<vmem>>, vector<1x16x256xbf16>
      %14 = vector.shape_cast %13 : vector<1x16x256xbf16> to vector<16x256xbf16>
      %15 = arith.extf %14 : vector<16x256xbf16> to vector<16x256xf32>
      %c0_14 = arith.constant 0 : index
      %c0_15 = arith.constant 0 : index
      %16 = vector.load %arg7[%c0_14, %c0_15] : memref<16x256xf32, #tpu.memory_space<vmem>>, vector<16x256xf32>
      tpu.vector_store %arg7[%c0_14, %c0_15], %15 {strides = array<i32>} : memref<16x256xf32, #tpu.memory_space<vmem>>, vector<16x256xf32>,
    } else {
    }
    %c0 = arith.constant 0 : index
    %c0_1 = arith.constant 0 : index
    %3 = vector.load %arg7[%c0, %c0_1] : memref<16x256xf32, #tpu.memory_space<vmem>>, vector<16x256xf32>
    %c0_2 = arith.constant 0 : index
    %c0_3 = arith.constant 0 : index
    %c0_4 = arith.constant 0 : index
    %4 = vector.load %arg3[%c0_2, %c0_3, %c0_4] : memref<1x16x256xbf16, #tpu.memory_space<vmem>>, vector<1x16x256xbf16>
    %5 = vector.shape_cast %4 : vector<1x16x256xbf16> to vector<16x256xbf16>
    %c0_5 = arith.constant 0 : index
    %c0_6 = arith.constant 0 : index
    %6 = vector.load %arg4[%c0_5, %c0_6] : memref<256x256xbf16, #tpu.memory_space<vmem>>, vector<256x256xbf16>
    %cst = arith.constant dense<0.000000e+00> : vector<16x256xf32>
    %7 = tpu.matmul %5, %6, %cst {dimension_numbers = #tpu.dot_dimension_numbers<[1], [0], [0], [1], [0, 0, 1, 1], [], []>} : vector<16x256xbf16>, vector<256x256xbf16>, vector<16x256xf32> -> vector<16x256xf32>
    %8 = arith.addf %3, %7 : vector<16x256xf32>
    %c0_7 = arith.constant 0 : index
    %c0_8 = arith.constant 0 : index
    %9 = vector.load %arg7[%c0_7, %c0_8] : memref<16x256xf32, #tpu.memory_space<vmem>>, vector<16x256xf32>
    tpu.vector_store %arg7[%c0_7, %c0_8], %8 {strides = array<i32>} : memref<16x256xf32, #tpu.memory_space<vmem>>, vector<16x256xf32>,
    %c0_i32_9 = arith.constant 0 : i32
    %10 = arith.cmpi eq, %arg2, %c0_i32_9 : i32
    %11 = arith.extui %10 : i1 to i32
    %c0_i32_10 = arith.constant 0 : i32
    %12 = arith.cmpi ne, %11, %c0_i32_10 : i32
    scf.if %12 {
      %c0_11 = arith.constant 0 : index
      %c0_12 = arith.constant 0 : index
      %13 = vector.load %arg7[%c0_11, %c0_12] : memref<16x256xf32, #tpu.memory_space<vmem>>, vector<16x256xf32>
      %14 = arith.truncf %13 : vector<16x256xf32> to vector<16x256xbf16>
      %c0_13 = arith.constant 0 : index
      %c0_14 = arith.constant 0 : index
      %c0_15 = arith.constant 0 : index
      %15 = vector.load %arg6[%c0_13, %c0_14, %c0_15] : memref<1x16x256xbf16, #tpu.memory_space<vmem>>, vector<1x16x256xbf16>
      %16 = vector.shape_cast %15 : vector<1x16x256xbf16> to vector<16x256xbf16>
      %17 = vector.shape_cast %14 : vector<16x256xbf16> to vector<1x16x256xbf16>
      tpu.vector_store %arg6[%c0_13, %c0_14, %c0_15], %17 {strides = array<i32>} : memref<1x16x256xbf16, #tpu.memory_space<vmem>>, vector<1x16x256xbf16>,
    } else {
    }
    return
  }
  func.func @transform_0(%arg0: i32, %arg1: i32, %arg2: i32) -> (i32, i32, i32) {
    %c0_i32 = arith.constant 0 : i32
    return %arg0, %arg1, %arg2 : i32, i32, i32
  }
  func.func @transform_1(%arg0: i32, %arg1: i32, %arg2: i32) -> (i32, i32) {
    %c0_i32 = arith.constant 0 : i32
    %c0_i32_0 = arith.constant 0 : i32
    return %arg2, %c0_i32 : i32, i32
  }
  func.func @transform_2(%arg0: i32, %arg1: i32, %arg2: i32) -> (i32, i32, i32) {
    %c0_i32 = arith.constant 0 : i32
    %c0_i32_0 = arith.constant 0 : i32
    return %arg0, %arg1, %c0_i32 : i32, i32, i32
  }
  func.func @transform_3(%arg0: i32, %arg1: i32, %arg2: i32) -> (i32, i32, i32) {
    %c0_i32 = arith.constant 0 : i32
    %c0_i32_0 = arith.constant 0 : i32
    return %arg0, %arg1, %c0_i32 : i32, i32, i32
  }
}

module attributes {stable_mosaic.version = 11 : i64} {
  func.func @_rmsnorm_swiglu_kernel(%arg0: i32, %arg1: i32, %arg2: memref<32x256xbf16, #tpu.memory_space<vmem>>, %arg3: memref<1x256xf32, #tpu.memory_space<vmem>>, %arg4: memref<256x512xbf16, #tpu.memory_space<vmem>>, %arg5: memref<256x512xbf16, #tpu.memory_space<vmem>>, %arg6: memref<512x256xbf16, #tpu.memory_space<vmem>>, %arg7: memref<32x256xbf16, #tpu.memory_space<vmem>>, %arg8: memref<32x256xbf16, #tpu.memory_space<vmem>>, %arg9: memref<32x256xf32, #tpu.memory_space<vmem>>) attributes {dimension_semantics = [#tpu.dimension_semantics<parallel>, #tpu.dimension_semantics<arbitrary>], iteration_bounds = array<i64: 1, 1>, scalar_prefetch = 0 : i64, scratch_operands = 2 : i64, tpu.core_type = #tpu.core_type<tc>, window_params = [{transform_indices = @transform_0, window_bounds = array<i64: 32, 256>}, {pipeline_mode = #tpu.pipeline_mode<synchronous>, transform_indices = @transform_1, window_bounds = array<i64: 1, 256>}, {transform_indices = @transform_2, window_bounds = array<i64: 256, 512>}, {transform_indices = @transform_3, window_bounds = array<i64: 256, 512>}, {transform_indices = @transform_4, window_bounds = array<i64: 512, 256>}, {transform_indices = @transform_5, window_bounds = array<i64: 32, 256>}]} {
    %c0_i32 = arith.constant 0 : i32
    %0 = arith.cmpi eq, %arg1, %c0_i32 : i32
    %1 = arith.extui %0 : i1 to i32
    %c0_i32_0 = arith.constant 0 : i32
    %2 = arith.cmpi ne, %1, %c0_i32_0 : i32
    scf.if %2 {
      %c0_17 = arith.constant 0 : index
      %c0_18 = arith.constant 0 : index
      %24 = vector.load %arg2[%c0_17, %c0_18] : memref<32x256xbf16, #tpu.memory_space<vmem>>, vector<32x256xbf16>
      %25 = arith.extf %24 : vector<32x256xbf16> to vector<32x256xf32>
      %c0_19 = arith.constant 0 : index
      %c0_20 = arith.constant 0 : index
      %26 = vector.load %arg9[%c0_19, %c0_20] : memref<32x256xf32, #tpu.memory_space<vmem>>, vector<32x256xf32>
      tpu.vector_store %arg9[%c0_19, %c0_20], %25 {strides = array<i32>} : memref<32x256xf32, #tpu.memory_space<vmem>>, vector<32x256xf32>,
      %27 = arith.mulf %25, %25 : vector<32x256xf32>
      %cst_21 = arith.constant dense<0.000000e+00> : vector<32xf32>
      %28 = vector.multi_reduction <add>, %27, %cst_21 [1] : vector<32x256xf32> to vector<32xf32>
      %29 = vector.shape_cast %28 : vector<32xf32> to vector<32x1xf32>
      %cst_22 = arith.constant 2.560000e+02 : f32
      %30 = vector.broadcast %cst_22 : f32 to vector<32x1xf32>
      %31 = arith.divf %29, %30 : vector<32x1xf32>
      %cst_23 = arith.constant 9.99999997E-7 : f32
      %32 = vector.broadcast %cst_23 : f32 to vector<32x1xf32>
      %33 = arith.addf %31, %32 : vector<32x1xf32>
      %34 = math.rsqrt %33 : vector<32x1xf32>
      %35 = vector.broadcast %34 : vector<32x1xf32> to vector<32x256xf32>
      %36 = arith.mulf %25, %35 : vector<32x256xf32>
      %c0_24 = arith.constant 0 : index
      %c0_25 = arith.constant 0 : index
      %37 = vector.load %arg3[%c0_24, %c0_25] : memref<1x256xf32, #tpu.memory_space<vmem>>, vector<1x256xf32>
      %38 = vector.broadcast %37 : vector<1x256xf32> to vector<32x256xf32>
      %39 = arith.mulf %36, %38 : vector<32x256xf32>
      %40 = arith.truncf %39 : vector<32x256xf32> to vector<32x256xbf16>
      %c0_26 = arith.constant 0 : index
      %c0_27 = arith.constant 0 : index
      %41 = vector.load %arg8[%c0_26, %c0_27] : memref<32x256xbf16, #tpu.memory_space<vmem>>, vector<32x256xbf16>
      tpu.vector_store %arg8[%c0_26, %c0_27], %40 {strides = array<i32>} : memref<32x256xbf16, #tpu.memory_space<vmem>>, vector<32x256xbf16>,
    } else {
    }
    %c0 = arith.constant 0 : index
    %c0_1 = arith.constant 0 : index
    %3 = vector.load %arg8[%c0, %c0_1] : memref<32x256xbf16, #tpu.memory_space<vmem>>, vector<32x256xbf16>
    %c0_2 = arith.constant 0 : index
    %c0_3 = arith.constant 0 : index
    %4 = vector.load %arg4[%c0_2, %c0_3] : memref<256x512xbf16, #tpu.memory_space<vmem>>, vector<256x512xbf16>
    %cst = arith.constant dense<0.000000e+00> : vector<32x512xf32>
    %5 = tpu.matmul %3, %4, %cst {dimension_numbers = #tpu.dot_dimension_numbers<[1], [0], [0], [1], [0, 0, 1, 1], [], []>} : vector<32x256xbf16>, vector<256x512xbf16>, vector<32x512xf32> -> vector<32x512xf32>
    %c0_4 = arith.constant 0 : index
    %c0_5 = arith.constant 0 : index
    %6 = vector.load %arg5[%c0_4, %c0_5] : memref<256x512xbf16, #tpu.memory_space<vmem>>, vector<256x512xbf16>
    %cst_6 = arith.constant dense<0.000000e+00> : vector<32x512xf32>
    %7 = tpu.matmul %3, %6, %cst_6 {dimension_numbers = #tpu.dot_dimension_numbers<[1], [0], [0], [1], [0, 0, 1, 1], [], []>} : vector<32x256xbf16>, vector<256x512xbf16>, vector<32x512xf32> -> vector<32x512xf32>
    %8 = arith.negf %5 : vector<32x512xf32>
    %9 = math.exp %8 : vector<32x512xf32>
    %cst_7 = arith.constant 1.000000e+00 : f32
    %10 = vector.broadcast %cst_7 : f32 to vector<32x512xf32>
    %11 = arith.addf %10, %9 : vector<32x512xf32>
    %12 = arith.divf %10, %11 : vector<32x512xf32>
    %13 = arith.mulf %5, %12 : vector<32x512xf32>
    %14 = arith.mulf %13, %7 : vector<32x512xf32>
    %15 = arith.truncf %14 : vector<32x512xf32> to vector<32x512xbf16>
    %c0_8 = arith.constant 0 : index
    %c0_9 = arith.constant 0 : index
    %16 = vector.load %arg9[%c0_8, %c0_9] : memref<32x256xf32, #tpu.memory_space<vmem>>, vector<32x256xf32>
    %c0_10 = arith.constant 0 : index
    %c0_11 = arith.constant 0 : index
    %17 = vector.load %arg6[%c0_10, %c0_11] : memref<512x256xbf16, #tpu.memory_space<vmem>>, vector<512x256xbf16>
    %cst_12 = arith.constant dense<0.000000e+00> : vector<32x256xf32>
    %18 = tpu.matmul %15, %17, %cst_12 {dimension_numbers = #tpu.dot_dimension_numbers<[1], [0], [0], [1], [0, 0, 1, 1], [], []>} : vector<32x512xbf16>, vector<512x256xbf16>, vector<32x256xf32> -> vector<32x256xf32>
    %19 = arith.addf %16, %18 : vector<32x256xf32>
    %c0_13 = arith.constant 0 : index
    %c0_14 = arith.constant 0 : index
    %20 = vector.load %arg9[%c0_13, %c0_14] : memref<32x256xf32, #tpu.memory_space<vmem>>, vector<32x256xf32>
    tpu.vector_store %arg9[%c0_13, %c0_14], %19 {strides = array<i32>} : memref<32x256xf32, #tpu.memory_space<vmem>>, vector<32x256xf32>,
    %c0_i32_15 = arith.constant 0 : i32
    %21 = arith.cmpi eq, %arg1, %c0_i32_15 : i32
    %22 = arith.extui %21 : i1 to i32
    %c0_i32_16 = arith.constant 0 : i32
    %23 = arith.cmpi ne, %22, %c0_i32_16 : i32
    scf.if %23 {
      %c0_17 = arith.constant 0 : index
      %c0_18 = arith.constant 0 : index
      %24 = vector.load %arg9[%c0_17, %c0_18] : memref<32x256xf32, #tpu.memory_space<vmem>>, vector<32x256xf32>
      %25 = arith.truncf %24 : vector<32x256xf32> to vector<32x256xbf16>
      %c0_19 = arith.constant 0 : index
      %c0_20 = arith.constant 0 : index
      %26 = vector.load %arg7[%c0_19, %c0_20] : memref<32x256xbf16, #tpu.memory_space<vmem>>, vector<32x256xbf16>
      tpu.vector_store %arg7[%c0_19, %c0_20], %25 {strides = array<i32>} : memref<32x256xbf16, #tpu.memory_space<vmem>>, vector<32x256xbf16>,
    } else {
    }
    return
  }
  func.func @transform_0(%arg0: i32, %arg1: i32) -> (i32, i32) {
    %c0_i32 = arith.constant 0 : i32
    %c0_i32_0 = arith.constant 0 : i32
    return %arg0, %c0_i32 : i32, i32
  }
  func.func @transform_1(%arg0: i32, %arg1: i32) -> (i32, i32) {
    %c0_i32 = arith.constant 0 : i32
    %c0_i32_0 = arith.constant 0 : i32
    %c0_i32_1 = arith.constant 0 : i32
    return %c0_i32, %c0_i32_0 : i32, i32
  }
  func.func @transform_2(%arg0: i32, %arg1: i32) -> (i32, i32) {
    %c0_i32 = arith.constant 0 : i32
    %c0_i32_0 = arith.constant 0 : i32
    return %c0_i32, %arg1 : i32, i32
  }
  func.func @transform_3(%arg0: i32, %arg1: i32) -> (i32, i32) {
    %c0_i32 = arith.constant 0 : i32
    %c0_i32_0 = arith.constant 0 : i32
    return %c0_i32, %arg1 : i32, i32
  }
  func.func @transform_4(%arg0: i32, %arg1: i32) -> (i32, i32) {
    %c0_i32 = arith.constant 0 : i32
    %c0_i32_0 = arith.constant 0 : i32
    return %arg1, %c0_i32 : i32, i32
  }
  func.func @transform_5(%arg0: i32, %arg1: i32) -> (i32, i32) {
    %c0_i32 = arith.constant 0 : i32
    %c0_i32_0 = arith.constant 0 : i32
    return %arg0, %c0_i32 : i32, i32
  }
}

module attributes {stable_mosaic.version = 11 : i64} {
  func.func @_rmsnorm_qkv_kernel(%arg0: i32, %arg1: i32, %arg2: i32, %arg3: memref<1x16x256xbf16, #tpu.memory_space<vmem>>, %arg4: memref<1x256xf32, #tpu.memory_space<vmem>>, %arg5: memref<256x384xbf16, #tpu.memory_space<vmem>>, %arg6: memref<1x16x384xbf16, #tpu.memory_space<vmem>>, %arg7: memref<16x256xbf16, #tpu.memory_space<vmem>>) attributes {dimension_semantics = [#tpu.dimension_semantics<parallel>, #tpu.dimension_semantics<parallel>, #tpu.dimension_semantics<arbitrary>], iteration_bounds = array<i64: 2, 1, 2>, scalar_prefetch = 0 : i64, scratch_operands = 1 : i64, tpu.core_type = #tpu.core_type<tc>, window_params = [{transform_indices = @transform_0, window_bounds = array<i64: 1, 16, 256>}, {pipeline_mode = #tpu.pipeline_mode<synchronous>, transform_indices = @transform_1, window_bounds = array<i64: 1, 256>}, {transform_indices = @transform_2, window_bounds = array<i64: 256, 384>}, {transform_indices = @transform_3, window_bounds = array<i64: 1, 16, 384>}]} {
    %c0_i32 = arith.constant 0 : i32
    %0 = arith.cmpi eq, %arg2, %c0_i32 : i32
    %1 = arith.extui %0 : i1 to i32
    %c0_i32_0 = arith.constant 0 : i32
    %2 = arith.cmpi ne, %1, %c0_i32_0 : i32
    scf.if %2 {
      %c0_7 = arith.constant 0 : index
      %c0_8 = arith.constant 0 : index
      %c0_9 = arith.constant 0 : index
      %10 = vector.load %arg3[%c0_7, %c0_8, %c0_9] : memref<1x16x256xbf16, #tpu.memory_space<vmem>>, vector<1x16x256xbf16>
      %11 = vector.shape_cast %10 : vector<1x16x256xbf16> to vector<16x256xbf16>
      %12 = arith.extf %11 : vector<16x256xbf16> to vector<16x256xf32>
      %13 = arith.mulf %12, %12 : vector<16x256xf32>
      %cst_10 = arith.constant dense<0.000000e+00> : vector<16xf32>
      %14 = vector.multi_reduction <add>, %13, %cst_10 [1] : vector<16x256xf32> to vector<16xf32>
      %15 = vector.shape_cast %14 : vector<16xf32> to vector<16x1xf32>
      %cst_11 = arith.constant 2.560000e+02 : f32
      %16 = vector.broadcast %cst_11 : f32 to vector<16x1xf32>
      %17 = arith.divf %15, %16 : vector<16x1xf32>
      %cst_12 = arith.constant 9.99999997E-7 : f32
      %18 = vector.broadcast %cst_12 : f32 to vector<16x1xf32>
      %19 = arith.addf %17, %18 : vector<16x1xf32>
      %20 = math.rsqrt %19 : vector<16x1xf32>
      %21 = vector.broadcast %20 : vector<16x1xf32> to vector<16x256xf32>
      %22 = arith.mulf %12, %21 : vector<16x256xf32>
      %c0_13 = arith.constant 0 : index
      %c0_14 = arith.constant 0 : index
      %23 = vector.load %arg4[%c0_13, %c0_14] : memref<1x256xf32, #tpu.memory_space<vmem>>, vector<1x256xf32>
      %24 = vector.broadcast %23 : vector<1x256xf32> to vector<16x256xf32>
      %25 = arith.mulf %22, %24 : vector<16x256xf32>
      %26 = arith.truncf %25 : vector<16x256xf32> to vector<16x256xbf16>
      %c0_15 = arith.constant 0 : index
      %c0_16 = arith.constant 0 : index
      %27 = vector.load %arg7[%c0_15, %c0_16] : memref<16x256xbf16, #tpu.memory_space<vmem>>, vector<16x256xbf16>
      tpu.vector_store %arg7[%c0_15, %c0_16], %26 {strides = array<i32>} : memref<16x256xbf16, #tpu.memory_space<vmem>>, vector<16x256xbf16>,
    } else {
    }
    %c0 = arith.constant 0 : index
    %c0_1 = arith.constant 0 : index
    %3 = vector.load %arg7[%c0, %c0_1] : memref<16x256xbf16, #tpu.memory_space<vmem>>, vector<16x256xbf16>
    %c0_2 = arith.constant 0 : index
    %c0_3 = arith.constant 0 : index
    %4 = vector.load %arg5[%c0_2, %c0_3] : memref<256x384xbf16, #tpu.memory_space<vmem>>, vector<256x384xbf16>
    %cst = arith.constant dense<0.000000e+00> : vector<16x384xf32>
    %5 = tpu.matmul %3, %4, %cst {dimension_numbers = #tpu.dot_dimension_numbers<[1], [0], [0], [1], [0, 0, 1, 1], [], []>} : vector<16x256xbf16>, vector<256x384xbf16>, vector<16x384xf32> -> vector<16x384xf32>
    %6 = arith.truncf %5 : vector<16x384xf32> to vector<16x384xbf16>
    %c0_4 = arith.constant 0 : index
    %c0_5 = arith.constant 0 : index
    %c0_6 = arith.constant 0 : index
    %7 = vector.load %arg6[%c0_4, %c0_5, %c0_6] : memref<1x16x384xbf16, #tpu.memory_space<vmem>>, vector<1x16x384xbf16>
    %8 = vector.shape_cast %7 : vector<1x16x384xbf16> to vector<16x384xbf16>
    %9 = vector.shape_cast %6 : vector<16x384xbf16> to vector<1x16x384xbf16>
    tpu.vector_store %arg6[%c0_4, %c0_5, %c0_6], %9 {strides = array<i32>} : memref<1x16x384xbf16, #tpu.memory_space<vmem>>, vector<1x16x384xbf16>,
    return
  }
  func.func @transform_0(%arg0: i32, %arg1: i32, %arg2: i32) -> (i32, i32, i32) {
    %c0_i32 = arith.constant 0 : i32
    %c0_i32_0 = arith.constant 0 : i32
    return %arg0, %arg1, %c0_i32 : i32, i32, i32
  }
  func.func @transform_1(%arg0: i32, %arg1: i32, %arg2: i32) -> (i32, i32) {
    %c0_i32 = arith.constant 0 : i32
    %c0_i32_0 = arith.constant 0 : i32
    %c0_i32_1 = arith.constant 0 : i32
    return %c0_i32, %c0_i32_0 : i32, i32
  }
  func.func @transform_2(%arg0: i32, %arg1: i32, %arg2: i32) -> (i32, i32) {
    %c0_i32 = arith.constant 0 : i32
    %c0_i32_0 = arith.constant 0 : i32
    return %c0_i32, %arg2 : i32, i32
  }
  func.func @transform_3(%arg0: i32, %arg1: i32, %arg2: i32) -> (i32, i32, i32) {
    %c0_i32 = arith.constant 0 : i32
    return %arg0, %arg1, %arg2 : i32, i32, i32
  }
}

module attributes {stable_mosaic.version = 11 : i64} {
  func.func @_rmsnorm_lmhead_kernel(%arg0: i32, %arg1: i32, %arg2: memref<32x256xbf16, #tpu.memory_space<vmem>>, %arg3: memref<1x256xf32, #tpu.memory_space<vmem>>, %arg4: memref<256x256xbf16, #tpu.memory_space<vmem>>, %arg5: memref<1x256xf32, #tpu.memory_space<vmem>>, %arg6: memref<32x256xbf16, #tpu.memory_space<vmem>>, %arg7: memref<32x256xbf16, #tpu.memory_space<vmem>>) attributes {dimension_semantics = [#tpu.dimension_semantics<parallel>, #tpu.dimension_semantics<arbitrary>], iteration_bounds = array<i64: 1, 1>, scalar_prefetch = 0 : i64, scratch_operands = 1 : i64, tpu.core_type = #tpu.core_type<tc>, window_params = [{transform_indices = @transform_0, window_bounds = array<i64: 32, 256>}, {pipeline_mode = #tpu.pipeline_mode<synchronous>, transform_indices = @transform_1, window_bounds = array<i64: 1, 256>}, {transform_indices = @transform_2, window_bounds = array<i64: 256, 256>}, {transform_indices = @transform_3, window_bounds = array<i64: 1, 256>}, {transform_indices = @transform_4, window_bounds = array<i64: 32, 256>}]} {
    %c0_i32 = arith.constant 0 : i32
    %0 = arith.cmpi eq, %arg1, %c0_i32 : i32
    %1 = arith.extui %0 : i1 to i32
    %c0_i32_0 = arith.constant 0 : i32
    %2 = arith.cmpi ne, %1, %c0_i32_0 : i32
    scf.if %2 {
      %c0_8 = arith.constant 0 : index
      %c0_9 = arith.constant 0 : index
      %11 = vector.load %arg2[%c0_8, %c0_9] : memref<32x256xbf16, #tpu.memory_space<vmem>>, vector<32x256xbf16>
      %12 = arith.extf %11 : vector<32x256xbf16> to vector<32x256xf32>
      %13 = arith.mulf %12, %12 : vector<32x256xf32>
      %cst_10 = arith.constant dense<0.000000e+00> : vector<32xf32>
      %14 = vector.multi_reduction <add>, %13, %cst_10 [1] : vector<32x256xf32> to vector<32xf32>
      %15 = vector.shape_cast %14 : vector<32xf32> to vector<32x1xf32>
      %cst_11 = arith.constant 2.560000e+02 : f32
      %16 = vector.broadcast %cst_11 : f32 to vector<32x1xf32>
      %17 = arith.divf %15, %16 : vector<32x1xf32>
      %cst_12 = arith.constant 9.99999997E-7 : f32
      %18 = vector.broadcast %cst_12 : f32 to vector<32x1xf32>
      %19 = arith.addf %17, %18 : vector<32x1xf32>
      %20 = math.rsqrt %19 : vector<32x1xf32>
      %21 = vector.broadcast %20 : vector<32x1xf32> to vector<32x256xf32>
      %22 = arith.mulf %12, %21 : vector<32x256xf32>
      %c0_13 = arith.constant 0 : index
      %c0_14 = arith.constant 0 : index
      %23 = vector.load %arg3[%c0_13, %c0_14] : memref<1x256xf32, #tpu.memory_space<vmem>>, vector<1x256xf32>
      %24 = vector.broadcast %23 : vector<1x256xf32> to vector<32x256xf32>
      %25 = arith.mulf %22, %24 : vector<32x256xf32>
      %26 = arith.truncf %25 : vector<32x256xf32> to vector<32x256xbf16>
      %c0_15 = arith.constant 0 : index
      %c0_16 = arith.constant 0 : index
      %27 = vector.load %arg7[%c0_15, %c0_16] : memref<32x256xbf16, #tpu.memory_space<vmem>>, vector<32x256xbf16>
      tpu.vector_store %arg7[%c0_15, %c0_16], %26 {strides = array<i32>} : memref<32x256xbf16, #tpu.memory_space<vmem>>, vector<32x256xbf16>,
    } else {
    }
    %c0 = arith.constant 0 : index
    %c0_1 = arith.constant 0 : index
    %3 = vector.load %arg7[%c0, %c0_1] : memref<32x256xbf16, #tpu.memory_space<vmem>>, vector<32x256xbf16>
    %c0_2 = arith.constant 0 : index
    %c0_3 = arith.constant 0 : index
    %4 = vector.load %arg4[%c0_2, %c0_3] : memref<256x256xbf16, #tpu.memory_space<vmem>>, vector<256x256xbf16>
    %cst = arith.constant dense<0.000000e+00> : vector<32x256xf32>
    %5 = tpu.matmul %3, %4, %cst {dimension_numbers = #tpu.dot_dimension_numbers<[1], [1], [0], [0], [0, 0, 1, 0], [], []>} : vector<32x256xbf16>, vector<256x256xbf16>, vector<32x256xf32> -> vector<32x256xf32>
    %c0_4 = arith.constant 0 : index
    %c0_5 = arith.constant 0 : index
    %6 = vector.load %arg5[%c0_4, %c0_5] : memref<1x256xf32, #tpu.memory_space<vmem>>, vector<1x256xf32>
    %7 = vector.broadcast %6 : vector<1x256xf32> to vector<32x256xf32>
    %8 = arith.addf %5, %7 : vector<32x256xf32>
    %9 = arith.truncf %8 : vector<32x256xf32> to vector<32x256xbf16>
    %c0_6 = arith.constant 0 : index
    %c0_7 = arith.constant 0 : index
    %10 = vector.load %arg6[%c0_6, %c0_7] : memref<32x256xbf16, #tpu.memory_space<vmem>>, vector<32x256xbf16>
    tpu.vector_store %arg6[%c0_6, %c0_7], %9 {strides = array<i32>} : memref<32x256xbf16, #tpu.memory_space<vmem>>, vector<32x256xbf16>,
    return
  }
  func.func @transform_0(%arg0: i32, %arg1: i32) -> (i32, i32) {
    %c0_i32 = arith.constant 0 : i32
    %c0_i32_0 = arith.constant 0 : i32
    return %arg0, %c0_i32 : i32, i32
  }
  func.func @transform_1(%arg0: i32, %arg1: i32) -> (i32, i32) {
    %c0_i32 = arith.constant 0 : i32
    %c0_i32_0 = arith.constant 0 : i32
    %c0_i32_1 = arith.constant 0 : i32
    return %c0_i32, %c0_i32_0 : i32, i32
  }
  func.func @transform_2(%arg0: i32, %arg1: i32) -> (i32, i32) {
    %c0_i32 = arith.constant 0 : i32
    %c0_i32_0 = arith.constant 0 : i32
    return %arg1, %c0_i32 : i32, i32
  }
  func.func @transform_3(%arg0: i32, %arg1: i32) -> (i32, i32) {
    %c0_i32 = arith.constant 0 : i32
    %c0_i32_0 = arith.constant 0 : i32
    return %c0_i32, %arg1 : i32, i32
  }
  func.func @transform_4(%arg0: i32, %arg1: i32) -> (i32, i32) {
    %c0_i32 = arith.constant 0 : i32
    return %arg0, %arg1 : i32, i32
  }
}

</mosaic_0001>

<bundles_post_ra>
// kernel: llm_forward.11
= control target key start
LH: loop header
LB: loop body
LE: loop exit
PB: predicated region body
PF: predicated region fallthrough
CT: control target
= control target key end

     0   :  { %s908_s12 = smov 0   ;;  %s910_s13 = smov 0   ;;  %s1049_s0 = inlined_call_operand.vmem [shape: bf16[2,16,256], index: 0, kind: input, shape index: {}]   ;;  %s1050_s1 = inlined_call_operand.vmem [shape: bf16[256,256], index: 1, kind: input, shape index: {}]   ;;  %s1051_s2 = inlined_call_operand.vmem [shape: bf16[2,16,256], index: 2, kind: input, shape index: {}]   ;;  %s1052_s3 = inlined_call_operand.vmem [shape: bf16[2,16,256], index: 3, kind: output, shape index: {}]  }
   0x1   :  { %s912_s14 = smov 0  }
   0x2 LB: > { %s32_s15 = sadd.s32 1, %s882_s13  ;;  %p739_p0 = scmp.ge.s32.totalorder %s886_s14, 1  ;;  %s886_s14 = sphi %s912_s14, %s13_s14   ;;  %s882_s13 = sphi %s910_s13, %s1054_s13   ;;  %s878_s12 = sphi %s908_s12, %s1053_s12  }
   0x3   : > { %p34_p1 = scmp.ge.s32.totalorder %s32_s15, 2  ;;  %p203_p2 = scmp.lt.s32.totalorder %s886_s14, 3 }
   0x5   : > { %s1056_s15 = smov (%p34_p1, %s32_s15), 0  ;;  %p204_p3 = pnand %p739_p0, %p203_p2 }
   0x6   : > { %p259_p4 = scmp.lt.s32.totalorder (!%p204_p3), %s878_s12, 1 }
   0x7   : > { %207 = sbr.rel (%p204_p3) target bundleno = 281 (0x119), region = 32 }
   0xc   : > { %v813_v0 = vld [vmem:[%s1050_s1 + $0x74] ss:$8 sps:$4 sm:$0xff]   ;;  %v815_v1 = vld [vmem:[%s1050_s1 + $0x70] ss:$8 sps:$4 sm:$0xff]   ;;  %v816_v2 = vld [vmem:[%s1050_s1 + $0x64] ss:$8 sps:$4 sm:$0xff]  }
   0xd   : > { %524 = vmatprep.subr.bf16.mxu0 %v813_v0  ;;  %v818_v3 = vld [vmem:[%s1050_s1 + $0x60] ss:$8 sps:$4 sm:$0xff]   ;;  %v819_v4 = vld [vmem:[%s1050_s1 + $0x54] ss:$8 sps:$4 sm:$0xff]   ;;  %v821_v5 = vld [vmem:[%s1050_s1 + $0x50] ss:$8 sps:$4 sm:$0xff]  }
   0xe   : > { %525 = vmatpush1.bf16.msra.mxu0 %v815_v1  ;;  %v822_v6 = vld [vmem:[%s1050_s1 + $0x44] ss:$8 sps:$4 sm:$0xff]   ;;  %v824_v7 = vld [vmem:[%s1050_s1 + $0x40] ss:$8 sps:$4 sm:$0xff]   ;;  %v825_v8 = vld [vmem:[%s1050_s1 + $0x34] ss:$8 sps:$4 sm:$0xff]  }
   0xf   : > { %526 = vmatprep.subr.bf16.mxu0 %v816_v2  ;;  %s1058_s12 = smov (!%p259_p4, %s878_s12), 1  ;;  %v827_v9 = vld [vmem:[%s1050_s1 + $0x30] ss:$8 sps:$4 sm:$0xff]   ;;  %v828_v10 = vld [vmem:[%s1050_s1 + $0x24] ss:$8 sps:$4 sm:$0xff]  }
  0x10   : > { %s959_s11 = sshll.u32 %s1058_s12, 4  ;;  %v830_v11 = vld [vmem:[%s1050_s1 + $0x20] ss:$8 sps:$4 sm:$0xff]   ;;  %v831_v12 = vld [vmem:[%s1050_s1 + $0x14] ss:$8 sps:$4 sm:$0xff]  }
  0x11   : > { %s968_s20 = scalar_lea.vmem %s1049_s0, %s959_s11  ;;  %v833_v14 = vld [vmem:[%s1050_s1 + $0x10] ss:$8 sps:$4 sm:$0xff]   ;;  %v834_v15 = vld [vmem:[%s1050_s1 + $0x4] ss:$8 sps:$4 sm:$0xff]   ;;  %v836_v16 = vld [vmem:[%s1050_s1] ss:$8 sps:$4 sm:$0xff]   ;;  %s289_s18 = scalar_lea.vmem %s1051_s2, %s959_s11 }
  0x12   : > { %527 = vmatpush1.bf16.msra.mxu0 %v818_v3  ;;  %v863_v13 = vld [vmem:[%s968_s20 + $0x4] ss:$8 sps:$4 sm:$0xff]   ;;  %v837_v17 = vld [vmem:[%s1050_s1 + $0xf4] ss:$8 sps:$4 sm:$0xff]   ;;  %v839_v18 = vld [vmem:[%s1050_s1 + $0xf0] ss:$8 sps:$4 sm:$0xff]  }
  0x13   : > { %528 = vmatprep.subr.bf16.mxu0 %v819_v4  ;;  %556 = vmatprep.mubr.bf16.mxu0 %v863_v13  ;;  %v840_v19 = vld [vmem:[%s1050_s1 + $0xe4] ss:$8 sps:$4 sm:$0xff]   ;;  %v842_v20 = vld [vmem:[%s1050_s1 + $0xe0] ss:$8 sps:$4 sm:$0xff]   ;;  %v843_v21 = vld [vmem:[%s1050_s1 + $0xd4] ss:$8 sps:$4 sm:$0xff]  }
  0x14   : > { %v845_v22 = vld [vmem:[%s1050_s1 + $0xd0] ss:$8 sps:$4 sm:$0xff]   ;;  %v846_v23 = vld [vmem:[%s1050_s1 + $0xc4] ss:$8 sps:$4 sm:$0xff]   ;;  %v848_v24 = vld [vmem:[%s1050_s1 + $0xc0] ss:$8 sps:$4 sm:$0xff]  }
  0x15   : > { %v849_v25 = vld [vmem:[%s1050_s1 + $0xb4] ss:$8 sps:$4 sm:$0xff]   ;;  %v851_v26 = vld [vmem:[%s1050_s1 + $0xb0] ss:$8 sps:$4 sm:$0xff]   ;;  %v852_v27 = vld [vmem:[%s1050_s1 + $0xa4] ss:$8 sps:$4 sm:$0xff]  }
  0x16   : > { %529 = vmatpush1.bf16.msra.mxu0 %v821_v5  ;;  %v854_v28 = vld [vmem:[%s1050_s1 + $0xa0] ss:$8 sps:$4 sm:$0xff]   ;;  %v855_v29 = vld [vmem:[%s1050_s1 + $0x94] ss:$8 sps:$4 sm:$0xff]   ;;  %v857_v30 = vld [vmem:[%s1050_s1 + $0x90] ss:$8 sps:$4 sm:$0xff]  }
  0x17   : > { %530 = vmatprep.subr.bf16.mxu0 %v822_v6  ;;  %v858_v31 = vld [vmem:[%s1050_s1 + $0x84] ss:$8 sps:$4 sm:$0xff]   ;;  %v860_v32 = vld [vmem:[%s1050_s1 + $0x80] ss:$8 sps:$4 sm:$0xff]  }
  0x18   : > { %v861_v33 = vld [vmem:[%s968_s20] ss:$8 sps:$4 sm:$0xff]   ;;  %s300_s20 = scalar_lea.vmem %s1052_s3, %s959_s11 }
  0x19   : > { %v306_v34 = vld [vmem:[%s289_s18] sm:$0xff]  ;;  %v307_v38 = vld [vmem:[%s289_s18 + $0x8] sm:$0xff] }
  0x1a   : > { %531 = vmatpush1.bf16.msra.mxu0 %v824_v7  ;;  %v308_v35 = vunpack.c.l.bf16 %v306_v34  ;;  %v309_v36 = vunpack.c.h.bf16 %v306_v34  ;;  %v310_v42 = vunpack.c.l.bf16 %v307_v38  ;;  %v311_v43 = vunpack.c.h.bf16 %v307_v38 }
  0x1b   : > { %532 = vmatprep.subr.bf16.mxu0 %v825_v8 }
  0x1e   : > { %533 = vmatpush1.bf16.msra.mxu0 %v827_v9 }
  0x1f   : > { %534 = vmatprep.subr.bf16.mxu0 %v828_v10 }
  0x22   : > { %535 = vmatpush1.bf16.msra.mxu0 %v830_v11 }
  0x23   : > { %536 = vmatprep.subr.bf16.mxu0 %v831_v12 }
  0x26   : > { %537 = vmatpush1.bf16.msra.mxu0 %v833_v14 }
  0x27   : > { %538 = vmatprep.subr.bf16.mxu0 %v834_v15 }
  0x2a   : > { %539 = vmatpush1.bf16.msra.mxu0 %v836_v16 }
  0x2b   : > { %540 = vmatprep.subr.bf16.mxu0 %v837_v17 }
  0x2e   : > { %541 = vmatpush2.bf16.msra.mxu0 %v839_v18 }
  0x2f   : > { %542 = vmatprep.subr.bf16.mxu0 %v840_v19 }
  0x32   : > { %543 = vmatpush2.bf16.msra.mxu0 %v842_v20 }
  0x33   : > { %544 = vmatprep.subr.bf16.mxu0 %v843_v21 }
  0x36   : > { %545 = vmatpush2.bf16.msra.mxu0 %v845_v22 }
  0x37   : > { %546 = vmatprep.subr.bf16.mxu0 %v846_v23 }
  0x3a   : > { %547 = vmatpush2.bf16.msra.mxu0 %v848_v24 }
  0x3b   : > { %548 = vmatprep.subr.bf16.mxu0 %v849_v25 }
  0x3e   : > { %549 = vmatpush2.bf16.msra.mxu0 %v851_v26 }
  0x3f   : > { %550 = vmatprep.subr.bf16.mxu0 %v852_v27 }
  0x42   : > { %551 = vmatpush2.bf16.msra.mxu0 %v854_v28 }
  0x43   : > { %552 = vmatprep.subr.bf16.mxu0 %v855_v29 }
  0x46   : > { %553 = vmatpush2.bf16.msra.mxu0 %v857_v30 }
  0x47   : > { %554 = vmatprep.subr.bf16.mxu0 %v858_v31 }
  0x4a   : > { %555 = vmatpush2.bf16.msra.mxu0 %v860_v32 }
  0x4d   : > { %557 = vmatmul.mubr.bf16.vlgmr.msra.gmra.mxu0 %v861_v33 }
 0x10d   : > { %v558_v37 = vpop.f32.mrf.mxu0 }
 0x10e   : > { %v567_v40 = vadd.f32 %v558_v37, %v308_v35 }
 0x10f   : > { %v560_v39 = vpop.f32.mrf.mxu0 }
 0x110   : > { %v568_v41 = vadd.f32 %v560_v39, %v309_v36 }
 0x111   : > { %v562_v44 = vpop.f32.mrf.mxu0 }
 0x112   : > { %v787_v45 = vpack.c.bf16 %v568_v41, %v567_v40  ;;  %v569_v47 = vadd.f32 %v562_v44, %v310_v42 }
 0x113   : > { %v564_v46 = vpop.f32.mrf.mxu0 }
 0x114   : > { %594 = vst [vmem:[%s300_s20] sm:$0xff] %v787_v45  ;;  %v570_v48 = vadd.f32 %v564_v46, %v311_v43 }
 0x116   : > { %v788_v49 = vpack.c.bf16 %v570_v48, %v569_v47 }
 0x118   : > { %595 = vst [vmem:[%s300_s20 + $0x8] sm:$0xff] %v788_v49 }
 0x119 PF: > { %s13_s14 = sadd.s32 1, %s886_s14   ;;  %s1053_s12 = smov %s882_s13 }
 0x11a   : > { %p10_p5 = scmp.ge.s32.totalorder %s13_s14, 4   ;;  %s1054_s13 = smov %s1056_s15 }
 0x11c   :  { %12 = sbr.rel (!%p10_p5) target bundleno = 2 (0x2), region = 76 }

// kernel: llm_forward.10
= control target key start
LH: loop header
LB: loop body
LE: loop exit
PB: predicated region body
PF: predicated region fallthrough
CT: control target
= control target key end

     0   :  { %s1344_s0 = inlined_call_operand.vmem [shape: bf16[2,16,768], index: 0, kind: input, shape index: {}, may-alias: {0,1,2}]   ;;  %s1345_s1 = inlined_call_operand.vmem [shape: bf16[2,16,768], index: 1, kind: input, shape index: {}, may-alias: {0,1,2}]   ;;  %s1346_s2 = inlined_call_operand.vmem [shape: bf16[2,16,768], index: 2, kind: input, shape index: {}, may-alias: {0,1,2}]   ;;  %s1347_s3 = inlined_call_operand.vmem [shape: bf16[2,16,256], index: 3, kind: output, shape index: {}]  }
   0x1   :  { %1350 = sst [smem:[#allocation12_spill]] %s1347_s3 }
   0x2   :  { %s1137_s12 = smov 0   ;;  %s1139_s13 = smov 0  }
   0x3   :  { %s1141_s14 = smov 0   ;;  %s1143_s15 = smov 0  }
   0x4   :  { %s1145_s16 = smov 0   ;;  %s1147_s17 = smov 0  }
   0x5   :  { %s1149_s18 = smov 0   ;;  %s1151_s19 = smov 0  }
   0x6   :  { %s1153_s20 = smov 0   ;;  %s1155_s21 = smov 0  }
   0x7   :  { %s1157_s22 = smov 0  }
   0x8 LB: > { %s35_s24 = sadd.s32 1, %s1103_s20  ;;  %s39_s25 = sadd.s32 1, %s1107_s21  ;;  %s1111_s22 = sphi %s1157_s22, %s13_s22   ;;  %s1107_s21 = sphi %s1155_s21, %s1372_s21   ;;  %s1103_s20 = sphi %s1153_s20, %s1371_s20   ;;  %s1099_s19 = sphi %s1151_s19, %s1370_s19   ;;  %s1095_s18 = sphi %s1149_s18, %s1369_s18   ;;  %s1091_s17 = sphi %s1147_s17, %s1368_s17   ;;  %s1087_s16 = sphi %s1145_s16, %s1367_s16   ;;  %s1083_s15 = sphi %s1143_s15, %s1366_s15   ;;  %s1079_s14 = sphi %s1141_s14, %s1365_s14   ;;  %s1075_s13 = sphi %s1139_s13, %s1364_s13   ;;  %s1071_s12 = sphi %s1137_s12, %s1363_s12  }
   0x9   : > { %p37_p0 = scmp.ge.s32.totalorder %s35_s24, 2  ;;  %s50_s26 = sadd.s32 1, %s1091_s17 }
   0xa   : > { %p57_p1 = scmp.ne.s32.totalorder %s1091_s17, %s1087_s16  ;;  %p58_p2 = scmp.eq.s32.totalorder %s1111_s22, 0 }
   0xb   : > { %s1374_s24 = smov (%p37_p0, %s35_s24), 0  ;;  %s1376_s25 = smov (!%p37_p0, %s39_s25), %s1107_s21 }
   0xc   : > { %1351 = sst [smem:[#allocation9_spill]] %s1374_s24  ;;  %s46_s27 = ssub.s32 %s1103_s20, %s1374_s24 }
   0xd   : > { %p41_p3 = scmp.ge.s32.totalorder %s1376_s25, 2  ;;  %s75_s28 = sadd.s32 2, %s1103_s20 }
   0xe   : > { %p1210_p4 = por %p58_p2, %p57_p1  ;;  %s78_s30 = sadd.s32 2, %s1374_s24 }
   0xf   : > { %s1378_s25 = smov (%p41_p3, %s1376_s25), 0  ;;  %s82_s4 = ssub.s32 %s75_s28, %s78_s30 }
  0x10   : > { %1353 = sst [smem:[#allocation10_spill]] %s1378_s25  ;;  %s86_s5 = sadd.s32 1, %s1083_s15 }
  0x11   : > { %s43_s6 = ssub.s32 %s1107_s21, %s1378_s25  ;;  %p93_p5 = scmp.ne.s32.totalorder %s1083_s15, %s1079_s14 }
  0x12   : > { %s47_s7 = sor.u32 %s46_s27, %s43_s6  ;;  %s83_s8 = sor.u32 %s82_s4, %s43_s6 }
  0x13   : > { %p48_p6 = scmp.eq.s32.totalorder %s47_s7, 0  ;;  %p84_p7 = scmp.eq.s32.totalorder %s83_s8, 0 }
  0x14   : > { %p1224_p8 = por %p93_p5, %p58_p2  ;;  %s111_s10 = sadd.s32 4, %s1103_s20 }
  0x15   : > { %s1230_s11 = scalar_select %p48_p6, %s1091_s17, %s50_s26  }
  0x16   : > { %s1233_s28 = scalar_select %p84_p7, %s1083_s15, %s86_s5  }
  0x17   : > { %1355 = sst [smem:[#allocation11_spill]] %s1230_s11  ;;  %s114_s30 = sadd.s32 4, %s1374_s24 }
  0x18   : > { %s122_s23 = sadd.s32 1, %s1075_s13  ;;  %s118_s25 = ssub.s32 %s111_s10, %s114_s30 }
  0x19   : > { %p129_p9 = scmp.ne.s32.totalorder %s1075_s13, %s1071_s12  ;;  %s119_s27 = sor.u32 %s118_s25, %s43_s6 }
  0x1a   : > { %s1356_s3 = sadd.s32 4294967295, %s1111_s22   ;;  %p120_p11 = scmp.eq.s32.totalorder %s119_s27, 0 }
  0x1b   : > { %p163_p10 = scmp.eq.s32.totalorder %s1356_s3, 3  ;;  %p1243_p12 = por %p129_p9, %p58_p2 }
  0x1c   : > { %s1255_s26 = scalar_select %p120_p11, %s1075_s13, %s122_s23  }
  0x1d   : > { %p1250_p13 = por %p163_p10, %p57_p1  ;;  %p865_p0 = scmp.ge.s32.totalorder %s1111_s22, 4 }
  0x1f   : > { %185 = sbr.rel (%p865_p0) target bundleno = 60 (0x3c), region = 16 }
  0x24   : > { %188 = sbr.rel (!%p1210_p4) target bundleno = 44 (0x2c), region = 20  ;;  %s190_s3 = sand.u32 (%p1210_p4), 1, %s1091_s17  }
  0x25   : > { %s915_s25 = smul.u32 (%p1210_p4), 12, %s1107_s21  ;;  %s866_s5 = sshll.u32 (%p1210_p4), %s190_s3, 3 }
  0x26   : > { %s192_s23 = scalar_lea.vmem (%p1210_p4), [#allocation5], %s866_s5 }
  0x27   : > { %s197_s6 = sadd.s32 (%p1210_p4), %s1103_s20, %s915_s25 }
  0x28   : > { %s867_s8 = sshll.u32 (%p1210_p4), %s197_s6, 2 }
  0x29   : > { %s199_s27 = scalar_lea.vmem %s1344_s0, %s867_s8 }
  0x2a   : > { %v216_v0 = vld [vmem:[%s199_s27] sm:$0xf]  ;;  %v218_v1 = vld [vmem:[%s199_s27 + $0x18] sm:$0xf] }
  0x2b   : > { %217 = vst [vmem:[%s192_s23] sm:$0xf] %v216_v0  ;;  %219 = vst [vmem:[%s192_s23 + $0x4] sm:$0xf] %v218_v1 }
  0x2c PF: > { %247 = sbr.rel (!%p1224_p8) target bundleno = 52 (0x34), region = 61  ;;  %s249_s29 = sand.u32 (%p1224_p8), 1, %s1083_s15  }
  0x2d   : > { %s758_s3 = smul.u32 (%p1224_p8), 12, %s1107_s21  ;;  %s868_s25 = sshll.u32 (%p1224_p8), %s249_s29, 3 }
  0x2e   : > { %s251_s5 = scalar_lea.vmem (%p1224_p8), [#allocation6], %s868_s25 }
  0x2f   : > { %s759_s6 = sadd.s32 (%p1224_p8), %s1103_s20, %s758_s3 }
  0x30   : > { %s869_s24 = sshll.u32 (%p1224_p8), %s759_s6, 2 }
  0x31   : > { %s761_s8 = scalar_lea.vmem %s1345_s1, %s869_s24 }
  0x32   : > { %v870_v2 = vld [vmem:[%s761_s8 + $0x8] sm:$0xf]  ;;  %v871_v3 = vld [vmem:[%s761_s8 + $0x20] sm:$0xf] }
  0x33   : > { %279 = vst [vmem:[%s251_s5] sm:$0xf] %v870_v2  ;;  %281 = vst [vmem:[%s251_s5 + $0x4] sm:$0xf] %v871_v3 }
  0x34 PF: > { %309 = sbr.rel (!%p1243_p12) target bundleno = 60 (0x3c), region = 102  ;;  %s311_s9 = sand.u32 (%p1243_p12), 1, %s1075_s13  }
  0x35   : > { %s767_s30 = smul.u32 (%p1243_p12), 12, %s1107_s21  ;;  %s872_s27 = sshll.u32 (%p1243_p12), %s311_s9, 3 }
  0x36   : > { %s313_s25 = scalar_lea.vmem (%p1243_p12), [#allocation7], %s872_s27 }
  0x37   : > { %s768_s23 = sadd.s32 (%p1243_p12), %s1103_s20, %s767_s30 }
  0x38   : > { %s873_s29 = sshll.u32 (%p1243_p12), %s768_s23, 2 }
  0x39   : > { %s770_s24 = scalar_lea.vmem %s1346_s2, %s873_s29 }
  0x3a   : > { %v874_v4 = vld [vmem:[%s770_s24 + $0x10] sm:$0xf]  ;;  %v875_v5 = vld [vmem:[%s770_s24 + $0x28] sm:$0xf] }
  0x3b   : > { %341 = vst [vmem:[%s313_s25] sm:$0xf] %v874_v4  ;;  %343 = vst [vmem:[%s313_s25 + $0x4] sm:$0xf] %v875_v5 }
  0x3c PF: > { %p876_p1 = scmp.ge.s32.totalorder %s1111_s22, 1  ;;  %p370_p2 = scmp.lt.s32.totalorder %s1111_s22, 5 }
  0x3e   : > { %p371_p3 = pnand %p876_p1, %p370_p2 }
  0x3f   : > { %s384_s4 = sand.u32 (!%p371_p3), 1, %s1079_s14   ;;  %s377_s6 = sand.u32 (!%p371_p3), 1, %s1087_s16  }
  0x40   : > { %374 = sbr.rel (%p371_p3) target bundleno = 862 (0x35e), region = 143  ;;  %s878_s10 = sshll.u32 (!%p371_p3), %s384_s4, 3 }
  0x41   : > { %s1286_s8 = sshll.u32 (!%p371_p3), %s377_s6, 3  ;;  %s386_s5 = scalar_lea.vmem (!%p371_p3), [#allocation6], %s878_s10 }
  0x42   : > { %s379_s9 = scalar_lea.vmem (!%p371_p3), [#allocation5], %s1286_s8  ;;  %s391_s14 = sand.u32 (!%p371_p3), 1, %s1071_s12  }
  0x43   : > { %s879_s16 = sshll.u32 (!%p371_p3), %s391_s14, 3  ;;  %s420_s12 = scalar_lea.vmem (!%p371_p3), [#allocation8], %s1286_s8 }
  0x44   : > { %s393_s30 = scalar_lea.vmem (!%p371_p3), [#allocation7], %s879_s16 }
  0x45   : > { %v1113_v6 = vmov 0.0   ;;  %vm1114_vm0 = vmmov 0   ;;  %v1010_v7 = vld [vmem:[%s386_s5] sm:$0xff]   ;;  %v1011_v8 = vld [vmem:[%s379_s9] sm:$0xff]   ;;  %vm436_vm1 = vcmask 7168   ;;  %v511_v10 = vlaneseq  ;;  %s888_s27 = sshll.u32 (%p1250_p13), %s1099_s19, 2 }
  0x46   : > { %903 = vmatprep.subr.bf16.mxu0 %v1113_v6  ;;  %905 = vmatprep.mubr.msk.bf16.mxu0 %vm1114_vm0, %v1113_v6  ;;  %v1115_v9 = vmov -1e+30   ;;  %439 = vst.msk [vmem:[#allocation3] sm:$0xff] %vm436_vm1, %v1113_v6  ;;  %440 = vst.msk [vmem:[#allocation3 + $0x8] sm:$0xff] %vm436_vm1, %v1113_v6  ;;  %vm527_vm3 = vcmask 130048   ;;  %v1116_v24 = vmov 0   ;;  %s686_s23 = sadd.s32 (%p1250_p13), %s1095_s18, %s888_s27 }
  0x47   : > { %909 = vmatprep.subr.bf16.mxu1 %v1113_v6  ;;  %911 = vmatprep.mubr.msk.bf16.mxu1 %vm1114_vm0, %v1113_v6  ;;  %437 = vst.msk [vmem:[#allocation2] sm:$0xff] %vm436_vm1, %v1115_v9  ;;  %438 = vst.msk [vmem:[#allocation2 + $0x8] sm:$0xff] %vm436_vm1, %v1115_v9  ;;  %v512_v11 = vshrl.u32 %v511_v10, 7  ;;  %v518_v12 = vand.u32 127, %v511_v10  ;;  %v1012_v33 = vld [vmem:[%s393_s30] sm:$0xff]   ;;  %s889_s29 = sshll.u32 (%p1250_p13), %s686_s23, 2 }
  0x48   : > { %904 = vmatpush3.bf16.xpose.msra.mxu0 %v1010_v7  ;;  %1008 = vset.pattern.permute.xlu1 %v1116_v24  ;;  %s1359_s24 = sld [smem:[#allocation12_spill]] (%p1250_p13) }
  0x49   : > { %vm521_vm2 = vcmp.le.s32.totalorder %v518_v12, %v512_v11  ;;  %v513_v14 = vadd.s32 8, %v512_v11  ;;  %1009 = vset.pattern.permute.xlu0 %v1116_v24  ;;  %910 = vmatpush3.bf16.msra.mxu1 %v1012_v33 }
  0x4b   : > { %vm522_vm4 = vcmp.le.s32.totalorder %v518_v12, %v513_v14 }
  0x4d   : > { %v558_v49 = vld [vmem:[#allocation3] sm:$0xff]  ;;  %v559_v52 = vld [vmem:[#allocation3 + $0x8] sm:$0xff] }
  0x4e   : > { %v525_v25 = vld [vmem:[#allocation2] sm:$0xff]  ;;  %v526_v28 = vld [vmem:[#allocation2 + $0x8] sm:$0xff]  ;;  %s688_s25 = scalar_lea.vmem (%p1250_p13), %s1359_s24, %s889_s29 }
  0x4f   : > { %906 = vmatmul.mubr.bf16.vlgmr.msra.gmra.mxu0 %v1011_v8 }
 0x10f   : > { %v502_v13 = vpop.f32.mrf.mxu0 }
 0x110   : > { %v509_v15 = vmul.f32 0.088388346, %v502_v13 }
 0x111   : > { %v907_v16 = vpop.f32.mrf.mxu0 }
 0x112   : > { %v523_v17 = vsel %vm521_vm2, %v509_v15, -1e+30 }
 0x113   : > { %v505_v18 = vpop.f32.mrf.mxu0  ;;  %v528_v19 = vsel %vm527_vm3, %v523_v17, -inf }
 0x114   : > { %v510_v20 = vmul.f32 0.088388346, %v505_v18  ;;  %529 = vmax.xlane.f32.xlu0 %v528_v19 }
 0x115   : > { %v908_v21 = vpop.f32.mrf.mxu0 }
 0x116   : > { %v524_v22 = vsel %vm522_vm4, %v510_v20, -1e+30 }
 0x117   : > { %v531_v23 = vsel %vm527_vm3, %v524_v22, -inf }
 0x118   : > { %532 = vmax.xlane.f32.xlu0 %v531_v23 }
 0x19d   : > { %v530_v26 = vpop.xlane.xlu0 %529 }
 0x19e   : > { %v534_v27 = vmax.f32 %v525_v25, %v530_v26 }
 0x1a0   : > { %v536_v29 = vsub.f32 %v525_v25, %v534_v27  ;;  %642 = vst.msk [vmem:[#allocation2] sm:$0xff] %vm436_vm1, %v534_v27  ;;  %544 = vperm.xlu1 %1008, %v534_v27  }
 0x1a1   : > { %v533_v30 = vpop.xlane.xlu0 %532 }
 0x1a2   : > { %v535_v31 = vmax.f32 %v526_v28, %v533_v30  ;;  %v538_v46 = vmul.f32 1.442695, %v536_v29 }
 0x1a4   : > { %v537_v32 = vsub.f32 %v526_v28, %v535_v31  ;;  %643 = vst.msk [vmem:[#allocation2 + $0x8] sm:$0xff] %vm436_vm1, %v535_v31  ;;  %549 = vperm.xlu1 %1008, %v535_v31  }
 0x1a6   : > { %v540_v43 = vmul.f32 1.442695, %v537_v32 }
 0x21b   : > { %v545_v34 = vpop.permute.xlu1 %544 }
 0x21c   : > { %v552_v35 = vsub.f32 %v523_v17, %v545_v34 }
 0x21e   : > { %v554_v36 = vmul.f32 1.442695, %v552_v35 }
 0x21f   : > { %v550_v37 = vpop.permute.xlu1 %549 }
 0x220   : > { %1013 = vpow2.f32 %v554_v36  ;;  %v553_v38 = vsub.f32 %v524_v22, %v550_v37 }
 0x222   : > { %v556_v39 = vmul.f32 1.442695, %v553_v38 }
 0x224   : > { %1015 = vpow2.f32 %v556_v39 }
 0x225   : > { %1017 = vpow2.f32 %v540_v43 }
 0x226   : > { %1019 = vpow2.f32 %v538_v46 }
 0x22d   : > { %v1014_v40 = vpop.eup %1013 }
 0x22e   : > { %v562_v41 = vsel %vm527_vm3, %v1014_v40, 0.0 }
 0x22f   : > { %563 = vadd.xlane.f32.xlu0 %v562_v41 }
 0x231   : > { %v1016_v42 = vpop.eup %1015 }
 0x232   : > { %v565_v44 = vsel %vm527_vm3, %v1016_v42, 0.0  ;;  %v587_v45 = vpack.c.bf16 %v1016_v42, %v1014_v40  ;;  %v1018_v47 = vpop.eup %1017 }
 0x233   : > { %566 = vadd.xlane.f32.xlu1 %v565_v44  ;;  %v1020_v48 = vpop.eup %1019  ;;  %v561_v54 = vmul.f32 %v1018_v47, %v559_v52 }
 0x234   : > { %912 = vmatmul.mubr.msk.bf16.vlgmr.msra.gmra.mxu1 %vm527_vm3, %v587_v45  ;;  %v560_v50 = vmul.f32 %v1020_v48, %v558_v49 }
 0x244   : > { %582 = vperm.xlu1 %1008, %v1018_v47  }
 0x245   : > { %577 = vperm.xlu0 %1009, %v1020_v48  }
 0x2b8   : > { %v564_v51 = vpop.xlane.xlu0 %563 }
 0x2b9   : > { %v568_v53 = vadd.f32 %v564_v51, %v560_v50 }
 0x2bb   : > { %571 = vst.msk [vmem:[#allocation3] sm:$0xff] %vm436_vm1, %v568_v53 }
 0x2bc   : > { %v567_v55 = vpop.xlane.xlu1 %566 }
 0x2bd   : > { %v569_v56 = vadd.f32 %v567_v55, %v561_v54 }
 0x2bf   : > { %572 = vst.msk [vmem:[#allocation3 + $0x8] sm:$0xff] %vm436_vm1, %v569_v56 }
 0x2c0   : > { %v578_v1 = vpop.permute.xlu0 %577  ;;  %v583_v2 = vpop.permute.xlu1 %582 }
 0x2c1   : > { %v586_v4 = vmul.f32 0.0, %v583_v2  ;;  %v585_v5 = vmul.f32 0.0, %v578_v1 }
 0x2c2   : > { %v649_v57 = vld [vmem:[#allocation3] sm:$0xff] }
 0x2c3   : > { %1021 = vrcp.f32 %v649_v57 }
 0x2c6   : > { %v650_v58 = vld [vmem:[#allocation3 + $0x8] sm:$0xff] }
 0x2c7   : > { %1023 = vrcp.f32 %v650_v58 }
 0x2d0   : > { %v1022_v59 = vpop.eup %1021 }
 0x2d1   : > { %655 = vperm.xlu0 %1009, %v1022_v59  }
 0x2d4   : > { %v1024_v60 = vpop.eup %1023 }
 0x2d5   : > { %660 = vperm.xlu0 %1009, %v1024_v60  }
 0x2f4   : > { %v631_v61 = vpop.f32.mrf.mxu1 }
 0x2f5   : > { %v638_v6 = vadd.f32 %v631_v61, %v585_v5 }
 0x2f6   : > { %v913_v62 = vpop.f32.mrf.mxu1 }
 0x2f8   : > { %v634_v63 = vpop.f32.mrf.mxu1 }
 0x2f9   : > { %v639_v7 = vadd.f32 %v634_v63, %v586_v4 }
 0x2fa   : > { %v914_v0 = vpop.f32.mrf.mxu1 }
 0x34c   : > { %v656_v3 = vpop.permute.xlu0 %655 }
 0x34d   : > { %v663_v9 = vmul.f32 %v656_v3, %v638_v6 }
 0x350   : > { %v661_v8 = vpop.permute.xlu0 %660 }
 0x351   : > { %v664_v10 = vmul.f32 %v661_v8, %v639_v7  ;;  %681 = sbr.rel (!%p1250_p13) target bundleno = 862 (0x35e), region = 171 }
 0x353   : > { %v897_v11 = vpack.c.bf16 %v664_v10, %v663_v9 }
 0x355   : > { %898 = vst [vmem:[%s420_s12] sm:$0xff] %v897_v11  }
 0x35c   : > { %v705_v12 = vld [vmem:[%s420_s12] sm:$0xf]  ;;  %v707_v13 = vld [vmem:[%s420_s12 + $0x4] sm:$0xf] }
 0x35d   : > { %706 = vst [vmem:[%s688_s25] sm:$0xf] %v705_v12  ;;  %708 = vst [vmem:[%s688_s25 + $0x8] sm:$0xf] %v707_v13 }
 0x35e PF: > { %s13_s22 = sadd.s32 1, %s1111_s22   ;;  %s1360_s18 = sld [smem:[#allocation11_spill]] }
 0x35f   : > { %p10_p4 = scmp.ge.s32.totalorder %s13_s22, 6   ;;  %s1361_s7 = sld [smem:[#allocation9_spill]] }
 0x360   : > { %s1362_s4 = sld [smem:[#allocation10_spill]]  ;;  %s1363_s12 = smov %s1075_s13 }
 0x361   : > { %s1364_s13 = smov %s1255_s26  ;;  %s1365_s14 = smov %s1083_s15 }
 0x362   : > { %s1366_s15 = smov %s1233_s28  ;;  %s1367_s16 = smov %s1091_s17 }
 0x363   : > { %s1370_s19 = smov %s1107_s21  ;;  %12 = sbr.rel (!%p10_p4) target bundleno = 8 (0x8), region = 259 }
 0x364   : > { %s1368_s17 = smov %s1360_s18  ;;  %s1369_s18 = smov %s1103_s20 }
 0x365   : > { %s1371_s20 = smov %s1361_s7 }
 0x366   : > { %s1372_s21 = smov %s1362_s4 }

// kernel: llm_forward.9
= control target key start
LH: loop header
LB: loop body
LE: loop exit
PB: predicated region body
PF: predicated region fallthrough
CT: control target
= control target key end

     0   :  { %8 = vsyncpa [#allocation4], 0  ;;  %s1525_s0 = inlined_call_operand.vmem [shape: bf16[2,16,256], index: 0, kind: input, shape index: {}]   ;;  %s1526_s1 = inlined_call_operand.vmem [shape: f32[1,256], index: 1, kind: input, shape index: {}]   ;;  %s1527_s2 = inlined_call_operand.hbm [shape: bf16[256,768], index: 2, kind: input, shape index: {}]   ;;  %s1528_s3 = inlined_call_operand.vmem [shape: bf16[2,16,768], index: 3, kind: output, shape index: {}]  }
   0x1   :  { %10 = vsyncpa [#allocation4 + $0x1], 0  ;;  %s1309_s12 = smov 0   ;;  %s1311_s13 = smov 0  }
   0x2   :  { %s1313_s14 = smov 0   ;;  %s1315_s15 = smov 0  }
   0x3   :  { %s1317_s16 = smov 0   ;;  %s1319_s17 = smov 0  }
   0x4   :  { %s1321_s18 = smov 0   ;;  %s1323_s19 = smov 0  }
   0x5   :  { %s1325_s20 = smov 0   ;;  %s1327_s21 = smov 0  }
   0x6 LB: > { %s906_s22 = sadd.s32 4294967295, %s1283_s21   ;;  %s28_s23 = sadd.s32 1, %s1275_s19  ;;  %s1283_s21 = sphi %s1327_s21, %s16_s21   ;;  %s1279_s20 = sphi %s1325_s20, %s1547_s20   ;;  %s1275_s19 = sphi %s1323_s19, %s1546_s19   ;;  %s1271_s18 = sphi %s1321_s18, %s1545_s18   ;;  %s1267_s17 = sphi %s1319_s17, %s1544_s17   ;;  %s1263_s16 = sphi %s1317_s16, %s1543_s16   ;;  %s1259_s15 = sphi %s1315_s15, %s1542_s15   ;;  %s1255_s14 = sphi %s1313_s14, %s1541_s14   ;;  %s1251_s13 = sphi %s1311_s13, %s1540_s13   ;;  %s1247_s12 = sphi %s1309_s12, %s1539_s12  }
   0x7   : > { %p29_p0 = scmp.ge.s32.totalorder %s28_s23, 2  ;;  %s35_s24 = sadd.s32 1, %s1279_s20 }
   0x8   : > { %s91_s25 = sadd.s32 1, %s1263_s16  ;;  %p98_p1 = scmp.ne.s32.totalorder %s1263_s16, %s1259_s15 }
   0x9   : > { %s1549_s23 = smov (%p29_p0, %s28_s23), 0  ;;  %s1551_s24 = smov (!%p29_p0, %s35_s24), %s1279_s20 }
   0xa   : > { %1531 = sst [smem:[#allocation7_spill]] %s1549_s23  ;;  %s88_s26 = ssub.s32 %s1275_s19, %s1549_s23 }
   0xb   : > { %p99_p2 = scmp.eq.s32.totalorder %s1283_s21, 0  ;;  %p37_p3 = scmp.ge.s32.totalorder %s1551_s24, 2 }
   0xc   : > { %p89_p4 = scmp.eq.s32.totalorder %s88_s26, 0  ;;  %p104_p6 = scmp.ne.s32.totalorder %s1259_s15, %s1255_s14 }
   0xd   : > { %p1369_p5 = por %p99_p2, %p98_p1  ;;  %s1553_s24 = smov (%p37_p3, %s1551_s24), 0 }
   0xe   : > { %1533 = sst [smem:[#allocation8_spill]] %s1553_s24  ;;  %p105_p7 = scmp.eq.s32.totalorder %s906_s22, 0 }
   0xf   : > { %s1377_s28 = scalar_select %p89_p4, %s1263_s16, %s91_s25  }
  0x10   : > { %s114_s29 = ssub.s32 %s1279_s20, %s1553_s24  ;;  %s121_s4 = sadd.s32 1, %s1251_s13 }
  0x11   : > { %s118_s30 = sor.u32 %s114_s29, %s88_s26  ;;  %p1382_p8 = por %p105_p7, %p104_p6 }
  0x12   : > { %p119_p9 = scmp.eq.s32.totalorder %s118_s30, 0  ;;  %p131_p10 = scmp.ne.s32.totalorder %s1251_s13, %s1247_s12 }
  0x13   : > { %p132_p11 = scmp.eq.s32.totalorder %s906_s22, 3  ;;  %p1018_p13 = scmp.lt.s32.totalorder %s1283_s21, 4 }
  0x14   : > { %s1389_s6 = scalar_select %p119_p9, %s1251_s13, %s121_s4  }
  0x15   : > { %p1391_p12 = por %p132_p11, %p131_p10  ;;  %s175_s8 = sand.u32 1, %s1263_s16  }
  0x16   : > { %s1008_s9 = smul.u32 384, %s175_s8  ;;  %p1400_p0 = pnand %p1018_p13, %p1369_p5 }
  0x17   : > { %s978_s10 = smul.u32 192, %s1275_s19  ;;  %s176_s30 = scalar_lea.sflag [#allocation4], %s175_s8 }
  0x18   : > { %s179_s26 = scalar_lea.vmem [#allocation3], %s1008_s9  ;;  %p1175_p1 = pneg %p1400_p0 }
  0x19   : > { %s185_s22 = scalar_lea.hbm %s1527_s2, %s978_s10  ;;  %s186_s29 = sshll.u32 %s179_s26, 4  ;;  %s187_s29 = int_to_ptr.vmem [resolvable:$true] %s186_s29 }
  0x1a   : > { %s1186_s4 = scalar_lea.vmem %s187_s29, 6144  ;;  %s1285_s27 = smov [#allocation3]  }
  0x1b   : > { %p1187_p2 = scmp.ne.s32.totalorder %s187_s29, %s1186_s4  ;;  %s1191_s24 = sshll.u32 %s1285_s27, 4  ;;  %s1192_s24 = int_to_ptr.vmem [resolvable:$false] %s1191_s24 }
  0x1c   : > { %s1193_s23 = scalar_lea.vmem %s1192_s24, 12288  ;;  %p1194_p5 = scmp.lt.s32.totalorder %s187_s29, %s1192_s24 }
  0x1d   : > { %p1189_p3 = pnand %p1187_p2, %p1175_p1  ;;  %p1195_p6 = scmp.lt.s32.totalorder %s1193_s23, %s1186_s4 }
  0x1f   : > { %p1190_p4 = pneg %p1189_p3  ;;  %p1196_p7 = por %p1195_p6, %p1194_p5 }
  0x21   : > { %p1197_p9 = pnand %p1196_p7, %p1190_p4 }
  0x23   : > { %1200 = shalt.err (!%p1197_p9)
}
  0x24   : > { %s1286_s10 = smov 384   ;;  %s1287_s8 = smov 192  }
  0x25   : > { %s1288_s9 = smov 12   ;;  %p911_p10 = scmp.ge.s32.totalorder %s1283_s21, 1 }
  0x26   : > { %1017 = dma.hbm_to_vmem [thread:$0]  (!%p1400_p0), %s185_s22, 6144, %s187_s29, %s176_s30, %s1286_s10, %s1287_s8, %s1288_s9  }
  0x27   : > { %p194_p11 = scmp.lt.s32.totalorder %s1283_s21, 5 }
  0x29   : > { %p195_p13 = pnand %p911_p10, %p194_p11 }
  0x2a   : > { %s200_s14 = sand.u32 (!%p195_p13), 1, %s1259_s15  }
  0x2b   : > { %198 = sbr.rel (%p195_p13) target bundleno = 506 (0x1fa), region = 32  ;;  %s201_s23 = scalar_lea.sflag (!%p195_p13), [#allocation4], %s200_s14 }
  0x2c   : > { %s1009_s24 = smul.u32 (!%p195_p13), 384, %s200_s14 }
  0x2e   : > { %s1414_s25 = scalar_lea.vmem (!%p195_p13), [#allocation3], %s1009_s24 }
  0x30   : > { %1242 = dma.done.wait (%p1382_p8), %s201_s23, 6144  }
  0x31   : > { %1244 = vsyncadd (%p1382_p8), %s201_s23, 4294961152  ;;  %s233_s11 = sand.u32 1, %s1247_s12   ;;  %p237_p0 = scmp.lt.s32.totalorder %s1271_s18, 1 }
  0x32   : > { %s1010_s22 = smul.u32 24, %s233_s11  ;;  %p914_p1 = scmp.ne.s32.totalorder %s1267_s17, 0 }
  0x33   : > { %s238_s26 = scalar_select %p237_p0, %s1271_s18, 1 }
  0x34   : > { %s1426_s10 = scalar_lea.vmem [#allocation5], %s1010_s22  ;;  %254 = sbr.rel (%p914_p1) target bundleno = 231 (0xe7), region = 40 }
  0x35   : > { %s979_s29 = sshll.u32 %s238_s26, 4 }
  0x36   : > { %s245_s27 = scalar_lea.vmem %s1525_s0, %s979_s29 }
  0x39   : > { %v255_v0 = vld [vmem:[%s245_s27] sm:$0xff]  ;;  %v256_v1 = vld [vmem:[%s245_s27 + $0x8] sm:$0xff]  ;;  %v284_v16 = vlaneseq }
  0x3a   : > { %v257_v2 = vunpack.c.l.bf16 %v255_v0  ;;  %v258_v3 = vunpack.c.h.bf16 %v255_v0  ;;  %v259_v4 = vunpack.c.l.bf16 %v256_v1  ;;  %v260_v5 = vunpack.c.h.bf16 %v256_v1  ;;  %v282_v22 = vld [vmem:[%s1526_s1] sm:$0x3] }
  0x3b   : > { %v285_v19 = vshrl.u32 %v284_v16, 7 }
  0x3c   : > { %v261_v6 = vmul.f32 %v257_v2, %v257_v2  ;;  %v262_v7 = vmul.f32 %v258_v3, %v258_v3  ;;  %v263_v8 = vmul.f32 %v259_v4, %v259_v4  ;;  %v264_v9 = vmul.f32 %v260_v5, %v260_v5 }
  0x3d   : > { %v286_v20 = vsub.s32 0, %v285_v19  ;;  %v290_v21 = vsub.s32 1, %v285_v19 }
  0x3e   : > { %v265_v10 = vadd.f32 %v262_v7, %v261_v6  ;;  %v268_v11 = vadd.f32 %v264_v9, %v263_v8 }
  0x3f   : > { %v287_v23 = vrot.slane %v282_v22, %v286_v20  ;;  %v291_v24 = vrot.slane %v282_v22, %v290_v21 }
  0x40   : > { %266 = vadd.xlane.f32.xlu0 %v265_v10 }
  0x44   : > { %269 = vadd.xlane.f32.xlu0 %v268_v11 }
  0xc9   : > { %v267_v12 = vpop.xlane.xlu0 %266 }
  0xca   : > { %v272_v13 = vmul.f32 0.00390625, %v267_v12 }
  0xcc   : > { %v274_v14 = vadd.f32 1e-06, %v272_v13 }
  0xcd   : > { %v270_v15 = vpop.xlane.xlu0 %269 }
  0xce   : > { %1102 = vrsqrt.f32 %v274_v14  ;;  %v273_v17 = vmul.f32 0.00390625, %v270_v15 }
  0xd0   : > { %v275_v18 = vadd.f32 1e-06, %v273_v17 }
  0xd2   : > { %1104 = vrsqrt.f32 %v275_v18 }
  0xdb   : > { %v1103_v25 = vpop.eup %1102 }
  0xdc   : > { %v278_v26 = vmul.f32 %v1103_v25, %v257_v2  ;;  %v279_v27 = vmul.f32 %v1103_v25, %v258_v3 }
  0xde   : > { %v294_v28 = vmul.f32 %v287_v23, %v278_v26  ;;  %v295_v29 = vmul.f32 %v291_v24, %v279_v27 }
  0xdf   : > { %v1105_v30 = vpop.eup %1104 }
  0xe0   : > { %v980_v31 = vpack.c.bf16 %v295_v29, %v294_v28  ;;  %v280_v32 = vmul.f32 %v1105_v30, %v259_v4  ;;  %v281_v33 = vmul.f32 %v1105_v30, %v260_v5 }
  0xe2   : > { %310 = vst [vmem:[#allocation2] sm:$0xff] %v980_v31  ;;  %v296_v34 = vmul.f32 %v287_v23, %v280_v32  ;;  %v297_v35 = vmul.f32 %v291_v24, %v281_v33 }
  0xe4   : > { %v981_v36 = vpack.c.bf16 %v297_v35, %v296_v34 }
  0xe6   : > { %311 = vst [vmem:[#allocation2 + $0x8] sm:$0xff] %v981_v36 }
  0xe7 PF: > { %v1106_v37 = vld [vmem:[%s1414_s25 + $0xac] ss:$12 sps:$4 sm:$0xff]   ;;  %v1108_v38 = vld [vmem:[%s1414_s25 + $0xa8] ss:$12 sps:$4 sm:$0xff]   ;;  %v1111_v40 = vld [vmem:[%s1414_s25 + $0x90] ss:$12 sps:$4 sm:$0xff]  }
  0xe8   : > { %644 = vmatprep.subr.bf16.mxu0 %v1106_v37  ;;  %v1109_v39 = vld [vmem:[%s1414_s25 + $0x94] ss:$12 sps:$4 sm:$0xff]   ;;  %v1112_v41 = vld [vmem:[%s1414_s25 + $0x7c] ss:$12 sps:$4 sm:$0xff]   ;;  %v1114_v42 = vld [vmem:[%s1414_s25 + $0x78] ss:$12 sps:$4 sm:$0xff]  }
  0xe9   : > { %645 = vmatpush1.bf16.msra.mxu0 %v1108_v38  ;;  %v1115_v43 = vld [vmem:[%s1414_s25 + $0x64] ss:$12 sps:$4 sm:$0xff]   ;;  %v1117_v45 = vld [vmem:[%s1414_s25 + $0x60] ss:$12 sps:$4 sm:$0xff]   ;;  %v1120_v50 = vld [vmem:[%s1414_s25 + $0x48] ss:$12 sps:$4 sm:$0xff]  }
  0xea   : > { %646 = vmatprep.subr.bf16.mxu0 %v1109_v39  ;;  %v1126_v44 = vld [vmem:[%s1414_s25 + $0x170] ss:$12 sps:$4 sm:$0xff]   ;;  %v1118_v47 = vld [vmem:[%s1414_s25 + $0x4c] ss:$12 sps:$4 sm:$0xff]   ;;  %v1121_v51 = vld [vmem:[%s1414_s25 + $0x34] ss:$12 sps:$4 sm:$0xff]  }
  0xeb   : > { %986 = vmatprep.subr.bf16.mxu1 %v1126_v44  ;;  %v1128_v46 = vld [vmem:[%s1414_s25 + $0xb0] ss:$12 sps:$4 sm:$0xff]   ;;  %v1131_v48 = vld [vmem:[%s1414_s25 + $0x158] ss:$12 sps:$4 sm:$0xff]   ;;  %v1136_v52 = vld [vmem:[%s1414_s25 + $0x140] ss:$12 sps:$4 sm:$0xff]  }
  0xec   : > { %987 = vmatpush3.bf16.msra.mxu1 %v1128_v46  ;;  %v1133_v49 = vld [vmem:[%s1414_s25 + $0x98] ss:$12 sps:$4 sm:$0xff]   ;;  %v1138_v53 = vld [vmem:[%s1414_s25 + $0x80] ss:$12 sps:$4 sm:$0xff]   ;;  %v1123_v54 = vld [vmem:[%s1414_s25 + $0x30] ss:$12 sps:$4 sm:$0xff]  }
  0xed   : > { %647 = vmatpush1.bf16.msra.mxu0 %v1111_v40  ;;  %988 = vmatprep.subr.bf16.mxu1 %v1131_v48  ;;  %v1141_v55 = vld [vmem:[%s1414_s25 + $0x128] ss:$12 sps:$4 sm:$0xff]   ;;  %v1127_v58 = vld [vmem:[%s1414_s25 + $0x18] ss:$12 sps:$4 sm:$0xff]   ;;  %v1146_v59 = vld [vmem:[%s1414_s25 + $0x110] ss:$12 sps:$4 sm:$0xff]  }
  0xee   : > { %648 = vmatprep.subr.bf16.mxu0 %v1112_v41  ;;  %v1124_v56 = vld [vmem:[%s1414_s25 + $0x1c] ss:$12 sps:$4 sm:$0xff]   ;;  %v1129_v60 = vld [vmem:[%s1414_s25 + $0x4] ss:$12 sps:$4 sm:$0xff]   ;;  %v1132_v63 = vld [vmem:[%s1414_s25] ss:$12 sps:$4 sm:$0xff]  }
  0xef   : > { %v1143_v57 = vld [vmem:[%s1414_s25 + $0x68] ss:$12 sps:$4 sm:$0xff]   ;;  %v1148_v61 = vld [vmem:[%s1414_s25 + $0x50] ss:$12 sps:$4 sm:$0xff]   ;;  %v1151_v62 = vld [vmem:[%s1414_s25 + $0xf8] ss:$12 sps:$4 sm:$0xff]  }
  0xf0   : > { %989 = vmatpush3.bf16.msra.mxu1 %v1133_v49  ;;  %v1134_v0 = vld [vmem:[%s1414_s25 + $0x16c] ss:$12 sps:$4 sm:$0xff]   ;;  %v1137_v3 = vld [vmem:[%s1414_s25 + $0x168] ss:$12 sps:$4 sm:$0xff]   ;;  %v1142_v7 = vld [vmem:[%s1414_s25 + $0x150] ss:$12 sps:$4 sm:$0xff]  }
  0xf1   : > { %649 = vmatpush1.bf16.msra.mxu0 %v1114_v42  ;;  %990 = vmatprep.subr.bf16.mxu1 %v1136_v52  ;;  %v1153_v1 = vld [vmem:[%s1414_s25 + $0x38] ss:$12 sps:$4 sm:$0xff]   ;;  %v1156_v2 = vld [vmem:[%s1414_s25 + $0xe0] ss:$12 sps:$4 sm:$0xff]   ;;  %v1161_v6 = vld [vmem:[%s1414_s25 + $0xc8] ss:$12 sps:$4 sm:$0xff]  }
  0xf2   : > { %650 = vmatprep.subr.bf16.mxu0 %v1115_v43  ;;  %v1139_v4 = vld [vmem:[%s1414_s25 + $0x154] ss:$12 sps:$4 sm:$0xff]   ;;  %v1144_v9 = vld [vmem:[%s1414_s25 + $0x13c] ss:$12 sps:$4 sm:$0xff]   ;;  %v1147_v11 = vld [vmem:[%s1414_s25 + $0x138] ss:$12 sps:$4 sm:$0xff]  }
  0xf3   : > { %v1158_v5 = vld [vmem:[%s1414_s25 + $0x20] ss:$12 sps:$4 sm:$0xff]   ;;  %v1166_v8 = vld [vmem:[#allocation2 + $0x4] ss:$8 sps:$4 sm:$0xff]   ;;  %v1149_v12 = vld [vmem:[%s1414_s25 + $0x124] ss:$12 sps:$4 sm:$0xff]  }
  0xf4   : > { %991 = vmatpush3.bf16.msra.mxu1 %v1138_v53  ;;  %v1163_v10 = vld [vmem:[%s1414_s25 + $0x8] ss:$12 sps:$4 sm:$0xff]   ;;  %719 = vmatprep.mubr.bf16.mxu1 %v1166_v8  ;;  %v1164_v13 = vld [vmem:[#allocation2] ss:$8 sps:$4 sm:$0xff]   ;;  %v1152_v14 = vld [vmem:[%s1414_s25 + $0x120] ss:$12 sps:$4 sm:$0xff]  }
  0xf5   : > { %651 = vmatpush1.bf16.msra.mxu0 %v1117_v45  ;;  %992 = vmatprep.subr.bf16.mxu1 %v1141_v55  ;;  %v1154_v15 = vld [vmem:[%s1414_s25 + $0x10c] ss:$12 sps:$4 sm:$0xff]   ;;  %v1157_v16 = vld [vmem:[%s1414_s25 + $0x108] ss:$12 sps:$4 sm:$0xff]   ;;  %v1162_v18 = vld [vmem:[%s1414_s25 + $0xf0] ss:$12 sps:$4 sm:$0xff]  }
  0xf6   : > { %652 = vmatprep.subr.bf16.mxu0 %v1118_v47  ;;  %676 = vmatprep.mubr.bf16.mxu0 %v1166_v8  ;;  %v1159_v17 = vld [vmem:[%s1414_s25 + $0xf4] ss:$12 sps:$4 sm:$0xff]   ;;  %v1167_v19 = vld [vmem:[%s1414_s25 + $0xdc] ss:$12 sps:$4 sm:$0xff]   ;;  %v1169_v20 = vld [vmem:[%s1414_s25 + $0xd8] ss:$12 sps:$4 sm:$0xff]  }
  0xf7   : > { %v1170_v21 = vld [vmem:[%s1414_s25 + $0xc4] ss:$12 sps:$4 sm:$0xff]   ;;  %v1172_v22 = vld [vmem:[%s1414_s25 + $0xc0] ss:$12 sps:$4 sm:$0xff]   ;;  %s760_s8 = smul.u32 (%p1391_p12), 3, %s1267_s17 }
  0xf8   : > { %993 = vmatpush3.bf16.msra.mxu1 %v1143_v57  ;;  %s1011_s9 = smul.u32 (%p1391_p12), 12, %s1271_s18 }
  0xf9   : > { %653 = vmatpush1.bf16.msra.mxu0 %v1120_v50  ;;  %994 = vmatprep.subr.bf16.mxu1 %v1146_v59 }
  0xfa   : > { %654 = vmatprep.subr.bf16.mxu0 %v1121_v51  ;;  %s764_s14 = sadd.s32 (%p1391_p12), %s1011_s9, %s760_s8 }
  0xfb   : > { %s971_s24 = sshll.u32 (%p1391_p12), %s764_s14, 2 }
  0xfc   : > { %995 = vmatpush3.bf16.msra.mxu1 %v1148_v61  ;;  %s766_s11 = scalar_lea.vmem (%p1391_p12), %s1528_s3, %s971_s24 }
  0xfd   : > { %655 = vmatpush1.bf16.msra.mxu0 %v1123_v54  ;;  %996 = vmatprep.subr.bf16.mxu1 %v1151_v62 }
  0xfe   : > { %656 = vmatprep.subr.bf16.mxu0 %v1124_v56 }
 0x100   : > { %997 = vmatpush3.bf16.msra.mxu1 %v1153_v1 }
 0x101   : > { %657 = vmatpush1.bf16.msra.mxu0 %v1127_v58  ;;  %998 = vmatprep.subr.bf16.mxu1 %v1156_v2 }
 0x102   : > { %658 = vmatprep.subr.bf16.mxu0 %v1129_v60 }
 0x104   : > { %999 = vmatpush3.bf16.msra.mxu1 %v1158_v5 }
 0x105   : > { %659 = vmatpush1.bf16.msra.mxu0 %v1132_v63  ;;  %1000 = vmatprep.subr.bf16.mxu1 %v1161_v6 }
 0x106   : > { %660 = vmatprep.subr.bf16.mxu0 %v1134_v0 }
 0x108   : > { %1001 = vmatpush3.bf16.msra.mxu1 %v1163_v10 }
 0x109   : > { %661 = vmatpush2.bf16.msra.mxu0 %v1137_v3 }
 0x10a   : > { %662 = vmatprep.subr.bf16.mxu0 %v1139_v4 }
 0x10b   : > { %720 = vmatmul.mubr.bf16.vlgmr.msra.gmra.mxu1 %v1164_v13 }
 0x10d   : > { %663 = vmatpush2.bf16.msra.mxu0 %v1142_v7 }
 0x10e   : > { %664 = vmatprep.subr.bf16.mxu0 %v1144_v9 }
 0x111   : > { %665 = vmatpush2.bf16.msra.mxu0 %v1147_v11 }
 0x112   : > { %666 = vmatprep.subr.bf16.mxu0 %v1149_v12 }
 0x115   : > { %667 = vmatpush2.bf16.msra.mxu0 %v1152_v14 }
 0x116   : > { %668 = vmatprep.subr.bf16.mxu0 %v1154_v15 }
 0x119   : > { %669 = vmatpush2.bf16.msra.mxu0 %v1157_v16 }
 0x11a   : > { %670 = vmatprep.subr.bf16.mxu0 %v1159_v17 }
 0x11d   : > { %671 = vmatpush2.bf16.msra.mxu0 %v1162_v18 }
 0x11e   : > { %672 = vmatprep.subr.bf16.mxu0 %v1167_v19 }
 0x121   : > { %673 = vmatpush2.bf16.msra.mxu0 %v1169_v20 }
 0x122   : > { %674 = vmatprep.subr.bf16.mxu0 %v1170_v21 }
 0x125   : > { %675 = vmatpush2.bf16.msra.mxu0 %v1172_v22 }
 0x128   : > { %677 = vmatmul.mubr.bf16.vlgmr.msra.gmra.mxu0 %v1164_v13 }
 0x1cb   : > { %v1002_v23 = vpop.f32.mrf.mxu1 }
 0x1cd   : > { %v1003_v24 = vpop.f32.mrf.mxu1 }
 0x1ce   : > { %v1004_v25 = vadd.f32 %v1003_v24, %v1002_v23 }
 0x1cf   : > { %v1005_v26 = vpop.f32.mrf.mxu1 }
 0x1d0   : > { %v983_v27 = vpack.c.bf16 %v1004_v25, %v1004_v25 }
 0x1d1   : > { %v1006_v28 = vpop.f32.mrf.mxu1 }
 0x1d2   : > { %749 = vst [vmem:[%s1426_s10 + $0x8] sm:$0xf] %v983_v27  ;;  %v1007_v29 = vadd.f32 %v1006_v28, %v1005_v26 }
 0x1d4   : > { %v985_v30 = vpack.c.bf16 %v1007_v29, %v1007_v29 }
 0x1d6   : > { %751 = vst [vmem:[%s1426_s10 + $0x14] sm:$0xf] %v985_v30 }
 0x1d9   : > { %v972_v39 = vld [vmem:[%s1426_s10 + $0x8] sm:$0xf] (%p1391_p12) }
 0x1da   : > { %973 = vst [vmem:[%s766_s11 + $0x8] sm:$0xf] (%p1391_p12), %v972_v39 }
 0x1dd   : > { %v974_v40 = vld [vmem:[%s1426_s10 + $0x14] sm:$0xf] (%p1391_p12) }
 0x1de   : > { %975 = vst [vmem:[%s766_s11 + $0x20] sm:$0xf] (%p1391_p12), %v974_v40 }
 0x1e8   : > { %v678_v31 = vpop.f32.mrf.mxu0 }
 0x1ea   : > { %v680_v32 = vpop.f32.mrf.mxu0 }
 0x1eb   : > { %v982_v33 = vpack.c.bf16 %v680_v32, %v678_v31 }
 0x1ec   : > { %v682_v34 = vpop.f32.mrf.mxu0 }
 0x1ed   : > { %748 = vst [vmem:[%s1426_s10] sm:$0xff] %v982_v33  ;;  %758 = sbr.rel (!%p1391_p12) target bundleno = 506 (0x1fa), region = 44 }
 0x1ee   : > { %v684_v35 = vpop.f32.mrf.mxu0 }
 0x1ef   : > { %v984_v36 = vpack.c.bf16 %v684_v35, %v682_v34 }
 0x1f1   : > { %750 = vst [vmem:[%s1426_s10 + $0xc] sm:$0xff] %v984_v36 }
 0x1f4   : > { %v781_v37 = vld [vmem:[%s1426_s10] sm:$0xff] }
 0x1f5   : > { %782 = vst [vmem:[%s766_s11] sm:$0xff] %v781_v37 }
 0x1f8   : > { %v783_v38 = vld [vmem:[%s1426_s10 + $0xc] sm:$0xff] }
 0x1f9   : > { %784 = vst [vmem:[%s766_s11 + $0x18] sm:$0xff] %v783_v38 }
 0x1fa PF: > { %s16_s21 = sadd.s32 1, %s1283_s21   ;;  %s1537_s7 = sld [smem:[#allocation7_spill]] }
 0x1fb   : > { %p13_p8 = scmp.ge.s32.totalorder %s16_s21, 6   ;;  %s1538_s22 = sld [smem:[#allocation8_spill]] }
 0x1fc   : > { %s1539_s12 = smov %s1251_s13  ;;  %s1540_s13 = smov %s1389_s6 }
 0x1fd   : > { %s1541_s14 = smov %s1259_s15  ;;  %s1542_s15 = smov %s1263_s16 }
 0x1fe   : > { %s1543_s16 = smov %s1377_s28  ;;  %s1544_s17 = smov %s1275_s19 }
 0x1ff   : > { %s1545_s18 = smov %s1279_s20  ;;  %15 = sbr.rel (!%p13_p8) target bundleno = 6 (0x6), region = 111 }
 0x200   : > { %s1546_s19 = smov %s1537_s7 }
 0x201   : > { %s1547_s20 = smov %s1538_s22 }
 0x204   :  { %812 = vsyncpa [#allocation4], 1 }
 0x205   :  { %814 = vsyncpa [#allocation4 + $0x1], 1 }

// kernel: llm_forward.13
= control target key start
LH: loop header
LB: loop body
LE: loop exit
PB: predicated region body
PF: predicated region fallthrough
CT: control target
= control target key end

     0   :  { %s1446_s12 = smov 0   ;;  %s1448_s13 = smov 0   ;;  %s1765_s0 = inlined_call_operand.vmem [shape: bf16[2,16,256], index: 0, kind: input, shape index: {}]   ;;  %s1766_s1 = inlined_call_operand.vmem [shape: f32[1,256], index: 1, kind: input, shape index: {}]   ;;  %s1767_s2 = inlined_call_operand.vmem [shape: bf16[256,768], index: 2, kind: input, shape index: {}]   ;;  %s1768_s3 = inlined_call_operand.vmem [shape: bf16[2,16,768], index: 3, kind: output, shape index: {}]  }
   0x1   :  { %s1450_s14 = smov 0   ;;  %s1452_s15 = smov 0  }
   0x2   :  { %s1454_s16 = smov 0   ;;  %s1456_s17 = smov 0  }
   0x3   :  { %s1458_s18 = smov 0   ;;  %s1460_s19 = smov 0  }
   0x4   :  { %s1462_s20 = smov 0  }
   0x5 LB: > { %s1041_s21 = sadd.s32 4294967295, %s1424_s20   ;;  %s25_s22 = sadd.s32 1, %s1416_s18  ;;  %s1424_s20 = sphi %s1462_s20, %s13_s20   ;;  %s1420_s19 = sphi %s1460_s19, %s1777_s19   ;;  %s1416_s18 = sphi %s1458_s18, %s1776_s18   ;;  %s1412_s17 = sphi %s1456_s17, %s1775_s17   ;;  %s1408_s16 = sphi %s1454_s16, %s1774_s16   ;;  %s1404_s15 = sphi %s1452_s15, %s1773_s15   ;;  %s1400_s14 = sphi %s1450_s14, %s1772_s14   ;;  %s1396_s13 = sphi %s1448_s13, %s1771_s13   ;;  %s1392_s12 = sphi %s1446_s12, %s1770_s12  }
   0x6   : > { %p26_p0 = scmp.ge.s32.totalorder %s25_s22, 2  ;;  %s32_s23 = sadd.s32 1, %s1420_s19 }
   0x7   : > { %s88_s24 = sadd.s32 1, %s1404_s15  ;;  %p95_p1 = scmp.ne.s32.totalorder %s1404_s15, %s1400_s14 }
   0x8   : > { %s1779_s22 = smov (%p26_p0, %s25_s22), 0  ;;  %s1781_s23 = smov (!%p26_p0, %s32_s23), %s1420_s19 }
   0x9   : > { %s85_s25 = ssub.s32 %s1416_s18, %s1779_s22  ;;  %p96_p2 = scmp.eq.s32.totalorder %s1424_s20, 0 }
   0xa   : > { %p34_p3 = scmp.ge.s32.totalorder %s1781_s23, 2  ;;  %p86_p4 = scmp.eq.s32.totalorder %s85_s25, 0 }
   0xb   : > { %p97_p5 = por %p96_p2, %p95_p1  ;;  %s118_s26 = sadd.s32 1, %s1396_s13 }
   0xc   : > { %s1783_s23 = smov (%p34_p3, %s1781_s23), 0  ;;  %p128_p6 = scmp.ne.s32.totalorder %s1396_s13, %s1392_s12 }
   0xd   : > { %s1507_s27 = scalar_select %p86_p4, %s1404_s15, %s88_s24  }
   0xe   : > { %s111_s28 = ssub.s32 %s1420_s19, %s1783_s23  ;;  %p129_p7 = scmp.eq.s32.totalorder %s1041_s21, 3 }
   0xf   : > { %s115_s29 = sor.u32 %s111_s28, %s85_s25  ;;  %p1044_p10 = scmp.ge.s32.totalorder %s1424_s20, 4 }
  0x10   : > { %p116_p8 = scmp.eq.s32.totalorder %s115_s29, 0  ;;  %p1513_p9 = por %p129_p7, %p128_p6 }
  0x11   : > { %154 = sbr.rel (%p1044_p10) target bundleno = 64 (0x40), region = 20 }
  0x12   : > { %s1518_s4 = scalar_select %p116_p8, %s1396_s13, %s118_s26  }
  0x16   : > { %171 = sbr.rel (!%p97_p5) target bundleno = 64 (0x40), region = 28  ;;  %s173_s5 = sand.u32 (%p97_p5), 1, %s1404_s15  }
  0x17   : > { %s1177_s6 = smul.u32 (%p97_p5), 12, %s1416_s18 }
  0x18   : > { %s1207_s7 = smul.u32 (%p97_p5), 384, %s173_s5 }
  0x19   : > { %s1526_s10 = scalar_lea.vmem (%p97_p5), %s1767_s2, %s1177_s6 }
  0x1a   : > { %v193_v0 = vld [vmem:[%s1526_s10] sm:$0xff] (%p97_p5)  ;;  %v195_v1 = vld [vmem:[%s1526_s10 + $0x18] sm:$0xff] (%p97_p5)  ;;  %v197_v2 = vld [vmem:[%s1526_s10 + $0x30] sm:$0xff] (%p97_p5)  ;;  %s1531_s11 = scalar_lea.vmem (%p97_p5), [#allocation3], %s1207_s7 }
  0x1b   : > { %194 = vst [vmem:[%s1531_s11] sm:$0xff] %v193_v0  ;;  %196 = vst [vmem:[%s1531_s11 + $0xc] sm:$0xff] %v195_v1  ;;  %v199_v3 = vld [vmem:[%s1526_s10 + $0x48] sm:$0xff]  ;;  %v201_v4 = vld [vmem:[%s1526_s10 + $0x60] sm:$0xff] }
  0x1c   : > { %198 = vst [vmem:[%s1531_s11 + $0x18] sm:$0xff] %v197_v2  ;;  %v203_v5 = vld [vmem:[%s1526_s10 + $0x78] sm:$0xff]  ;;  %200 = vst [vmem:[%s1531_s11 + $0x24] sm:$0xff] %v199_v3  ;;  %v205_v6 = vld [vmem:[%s1526_s10 + $0x90] sm:$0xff] }
  0x1d   : > { %202 = vst [vmem:[%s1531_s11 + $0x30] sm:$0xff] %v201_v4  ;;  %204 = vst [vmem:[%s1531_s11 + $0x3c] sm:$0xff] %v203_v5  ;;  %v207_v7 = vld [vmem:[%s1526_s10 + $0xa8] sm:$0xff]  ;;  %v209_v8 = vld [vmem:[%s1526_s10 + $0xc0] sm:$0xff] }
  0x1e   : > { %206 = vst [vmem:[%s1531_s11 + $0x48] sm:$0xff] %v205_v6  ;;  %208 = vst [vmem:[%s1531_s11 + $0x54] sm:$0xff] %v207_v7  ;;  %v211_v9 = vld [vmem:[%s1526_s10 + $0xd8] sm:$0xff]  ;;  %v213_v10 = vld [vmem:[%s1526_s10 + $0xf0] sm:$0xff] }
  0x1f   : > { %210 = vst [vmem:[%s1531_s11 + $0x60] sm:$0xff] %v209_v8  ;;  %v215_v11 = vld [vmem:[%s1526_s10 + $0x108] sm:$0xff]  ;;  %212 = vst [vmem:[%s1531_s11 + $0x6c] sm:$0xff] %v211_v9  ;;  %v217_v12 = vld [vmem:[%s1526_s10 + $0x120] sm:$0xff] }
  0x20   : > { %214 = vst [vmem:[%s1531_s11 + $0x78] sm:$0xff] %v213_v10  ;;  %216 = vst [vmem:[%s1531_s11 + $0x84] sm:$0xff] %v215_v11  ;;  %v219_v13 = vld [vmem:[%s1526_s10 + $0x138] sm:$0xff]  ;;  %v221_v14 = vld [vmem:[%s1526_s10 + $0x150] sm:$0xff] }
  0x21   : > { %218 = vst [vmem:[%s1531_s11 + $0x90] sm:$0xff] %v217_v12  ;;  %220 = vst [vmem:[%s1531_s11 + $0x9c] sm:$0xff] %v219_v13  ;;  %v223_v15 = vld [vmem:[%s1526_s10 + $0x168] sm:$0xff]  ;;  %v225_v16 = vld [vmem:[%s1526_s10 + $0x180] sm:$0xff] }
  0x22   : > { %222 = vst [vmem:[%s1531_s11 + $0xa8] sm:$0xff] %v221_v14  ;;  %v227_v17 = vld [vmem:[%s1526_s10 + $0x198] sm:$0xff]  ;;  %224 = vst [vmem:[%s1531_s11 + $0xb4] sm:$0xff] %v223_v15  ;;  %v229_v18 = vld [vmem:[%s1526_s10 + $0x1b0] sm:$0xff] }
  0x23   : > { %226 = vst [vmem:[%s1531_s11 + $0xc0] sm:$0xff] %v225_v16  ;;  %228 = vst [vmem:[%s1531_s11 + $0xcc] sm:$0xff] %v227_v17  ;;  %v231_v19 = vld [vmem:[%s1526_s10 + $0x1c8] sm:$0xff]  ;;  %v233_v20 = vld [vmem:[%s1526_s10 + $0x1e0] sm:$0xff] }
  0x24   : > { %230 = vst [vmem:[%s1531_s11 + $0xd8] sm:$0xff] %v229_v18  ;;  %232 = vst [vmem:[%s1531_s11 + $0xe4] sm:$0xff] %v231_v19  ;;  %v235_v21 = vld [vmem:[%s1526_s10 + $0x1f8] sm:$0xff]  ;;  %v237_v22 = vld [vmem:[%s1526_s10 + $0x210] sm:$0xff] }
  0x25   : > { %234 = vst [vmem:[%s1531_s11 + $0xf0] sm:$0xff] %v233_v20  ;;  %v239_v23 = vld [vmem:[%s1526_s10 + $0x228] sm:$0xff]  ;;  %236 = vst [vmem:[%s1531_s11 + $0xfc] sm:$0xff] %v235_v21  ;;  %v241_v24 = vld [vmem:[%s1526_s10 + $0x240] sm:$0xff] }
  0x26   : > { %238 = vst [vmem:[%s1531_s11 + $0x108] sm:$0xff] %v237_v22  ;;  %240 = vst [vmem:[%s1531_s11 + $0x114] sm:$0xff] %v239_v23  ;;  %v243_v25 = vld [vmem:[%s1526_s10 + $0x258] sm:$0xff]  ;;  %v245_v26 = vld [vmem:[%s1526_s10 + $0x270] sm:$0xff] }
  0x27   : > { %242 = vst [vmem:[%s1531_s11 + $0x120] sm:$0xff] %v241_v24  ;;  %244 = vst [vmem:[%s1531_s11 + $0x12c] sm:$0xff] %v243_v25  ;;  %v247_v27 = vld [vmem:[%s1526_s10 + $0x288] sm:$0xff]  ;;  %v249_v28 = vld [vmem:[%s1526_s10 + $0x2a0] sm:$0xff] }
  0x28   : > { %246 = vst [vmem:[%s1531_s11 + $0x138] sm:$0xff] %v245_v26  ;;  %v251_v29 = vld [vmem:[%s1526_s10 + $0x2b8] sm:$0xff]  ;;  %248 = vst [vmem:[%s1531_s11 + $0x144] sm:$0xff] %v247_v27  ;;  %v253_v30 = vld [vmem:[%s1526_s10 + $0x2d0] sm:$0xff] }
  0x29   : > { %250 = vst [vmem:[%s1531_s11 + $0x150] sm:$0xff] %v249_v28  ;;  %252 = vst [vmem:[%s1531_s11 + $0x15c] sm:$0xff] %v251_v29  ;;  %v255_v31 = vld [vmem:[%s1526_s10 + $0x2e8] sm:$0xff]  ;;  %v1048_v33 = vld [vmem:[%s1526_s10 + $0x20] sm:$0xf] }
  0x2a   : > { %v1046_v32 = vld [vmem:[%s1526_s10 + $0x8] sm:$0xf]  ;;  %254 = vst [vmem:[%s1531_s11 + $0x168] sm:$0xff] %v253_v30  ;;  %256 = vst [vmem:[%s1531_s11 + $0x174] sm:$0xff] %v255_v31  ;;  %v1050_v34 = vld [vmem:[%s1526_s10 + $0x38] sm:$0xf] }
  0x2b   : > { %1047 = vst [vmem:[%s1531_s11 + $0x8] sm:$0xf] %v1046_v32  ;;  %v1052_v35 = vld [vmem:[%s1526_s10 + $0x50] sm:$0xf]  ;;  %1049 = vst [vmem:[%s1531_s11 + $0x14] sm:$0xf] %v1048_v33 }
  0x2c   : > { %1051 = vst [vmem:[%s1531_s11 + $0x20] sm:$0xf] %v1050_v34  ;;  %1053 = vst [vmem:[%s1531_s11 + $0x2c] sm:$0xf] %v1052_v35  ;;  %v1054_v36 = vld [vmem:[%s1526_s10 + $0x68] sm:$0xf] }
  0x2d   : > { %v1056_v37 = vld [vmem:[%s1526_s10 + $0x80] sm:$0xf]  ;;  %v1058_v38 = vld [vmem:[%s1526_s10 + $0x98] sm:$0xf]  ;;  %1055 = vst [vmem:[%s1531_s11 + $0x38] sm:$0xf] %v1054_v36 }
  0x2e   : > { %1057 = vst [vmem:[%s1531_s11 + $0x44] sm:$0xf] %v1056_v37  ;;  %1059 = vst [vmem:[%s1531_s11 + $0x50] sm:$0xf] %v1058_v38  ;;  %v1060_v39 = vld [vmem:[%s1526_s10 + $0xb0] sm:$0xf] }
  0x2f   : > { %v1062_v40 = vld [vmem:[%s1526_s10 + $0xc8] sm:$0xf]  ;;  %v1064_v41 = vld [vmem:[%s1526_s10 + $0xe0] sm:$0xf]  ;;  %1061 = vst [vmem:[%s1531_s11 + $0x5c] sm:$0xf] %v1060_v39 }
  0x30   : > { %1063 = vst [vmem:[%s1531_s11 + $0x68] sm:$0xf] %v1062_v40  ;;  %1065 = vst [vmem:[%s1531_s11 + $0x74] sm:$0xf] %v1064_v41  ;;  %v1066_v42 = vld [vmem:[%s1526_s10 + $0xf8] sm:$0xf] }
  0x31   : > { %v1068_v43 = vld [vmem:[%s1526_s10 + $0x110] sm:$0xf]  ;;  %v1070_v44 = vld [vmem:[%s1526_s10 + $0x128] sm:$0xf]  ;;  %1067 = vst [vmem:[%s1531_s11 + $0x80] sm:$0xf] %v1066_v42 }
  0x32   : > { %1069 = vst [vmem:[%s1531_s11 + $0x8c] sm:$0xf] %v1068_v43  ;;  %1071 = vst [vmem:[%s1531_s11 + $0x98] sm:$0xf] %v1070_v44  ;;  %v1072_v45 = vld [vmem:[%s1526_s10 + $0x140] sm:$0xf] }
  0x33   : > { %v1074_v46 = vld [vmem:[%s1526_s10 + $0x158] sm:$0xf]  ;;  %v1076_v47 = vld [vmem:[%s1526_s10 + $0x170] sm:$0xf]  ;;  %1073 = vst [vmem:[%s1531_s11 + $0xa4] sm:$0xf] %v1072_v45 }
  0x34   : > { %1075 = vst [vmem:[%s1531_s11 + $0xb0] sm:$0xf] %v1074_v46  ;;  %1077 = vst [vmem:[%s1531_s11 + $0xbc] sm:$0xf] %v1076_v47  ;;  %v1078_v48 = vld [vmem:[%s1526_s10 + $0x188] sm:$0xf] }
  0x35   : > { %v1080_v49 = vld [vmem:[%s1526_s10 + $0x1a0] sm:$0xf]  ;;  %v1082_v50 = vld [vmem:[%s1526_s10 + $0x1b8] sm:$0xf]  ;;  %1079 = vst [vmem:[%s1531_s11 + $0xc8] sm:$0xf] %v1078_v48 }
  0x36   : > { %1081 = vst [vmem:[%s1531_s11 + $0xd4] sm:$0xf] %v1080_v49  ;;  %1083 = vst [vmem:[%s1531_s11 + $0xe0] sm:$0xf] %v1082_v50  ;;  %v1084_v51 = vld [vmem:[%s1526_s10 + $0x1d0] sm:$0xf] }
  0x37   : > { %v1086_v52 = vld [vmem:[%s1526_s10 + $0x1e8] sm:$0xf]  ;;  %v1088_v53 = vld [vmem:[%s1526_s10 + $0x200] sm:$0xf]  ;;  %1085 = vst [vmem:[%s1531_s11 + $0xec] sm:$0xf] %v1084_v51 }
  0x38   : > { %1087 = vst [vmem:[%s1531_s11 + $0xf8] sm:$0xf] %v1086_v52  ;;  %1089 = vst [vmem:[%s1531_s11 + $0x104] sm:$0xf] %v1088_v53  ;;  %v1090_v54 = vld [vmem:[%s1526_s10 + $0x218] sm:$0xf] }
  0x39   : > { %v1092_v55 = vld [vmem:[%s1526_s10 + $0x230] sm:$0xf]  ;;  %v1094_v56 = vld [vmem:[%s1526_s10 + $0x248] sm:$0xf]  ;;  %1091 = vst [vmem:[%s1531_s11 + $0x110] sm:$0xf] %v1090_v54 }
  0x3a   : > { %1093 = vst [vmem:[%s1531_s11 + $0x11c] sm:$0xf] %v1092_v55  ;;  %1095 = vst [vmem:[%s1531_s11 + $0x128] sm:$0xf] %v1094_v56  ;;  %v1096_v57 = vld [vmem:[%s1526_s10 + $0x260] sm:$0xf] }
  0x3b   : > { %v1098_v58 = vld [vmem:[%s1526_s10 + $0x278] sm:$0xf]  ;;  %v1100_v59 = vld [vmem:[%s1526_s10 + $0x290] sm:$0xf]  ;;  %1097 = vst [vmem:[%s1531_s11 + $0x134] sm:$0xf] %v1096_v57 }
  0x3c   : > { %1099 = vst [vmem:[%s1531_s11 + $0x140] sm:$0xf] %v1098_v58  ;;  %1101 = vst [vmem:[%s1531_s11 + $0x14c] sm:$0xf] %v1100_v59  ;;  %v1102_v60 = vld [vmem:[%s1526_s10 + $0x2a8] sm:$0xf] }
  0x3d   : > { %v1104_v61 = vld [vmem:[%s1526_s10 + $0x2c0] sm:$0xf]  ;;  %v1106_v62 = vld [vmem:[%s1526_s10 + $0x2d8] sm:$0xf]  ;;  %1103 = vst [vmem:[%s1531_s11 + $0x158] sm:$0xf] %v1102_v60 }
  0x3e   : > { %1105 = vst [vmem:[%s1531_s11 + $0x164] sm:$0xf] %v1104_v61  ;;  %1107 = vst [vmem:[%s1531_s11 + $0x170] sm:$0xf] %v1106_v62  ;;  %v1108_v63 = vld [vmem:[%s1526_s10 + $0x2f0] sm:$0xf] }
  0x3f   : > { %1109 = vst [vmem:[%s1531_s11 + $0x17c] sm:$0xf] %v1108_v63 }
  0x40 PF: > { %p1110_p11 = scmp.ge.s32.totalorder %s1424_s20, 1  ;;  %p333_p12 = scmp.lt.s32.totalorder %s1424_s20, 5 }
  0x42   : > { %p334_p13 = pnand %p1110_p11, %p333_p12 }
  0x43   : > { %s340_s21 = sand.u32 (!%p334_p13), 1, %s1400_s14   ;;  %s369_s24 = sand.u32 (!%p334_p13), 1, %s1392_s12  }
  0x44   : > { %337 = sbr.rel (%p334_p13) target bundleno = 528 (0x210), region = 54  ;;  %p373_p0 = scmp.lt.s32.totalorder (!%p334_p13), %s1412_s17, 1 }
  0x45   : > { %s1208_s25 = smul.u32 (!%p334_p13), 384, %s340_s21  ;;  %p1113_p1 = scmp.ne.s32.totalorder (!%p334_p13), %s1408_s16, 0 }
  0x46   : > { %s1209_s26 = smul.u32 (!%p334_p13), 24, %s369_s24 }
  0x47   : > { %s1667_s8 = scalar_lea.vmem (!%p334_p13), [#allocation3], %s1208_s25 }
  0x48   : > { %s1669_s9 = scalar_lea.vmem (!%p334_p13), [#allocation4], %s1209_s26 }
  0x49   : > { %s374_s28 = scalar_select %p373_p0, %s1412_s17, 1 }
  0x4a   : > { %390 = sbr.rel (%p1113_p1) target bundleno = 253 (0xfd), region = 62 }
  0x4b   : > { %s1178_s29 = sshll.u32 %s374_s28, 4 }
  0x4c   : > { %s381_s7 = scalar_lea.vmem %s1765_s0, %s1178_s29 }
  0x4f   : > { %v391_v0 = vld [vmem:[%s381_s7] sm:$0xff]  ;;  %v392_v1 = vld [vmem:[%s381_s7 + $0x8] sm:$0xff]  ;;  %v420_v16 = vlaneseq }
  0x50   : > { %v393_v2 = vunpack.c.l.bf16 %v391_v0  ;;  %v394_v3 = vunpack.c.h.bf16 %v391_v0  ;;  %v395_v4 = vunpack.c.l.bf16 %v392_v1  ;;  %v396_v5 = vunpack.c.h.bf16 %v392_v1  ;;  %v418_v22 = vld [vmem:[%s1766_s1] sm:$0x3] }
  0x51   : > { %v421_v19 = vshrl.u32 %v420_v16, 7 }
  0x52   : > { %v397_v6 = vmul.f32 %v393_v2, %v393_v2  ;;  %v398_v7 = vmul.f32 %v394_v3, %v394_v3  ;;  %v399_v8 = vmul.f32 %v395_v4, %v395_v4  ;;  %v400_v9 = vmul.f32 %v396_v5, %v396_v5 }
  0x53   : > { %v422_v20 = vsub.s32 0, %v421_v19  ;;  %v426_v21 = vsub.s32 1, %v421_v19 }
  0x54   : > { %v401_v10 = vadd.f32 %v398_v7, %v397_v6  ;;  %v404_v11 = vadd.f32 %v400_v9, %v399_v8 }
  0x55   : > { %v423_v23 = vrot.slane %v418_v22, %v422_v20  ;;  %v427_v24 = vrot.slane %v418_v22, %v426_v21 }
  0x56   : > { %402 = vadd.xlane.f32.xlu0 %v401_v10 }
  0x5a   : > { %405 = vadd.xlane.f32.xlu0 %v404_v11 }
  0xdf   : > { %v403_v12 = vpop.xlane.xlu0 %402 }
  0xe0   : > { %v408_v13 = vmul.f32 0.00390625, %v403_v12 }
  0xe2   : > { %v410_v14 = vadd.f32 1e-06, %v408_v13 }
  0xe3   : > { %v406_v15 = vpop.xlane.xlu0 %405 }
  0xe4   : > { %1283 = vrsqrt.f32 %v410_v14  ;;  %v409_v17 = vmul.f32 0.00390625, %v406_v15 }
  0xe6   : > { %v411_v18 = vadd.f32 1e-06, %v409_v17 }
  0xe8   : > { %1285 = vrsqrt.f32 %v411_v18 }
  0xf1   : > { %v1284_v25 = vpop.eup %1283 }
  0xf2   : > { %v414_v26 = vmul.f32 %v1284_v25, %v393_v2  ;;  %v415_v27 = vmul.f32 %v1284_v25, %v394_v3 }
  0xf4   : > { %v430_v28 = vmul.f32 %v423_v23, %v414_v26  ;;  %v431_v29 = vmul.f32 %v427_v24, %v415_v27 }
  0xf5   : > { %v1286_v30 = vpop.eup %1285 }
  0xf6   : > { %v1179_v31 = vpack.c.bf16 %v431_v29, %v430_v28  ;;  %v416_v32 = vmul.f32 %v1286_v30, %v395_v4  ;;  %v417_v33 = vmul.f32 %v1286_v30, %v396_v5 }
  0xf8   : > { %446 = vst [vmem:[#allocation2] sm:$0xff] %v1179_v31  ;;  %v432_v34 = vmul.f32 %v423_v23, %v416_v32  ;;  %v433_v35 = vmul.f32 %v427_v24, %v417_v33 }
  0xfa   : > { %v1180_v36 = vpack.c.bf16 %v433_v35, %v432_v34 }
  0xfc   : > { %447 = vst [vmem:[#allocation2 + $0x8] sm:$0xff] %v1180_v36 }
  0xfd PF: > { %v1287_v37 = vld [vmem:[%s1667_s8 + $0xac] ss:$12 sps:$4 sm:$0xff]   ;;  %v1289_v38 = vld [vmem:[%s1667_s8 + $0xa8] ss:$12 sps:$4 sm:$0xff]   ;;  %v1292_v40 = vld [vmem:[%s1667_s8 + $0x90] ss:$12 sps:$4 sm:$0xff]  }
  0xfe   : > { %780 = vmatprep.subr.bf16.mxu0 %v1287_v37  ;;  %v1290_v39 = vld [vmem:[%s1667_s8 + $0x94] ss:$12 sps:$4 sm:$0xff]   ;;  %v1293_v41 = vld [vmem:[%s1667_s8 + $0x7c] ss:$12 sps:$4 sm:$0xff]   ;;  %v1295_v42 = vld [vmem:[%s1667_s8 + $0x78] ss:$12 sps:$4 sm:$0xff]  }
  0xff   : > { %781 = vmatpush1.bf16.msra.mxu0 %v1289_v38  ;;  %v1296_v43 = vld [vmem:[%s1667_s8 + $0x64] ss:$12 sps:$4 sm:$0xff]   ;;  %v1298_v45 = vld [vmem:[%s1667_s8 + $0x60] ss:$12 sps:$4 sm:$0xff]   ;;  %v1301_v50 = vld [vmem:[%s1667_s8 + $0x48] ss:$12 sps:$4 sm:$0xff]  }
 0x100   : > { %782 = vmatprep.subr.bf16.mxu0 %v1290_v39  ;;  %v1307_v44 = vld [vmem:[%s1667_s8 + $0x170] ss:$12 sps:$4 sm:$0xff]   ;;  %v1299_v47 = vld [vmem:[%s1667_s8 + $0x4c] ss:$12 sps:$4 sm:$0xff]   ;;  %v1302_v51 = vld [vmem:[%s1667_s8 + $0x34] ss:$12 sps:$4 sm:$0xff]  }
 0x101   : > { %1185 = vmatprep.subr.bf16.mxu1 %v1307_v44  ;;  %v1309_v46 = vld [vmem:[%s1667_s8 + $0xb0] ss:$12 sps:$4 sm:$0xff]   ;;  %v1312_v48 = vld [vmem:[%s1667_s8 + $0x158] ss:$12 sps:$4 sm:$0xff]   ;;  %v1317_v52 = vld [vmem:[%s1667_s8 + $0x140] ss:$12 sps:$4 sm:$0xff]  }
 0x102   : > { %1186 = vmatpush3.bf16.msra.mxu1 %v1309_v46  ;;  %v1314_v49 = vld [vmem:[%s1667_s8 + $0x98] ss:$12 sps:$4 sm:$0xff]   ;;  %v1319_v53 = vld [vmem:[%s1667_s8 + $0x80] ss:$12 sps:$4 sm:$0xff]   ;;  %v1304_v54 = vld [vmem:[%s1667_s8 + $0x30] ss:$12 sps:$4 sm:$0xff]  }
 0x103   : > { %783 = vmatpush1.bf16.msra.mxu0 %v1292_v40  ;;  %1187 = vmatprep.subr.bf16.mxu1 %v1312_v48  ;;  %v1322_v55 = vld [vmem:[%s1667_s8 + $0x128] ss:$12 sps:$4 sm:$0xff]   ;;  %v1308_v58 = vld [vmem:[%s1667_s8 + $0x18] ss:$12 sps:$4 sm:$0xff]   ;;  %v1327_v59 = vld [vmem:[%s1667_s8 + $0x110] ss:$12 sps:$4 sm:$0xff]  }
 0x104   : > { %784 = vmatprep.subr.bf16.mxu0 %v1293_v41  ;;  %v1305_v56 = vld [vmem:[%s1667_s8 + $0x1c] ss:$12 sps:$4 sm:$0xff]   ;;  %v1310_v60 = vld [vmem:[%s1667_s8 + $0x4] ss:$12 sps:$4 sm:$0xff]   ;;  %v1313_v63 = vld [vmem:[%s1667_s8] ss:$12 sps:$4 sm:$0xff]  }
 0x105   : > { %v1324_v57 = vld [vmem:[%s1667_s8 + $0x68] ss:$12 sps:$4 sm:$0xff]   ;;  %v1329_v61 = vld [vmem:[%s1667_s8 + $0x50] ss:$12 sps:$4 sm:$0xff]   ;;  %v1332_v62 = vld [vmem:[%s1667_s8 + $0xf8] ss:$12 sps:$4 sm:$0xff]  }
 0x106   : > { %1188 = vmatpush3.bf16.msra.mxu1 %v1314_v49  ;;  %v1315_v0 = vld [vmem:[%s1667_s8 + $0x16c] ss:$12 sps:$4 sm:$0xff]   ;;  %v1318_v3 = vld [vmem:[%s1667_s8 + $0x168] ss:$12 sps:$4 sm:$0xff]   ;;  %v1323_v7 = vld [vmem:[%s1667_s8 + $0x150] ss:$12 sps:$4 sm:$0xff]  }
 0x107   : > { %785 = vmatpush1.bf16.msra.mxu0 %v1295_v42  ;;  %1189 = vmatprep.subr.bf16.mxu1 %v1317_v52  ;;  %v1334_v1 = vld [vmem:[%s1667_s8 + $0x38] ss:$12 sps:$4 sm:$0xff]   ;;  %v1337_v2 = vld [vmem:[%s1667_s8 + $0xe0] ss:$12 sps:$4 sm:$0xff]   ;;  %v1342_v6 = vld [vmem:[%s1667_s8 + $0xc8] ss:$12 sps:$4 sm:$0xff]  }
 0x108   : > { %786 = vmatprep.subr.bf16.mxu0 %v1296_v43  ;;  %v1320_v4 = vld [vmem:[%s1667_s8 + $0x154] ss:$12 sps:$4 sm:$0xff]   ;;  %v1325_v9 = vld [vmem:[%s1667_s8 + $0x13c] ss:$12 sps:$4 sm:$0xff]   ;;  %v1328_v11 = vld [vmem:[%s1667_s8 + $0x138] ss:$12 sps:$4 sm:$0xff]  }
 0x109   : > { %v1339_v5 = vld [vmem:[%s1667_s8 + $0x20] ss:$12 sps:$4 sm:$0xff]   ;;  %v1347_v8 = vld [vmem:[#allocation2 + $0x4] ss:$8 sps:$4 sm:$0xff]   ;;  %v1330_v12 = vld [vmem:[%s1667_s8 + $0x124] ss:$12 sps:$4 sm:$0xff]  }
 0x10a   : > { %1190 = vmatpush3.bf16.msra.mxu1 %v1319_v53  ;;  %v1344_v10 = vld [vmem:[%s1667_s8 + $0x8] ss:$12 sps:$4 sm:$0xff]   ;;  %855 = vmatprep.mubr.bf16.mxu1 %v1347_v8  ;;  %v1345_v13 = vld [vmem:[#allocation2] ss:$8 sps:$4 sm:$0xff]   ;;  %v1333_v14 = vld [vmem:[%s1667_s8 + $0x120] ss:$12 sps:$4 sm:$0xff]  }
 0x10b   : > { %787 = vmatpush1.bf16.msra.mxu0 %v1298_v45  ;;  %1191 = vmatprep.subr.bf16.mxu1 %v1322_v55  ;;  %v1335_v15 = vld [vmem:[%s1667_s8 + $0x10c] ss:$12 sps:$4 sm:$0xff]   ;;  %v1338_v16 = vld [vmem:[%s1667_s8 + $0x108] ss:$12 sps:$4 sm:$0xff]   ;;  %v1343_v18 = vld [vmem:[%s1667_s8 + $0xf0] ss:$12 sps:$4 sm:$0xff]  }
 0x10c   : > { %788 = vmatprep.subr.bf16.mxu0 %v1299_v47  ;;  %812 = vmatprep.mubr.bf16.mxu0 %v1347_v8  ;;  %v1340_v17 = vld [vmem:[%s1667_s8 + $0xf4] ss:$12 sps:$4 sm:$0xff]   ;;  %v1348_v19 = vld [vmem:[%s1667_s8 + $0xdc] ss:$12 sps:$4 sm:$0xff]   ;;  %v1350_v20 = vld [vmem:[%s1667_s8 + $0xd8] ss:$12 sps:$4 sm:$0xff]  }
 0x10d   : > { %v1351_v21 = vld [vmem:[%s1667_s8 + $0xc4] ss:$12 sps:$4 sm:$0xff]   ;;  %v1353_v22 = vld [vmem:[%s1667_s8 + $0xc0] ss:$12 sps:$4 sm:$0xff]   ;;  %s896_s10 = smul.u32 (%p1513_p9), 3, %s1408_s16 }
 0x10e   : > { %1192 = vmatpush3.bf16.msra.mxu1 %v1324_v57  ;;  %s1210_s11 = smul.u32 (%p1513_p9), 12, %s1412_s17 }
 0x10f   : > { %789 = vmatpush1.bf16.msra.mxu0 %v1301_v50  ;;  %1193 = vmatprep.subr.bf16.mxu1 %v1327_v59 }
 0x110   : > { %790 = vmatprep.subr.bf16.mxu0 %v1302_v51  ;;  %s900_s21 = sadd.s32 (%p1513_p9), %s1210_s11, %s896_s10 }
 0x111   : > { %s1170_s24 = sshll.u32 (%p1513_p9), %s900_s21, 2 }
 0x112   : > { %1194 = vmatpush3.bf16.msra.mxu1 %v1329_v61  ;;  %s902_s28 = scalar_lea.vmem (%p1513_p9), %s1768_s3, %s1170_s24 }
 0x113   : > { %791 = vmatpush1.bf16.msra.mxu0 %v1304_v54  ;;  %1195 = vmatprep.subr.bf16.mxu1 %v1332_v62 }
 0x114   : > { %792 = vmatprep.subr.bf16.mxu0 %v1305_v56 }
 0x116   : > { %1196 = vmatpush3.bf16.msra.mxu1 %v1334_v1 }
 0x117   : > { %793 = vmatpush1.bf16.msra.mxu0 %v1308_v58  ;;  %1197 = vmatprep.subr.bf16.mxu1 %v1337_v2 }
 0x118   : > { %794 = vmatprep.subr.bf16.mxu0 %v1310_v60 }
 0x11a   : > { %1198 = vmatpush3.bf16.msra.mxu1 %v1339_v5 }
 0x11b   : > { %795 = vmatpush1.bf16.msra.mxu0 %v1313_v63  ;;  %1199 = vmatprep.subr.bf16.mxu1 %v1342_v6 }
 0x11c   : > { %796 = vmatprep.subr.bf16.mxu0 %v1315_v0 }
 0x11e   : > { %1200 = vmatpush3.bf16.msra.mxu1 %v1344_v10 }
 0x11f   : > { %797 = vmatpush2.bf16.msra.mxu0 %v1318_v3 }
 0x120   : > { %798 = vmatprep.subr.bf16.mxu0 %v1320_v4 }
 0x121   : > { %856 = vmatmul.mubr.bf16.vlgmr.msra.gmra.mxu1 %v1345_v13 }
 0x123   : > { %799 = vmatpush2.bf16.msra.mxu0 %v1323_v7 }
 0x124   : > { %800 = vmatprep.subr.bf16.mxu0 %v1325_v9 }
 0x127   : > { %801 = vmatpush2.bf16.msra.mxu0 %v1328_v11 }
 0x128   : > { %802 = vmatprep.subr.bf16.mxu0 %v1330_v12 }
 0x12b   : > { %803 = vmatpush2.bf16.msra.mxu0 %v1333_v14 }
 0x12c   : > { %804 = vmatprep.subr.bf16.mxu0 %v1335_v15 }
 0x12f   : > { %805 = vmatpush2.bf16.msra.mxu0 %v1338_v16 }
 0x130   : > { %806 = vmatprep.subr.bf16.mxu0 %v1340_v17 }
 0x133   : > { %807 = vmatpush2.bf16.msra.mxu0 %v1343_v18 }
 0x134   : > { %808 = vmatprep.subr.bf16.mxu0 %v1348_v19 }
 0x137   : > { %809 = vmatpush2.bf16.msra.mxu0 %v1350_v20 }
 0x138   : > { %810 = vmatprep.subr.bf16.mxu0 %v1351_v21 }
 0x13b   : > { %811 = vmatpush2.bf16.msra.mxu0 %v1353_v22 }
 0x13e   : > { %813 = vmatmul.mubr.bf16.vlgmr.msra.gmra.mxu0 %v1345_v13 }
 0x1e1   : > { %v1201_v23 = vpop.f32.mrf.mxu1 }
 0x1e3   : > { %v1202_v24 = vpop.f32.mrf.mxu1 }
 0x1e4   : > { %v1203_v25 = vadd.f32 %v1202_v24, %v1201_v23 }
 0x1e5   : > { %v1204_v26 = vpop.f32.mrf.mxu1 }
 0x1e6   : > { %v1182_v27 = vpack.c.bf16 %v1203_v25, %v1203_v25 }
 0x1e7   : > { %v1205_v28 = vpop.f32.mrf.mxu1 }
 0x1e8   : > { %885 = vst [vmem:[%s1669_s9 + $0x8] sm:$0xf] %v1182_v27  ;;  %v1206_v29 = vadd.f32 %v1205_v28, %v1204_v26 }
 0x1ea   : > { %v1184_v30 = vpack.c.bf16 %v1206_v29, %v1206_v29 }
 0x1ec   : > { %887 = vst [vmem:[%s1669_s9 + $0x14] sm:$0xf] %v1184_v30 }
 0x1ef   : > { %v1171_v39 = vld [vmem:[%s1669_s9 + $0x8] sm:$0xf] (%p1513_p9) }
 0x1f0   : > { %1172 = vst [vmem:[%s902_s28 + $0x8] sm:$0xf] (%p1513_p9), %v1171_v39 }
 0x1f3   : > { %v1173_v40 = vld [vmem:[%s1669_s9 + $0x14] sm:$0xf] (%p1513_p9) }
 0x1f4   : > { %1174 = vst [vmem:[%s902_s28 + $0x20] sm:$0xf] (%p1513_p9), %v1173_v40 }
 0x1fe   : > { %v814_v31 = vpop.f32.mrf.mxu0 }
 0x200   : > { %v816_v32 = vpop.f32.mrf.mxu0 }
 0x201   : > { %v1181_v33 = vpack.c.bf16 %v816_v32, %v814_v31 }
 0x202   : > { %v818_v34 = vpop.f32.mrf.mxu0 }
 0x203   : > { %884 = vst [vmem:[%s1669_s9] sm:$0xff] %v1181_v33  ;;  %894 = sbr.rel (!%p1513_p9) target bundleno = 528 (0x210), region = 66 }
 0x204   : > { %v820_v35 = vpop.f32.mrf.mxu0 }
 0x205   : > { %v1183_v36 = vpack.c.bf16 %v820_v35, %v818_v34 }
 0x207   : > { %886 = vst [vmem:[%s1669_s9 + $0xc] sm:$0xff] %v1183_v36 }
 0x20a   : > { %v917_v37 = vld [vmem:[%s1669_s9] sm:$0xff] }
 0x20b   : > { %918 = vst [vmem:[%s902_s28] sm:$0xff] %v917_v37 }
 0x20e   : > { %v919_v38 = vld [vmem:[%s1669_s9 + $0xc] sm:$0xff] }
 0x20f   : > { %920 = vst [vmem:[%s902_s28 + $0x18] sm:$0xff] %v919_v38 }
 0x210 PF: > { %s13_s20 = sadd.s32 1, %s1424_s20   ;;  %s1770_s12 = smov %s1396_s13 }
 0x211   : > { %p10_p2 = scmp.ge.s32.totalorder %s13_s20, 6   ;;  %s1771_s13 = smov %s1518_s4 }
 0x212   : > { %s1772_s14 = smov %s1404_s15  ;;  %s1773_s15 = smov %s1507_s27 }
 0x213   : > { %s1774_s16 = smov %s1416_s18  ;;  %s1775_s17 = smov %s1420_s19 }
 0x214   : > { %s1776_s18 = smov %s1779_s22  ;;  %s1777_s19 = smov %s1783_s23 }
 0x215   :  { %12 = sbr.rel (!%p10_p2) target bundleno = 5 (0x5), region = 138 }

// kernel: llm_forward.12
= control target key start
LH: loop header
LB: loop body
LE: loop exit
PB: predicated region body
PF: predicated region fallthrough
CT: control target
= control target key end

     0   :  { %s3185_s0 = inlined_call_operand.vmem [shape: bf16[32,256], index: 0, kind: input, shape index: {}]   ;;  %s3186_s2 = inlined_call_operand.vmem [shape: bf16[256,512], index: 2, kind: input, shape index: {}]   ;;  %s3187_s3 = inlined_call_operand.vmem [shape: bf16[256,512], index: 3, kind: input, shape index: {}]   ;;  %s3188_s1 = inlined_call_operand.vmem [shape: f32[1,256], index: 1, kind: input, shape index: {}]   ;;  %s3189_s4 = inlined_call_operand.vmem [shape: bf16[512,256], index: 4, kind: input, shape index: {}]   ;;  %s3190_s5 = inlined_call_operand.vmem [shape: bf16[32,256], index: 5, kind: output, shape index: {}]  }
   0x1   :  { %v24_v0 = vld [vmem:[%s3185_s0] sm:$0xff]  ;;  %v25_v1 = vld [vmem:[%s3185_s0 + $0x8] sm:$0xff]  ;;  %v26_v2 = vld [vmem:[%s3185_s0 + $0x10] sm:$0xff] }
   0x2   :  { %v2461_v3 = vunpack.c.l.bf16 %v24_v0  ;;  %v2463_v4 = vunpack.c.h.bf16 %v24_v0  ;;  %v2465_v5 = vunpack.c.l.bf16 %v25_v1  ;;  %v2467_v6 = vunpack.c.h.bf16 %v25_v1  ;;  %v27_v7 = vld [vmem:[%s3185_s0 + $0x18] sm:$0xff]  ;;  %v2062_v12 = vld [vmem:[%s3186_s2 + $0xe4] ss:$16 sps:$4 sm:$0xff]   ;;  %v2066_v18 = vld [vmem:[%s3186_s2 + $0xe0] ss:$16 sps:$4 sm:$0xff]  }
   0x3   :  { %v2472_v8 = vunpack.c.l.bf16 %v26_v2  ;;  %v2474_v9 = vunpack.c.h.bf16 %v26_v2  ;;  %v2476_v10 = vunpack.c.l.bf16 %v27_v7  ;;  %v2478_v11 = vunpack.c.h.bf16 %v27_v7  ;;  %v2064_v17 = vld [vmem:[%s3186_s2 + $0xec] ss:$16 sps:$4 sm:$0xff]   ;;  %v2067_v19 = vld [vmem:[%s3186_s2 + $0xe8] ss:$16 sps:$4 sm:$0xff]   ;;  %541 = vmatprep.subr.bf16.mxu0 %v2062_v12  ;;  %v2068_v24 = vld [vmem:[%s3186_s2 + $0xc4] ss:$16 sps:$4 sm:$0xff]  }
   0x4   :  { %v44_v13 = vmul.f32 %v2461_v3, %v2461_v3  ;;  %v45_v14 = vmul.f32 %v2463_v4, %v2463_v4  ;;  %v46_v15 = vmul.f32 %v2465_v5, %v2465_v5  ;;  %v47_v16 = vmul.f32 %v2467_v6, %v2467_v6  ;;  %594 = vmatprep.subr.bf16.mxu1 %v2064_v17  ;;  %v2070_v26 = vld [vmem:[%s3186_s2 + $0xcc] ss:$16 sps:$4 sm:$0xff]   ;;  %v2072_v28 = vld [vmem:[%s3186_s2 + $0xc0] ss:$16 sps:$4 sm:$0xff]   ;;  %v2073_v29 = vld [vmem:[%s3186_s2 + $0xc8] ss:$16 sps:$4 sm:$0xff]  }
   0x5   :  { %v48_v20 = vmul.f32 %v2472_v8, %v2472_v8  ;;  %v49_v21 = vmul.f32 %v2474_v9, %v2474_v9  ;;  %v50_v22 = vmul.f32 %v2476_v10, %v2476_v10  ;;  %v51_v23 = vmul.f32 %v2478_v11, %v2478_v11  ;;  %542 = vmatpush1.bf16.msra.mxu0 %v2066_v18  ;;  %v2074_v31 = vld [vmem:[%s3186_s2 + $0xa4] ss:$16 sps:$4 sm:$0xff]   ;;  %v2076_v33 = vld [vmem:[%s3186_s2 + $0xac] ss:$16 sps:$4 sm:$0xff]   ;;  %v2078_v34 = vld [vmem:[%s3186_s2 + $0xa0] ss:$16 sps:$4 sm:$0xff]  }
   0x6   :  { %v52_v25 = vadd.f32 %v45_v14, %v44_v13  ;;  %595 = vmatpush1.bf16.msra.mxu1 %v2067_v19  ;;  %543 = vmatprep.subr.bf16.mxu0 %v2068_v24  ;;  %v55_v30 = vadd.f32 %v47_v16, %v46_v15  ;;  %v2079_v35 = vld [vmem:[%s3186_s2 + $0xa8] ss:$16 sps:$4 sm:$0xff]   ;;  %v2080_v36 = vld [vmem:[%s3186_s2 + $0x84] ss:$16 sps:$4 sm:$0xff]   ;;  %v2082_v37 = vld [vmem:[%s3186_s2 + $0x8c] ss:$16 sps:$4 sm:$0xff]  }
   0x7   :  { %v58_v27 = vadd.f32 %v49_v21, %v48_v20  ;;  %596 = vmatprep.subr.bf16.mxu1 %v2070_v26  ;;  %v61_v32 = vadd.f32 %v51_v23, %v50_v22  ;;  %v2084_v38 = vld [vmem:[%s3186_s2 + $0x80] ss:$16 sps:$4 sm:$0xff]   ;;  %v2085_v39 = vld [vmem:[%s3186_s2 + $0x88] ss:$16 sps:$4 sm:$0xff]   ;;  %v2086_v40 = vld [vmem:[%s3186_s2 + $0x64] ss:$16 sps:$4 sm:$0xff]  }
   0x8   :  { %53 = vadd.xlane.f32.xlu0 %v52_v25  ;;  %v2088_v41 = vld [vmem:[%s3186_s2 + $0x6c] ss:$16 sps:$4 sm:$0xff]   ;;  %v2090_v42 = vld [vmem:[%s3186_s2 + $0x60] ss:$16 sps:$4 sm:$0xff]   ;;  %v2091_v43 = vld [vmem:[%s3186_s2 + $0x68] ss:$16 sps:$4 sm:$0xff]  }
   0x9   :  { %59 = vadd.xlane.f32.xlu1 %v58_v27  ;;  %544 = vmatpush1.bf16.msra.mxu0 %v2072_v28  ;;  %v2092_v44 = vld [vmem:[%s3186_s2 + $0x44] ss:$16 sps:$4 sm:$0xff]   ;;  %v2094_v45 = vld [vmem:[%s3186_s2 + $0x4c] ss:$16 sps:$4 sm:$0xff]   ;;  %v2096_v46 = vld [vmem:[%s3186_s2 + $0x40] ss:$16 sps:$4 sm:$0xff]  }
   0xa   :  { %597 = vmatpush1.bf16.msra.mxu1 %v2073_v29  ;;  %545 = vmatprep.subr.bf16.mxu0 %v2074_v31  ;;  %v2097_v47 = vld [vmem:[%s3186_s2 + $0x48] ss:$16 sps:$4 sm:$0xff]   ;;  %v2098_v48 = vld [vmem:[%s3186_s2 + $0x24] ss:$16 sps:$4 sm:$0xff]   ;;  %v2100_v49 = vld [vmem:[%s3186_s2 + $0x2c] ss:$16 sps:$4 sm:$0xff]  }
   0xb   :  { %598 = vmatprep.subr.bf16.mxu1 %v2076_v33  ;;  %v2102_v50 = vld [vmem:[%s3186_s2 + $0x20] ss:$16 sps:$4 sm:$0xff]   ;;  %v2103_v51 = vld [vmem:[%s3186_s2 + $0x28] ss:$16 sps:$4 sm:$0xff]   ;;  %v2104_v52 = vld [vmem:[%s3186_s2 + $0x4] ss:$16 sps:$4 sm:$0xff]  }
   0xc   :  { %56 = vadd.xlane.f32.xlu0 %v55_v30  ;;  %v2106_v53 = vld [vmem:[%s3186_s2 + $0xc] ss:$16 sps:$4 sm:$0xff]   ;;  %v2108_v54 = vld [vmem:[%s3186_s2] ss:$16 sps:$4 sm:$0xff]   ;;  %v2109_v55 = vld [vmem:[%s3186_s2 + $0x8] ss:$16 sps:$4 sm:$0xff]  }
   0xd   :  { %62 = vadd.xlane.f32.xlu1 %v61_v32  ;;  %546 = vmatpush1.bf16.msra.mxu0 %v2078_v34  ;;  %v2110_v56 = vld [vmem:[%s3186_s2 + $0x1e4] ss:$16 sps:$4 sm:$0xff]   ;;  %v2112_v57 = vld [vmem:[%s3186_s2 + $0x1ec] ss:$16 sps:$4 sm:$0xff]   ;;  %v2114_v58 = vld [vmem:[%s3186_s2 + $0x1e0] ss:$16 sps:$4 sm:$0xff]  }
   0xe   :  { %599 = vmatpush1.bf16.msra.mxu1 %v2079_v35  ;;  %547 = vmatprep.subr.bf16.mxu0 %v2080_v36  ;;  %v2115_v59 = vld [vmem:[%s3186_s2 + $0x1e8] ss:$16 sps:$4 sm:$0xff]   ;;  %v2116_v60 = vld [vmem:[%s3186_s2 + $0x1c4] ss:$16 sps:$4 sm:$0xff]   ;;  %v2118_v61 = vld [vmem:[%s3186_s2 + $0x1cc] ss:$16 sps:$4 sm:$0xff]  }
   0xf   :  { %600 = vmatprep.subr.bf16.mxu1 %v2082_v37  ;;  %v2120_v62 = vld [vmem:[%s3186_s2 + $0x1c0] ss:$16 sps:$4 sm:$0xff]   ;;  %v2121_v63 = vld [vmem:[%s3186_s2 + $0x1c8] ss:$16 sps:$4 sm:$0xff]   ;;  %v2122_v0 = vld [vmem:[%s3186_s2 + $0x1a4] ss:$16 sps:$4 sm:$0xff]  }
  0x10   :  { %v2124_v1 = vld [vmem:[%s3186_s2 + $0x1ac] ss:$16 sps:$4 sm:$0xff]   ;;  %v2126_v2 = vld [vmem:[%s3186_s2 + $0x1a0] ss:$16 sps:$4 sm:$0xff]   ;;  %v2127_v7 = vld [vmem:[%s3186_s2 + $0x1a8] ss:$16 sps:$4 sm:$0xff]  }
  0x11   :  { %548 = vmatpush1.bf16.msra.mxu0 %v2084_v38  ;;  %v2128_v12 = vld [vmem:[%s3186_s2 + $0x184] ss:$16 sps:$4 sm:$0xff]   ;;  %v2130_v13 = vld [vmem:[%s3186_s2 + $0x18c] ss:$16 sps:$4 sm:$0xff]   ;;  %v2132_v14 = vld [vmem:[%s3186_s2 + $0x180] ss:$16 sps:$4 sm:$0xff]  }
  0x12   :  { %601 = vmatpush1.bf16.msra.mxu1 %v2085_v39  ;;  %549 = vmatprep.subr.bf16.mxu0 %v2086_v40  ;;  %v2133_v15 = vld [vmem:[%s3186_s2 + $0x188] ss:$16 sps:$4 sm:$0xff]   ;;  %v2134_v16 = vld [vmem:[%s3186_s2 + $0x164] ss:$16 sps:$4 sm:$0xff]   ;;  %v2136_v17 = vld [vmem:[%s3186_s2 + $0x16c] ss:$16 sps:$4 sm:$0xff]  }
  0x13   :  { %602 = vmatprep.subr.bf16.mxu1 %v2088_v41  ;;  %v2138_v18 = vld [vmem:[%s3186_s2 + $0x160] ss:$16 sps:$4 sm:$0xff]   ;;  %v2139_v19 = vld [vmem:[%s3186_s2 + $0x168] ss:$16 sps:$4 sm:$0xff]   ;;  %v2140_v20 = vld [vmem:[%s3186_s2 + $0x144] ss:$16 sps:$4 sm:$0xff]  }
  0x14   :  { %v2142_v21 = vld [vmem:[%s3186_s2 + $0x14c] ss:$16 sps:$4 sm:$0xff]   ;;  %v2144_v22 = vld [vmem:[%s3186_s2 + $0x140] ss:$16 sps:$4 sm:$0xff]   ;;  %v2145_v23 = vld [vmem:[%s3186_s2 + $0x148] ss:$16 sps:$4 sm:$0xff]  }
  0x15   :  { %550 = vmatpush1.bf16.msra.mxu0 %v2090_v42  ;;  %v2146_v24 = vld [vmem:[%s3186_s2 + $0x124] ss:$16 sps:$4 sm:$0xff]   ;;  %v2148_v25 = vld [vmem:[%s3186_s2 + $0x12c] ss:$16 sps:$4 sm:$0xff]   ;;  %v2150_v26 = vld [vmem:[%s3186_s2 + $0x120] ss:$16 sps:$4 sm:$0xff]  }
  0x16   :  { %603 = vmatpush1.bf16.msra.mxu1 %v2091_v43  ;;  %551 = vmatprep.subr.bf16.mxu0 %v2092_v44  ;;  %v2151_v27 = vld [vmem:[%s3186_s2 + $0x128] ss:$16 sps:$4 sm:$0xff]   ;;  %v2152_v28 = vld [vmem:[%s3186_s2 + $0x104] ss:$16 sps:$4 sm:$0xff]   ;;  %v2154_v29 = vld [vmem:[%s3186_s2 + $0x10c] ss:$16 sps:$4 sm:$0xff]  }
  0x17   :  { %604 = vmatprep.subr.bf16.mxu1 %v2094_v45  ;;  %v2156_v30 = vld [vmem:[%s3186_s2 + $0x100] ss:$16 sps:$4 sm:$0xff]   ;;  %v2157_v31 = vld [vmem:[%s3186_s2 + $0x108] ss:$16 sps:$4 sm:$0xff]   ;;  %v2160_v32 = vld [vmem:[%s3187_s3 + $0xe4] ss:$16 sps:$4 sm:$0xff]  }
  0x18   :  { %v2163_v33 = vld [vmem:[%s3187_s3 + $0xec] ss:$16 sps:$4 sm:$0xff]  }
  0x19   :  { %552 = vmatpush1.bf16.msra.mxu0 %v2096_v46  ;;  %v87_v46 = vlaneseq }
  0x1a   :  { %605 = vmatpush1.bf16.msra.mxu1 %v2097_v47  ;;  %553 = vmatprep.subr.bf16.mxu0 %v2098_v48 }
  0x1b   :  { %606 = vmatprep.subr.bf16.mxu1 %v2100_v49  ;;  %v88_v47 = vshrl.u32 %v87_v46, 7  ;;  %v85_v49 = vld [vmem:[%s3188_s1] sm:$0x3]  ;;  %v2197_v46 = vld [vmem:[%s3187_s3 + $0x28] ss:$16 sps:$4 sm:$0xff]  }
  0x1d   :  { %554 = vmatpush1.bf16.msra.mxu0 %v2102_v50  ;;  %v93_v48 = vsub.s32 1, %v88_v47  ;;  %v89_v50 = vsub.s32 0, %v88_v47  ;;  %v2202_v47 = vld [vmem:[%s3187_s3 + $0x4] ss:$16 sps:$4 sm:$0xff]  }
  0x1e   :  { %607 = vmatpush1.bf16.msra.mxu1 %v2103_v51  ;;  %555 = vmatprep.subr.bf16.mxu0 %v2104_v52 }
  0x1f   :  { %608 = vmatprep.subr.bf16.mxu1 %v2106_v53 }
  0x21   :  { %556 = vmatpush1.bf16.msra.mxu0 %v2108_v54  ;;  %v94_v54 = vrot.slane %v85_v49, %v93_v48  ;;  %v2205_v48 = vld [vmem:[%s3187_s3 + $0xc] ss:$16 sps:$4 sm:$0xff]  }
  0x22   :  { %609 = vmatpush1.bf16.msra.mxu1 %v2109_v55  ;;  %557 = vmatprep.subr.bf16.mxu0 %v2110_v56  ;;  %v90_v56 = vrot.slane %v85_v49, %v89_v50  ;;  %v2200_v49 = vld [vmem:[%s3187_s3] ss:$16 sps:$4 sm:$0xff]   ;;  %v2203_v50 = vld [vmem:[%s3187_s3 + $0x8] ss:$16 sps:$4 sm:$0xff]  }
  0x23   :  { %610 = vmatprep.subr.bf16.mxu1 %v2112_v57 }
  0x25   :  { %558 = vmatpush2.bf16.msra.mxu0 %v2114_v58 }
  0x26   :  { %611 = vmatpush2.bf16.msra.mxu1 %v2115_v59  ;;  %559 = vmatprep.subr.bf16.mxu0 %v2116_v60 }
  0x27   :  { %612 = vmatprep.subr.bf16.mxu1 %v2118_v61 }
  0x29   :  { %560 = vmatpush2.bf16.msra.mxu0 %v2120_v62 }
  0x2a   :  { %613 = vmatpush2.bf16.msra.mxu1 %v2121_v63  ;;  %561 = vmatprep.subr.bf16.mxu0 %v2122_v0 }
  0x2b   :  { %614 = vmatprep.subr.bf16.mxu1 %v2124_v1 }
  0x2d   :  { %562 = vmatpush2.bf16.msra.mxu0 %v2126_v2 }
  0x2e   :  { %615 = vmatpush2.bf16.msra.mxu1 %v2127_v7  ;;  %563 = vmatprep.subr.bf16.mxu0 %v2128_v12 }
  0x2f   :  { %616 = vmatprep.subr.bf16.mxu1 %v2130_v13 }
  0x31   :  { %564 = vmatpush2.bf16.msra.mxu0 %v2132_v14 }
  0x32   :  { %617 = vmatpush2.bf16.msra.mxu1 %v2133_v15  ;;  %565 = vmatprep.subr.bf16.mxu0 %v2134_v16  ;;  %v2158_v16 = vld [vmem:[%s3187_s3 + $0xe0] ss:$16 sps:$4 sm:$0xff]  }
  0x33   :  { %618 = vmatprep.subr.bf16.mxu1 %v2136_v17  ;;  %v2161_v17 = vld [vmem:[%s3187_s3 + $0xe8] ss:$16 sps:$4 sm:$0xff]  }
  0x35   :  { %566 = vmatpush2.bf16.msra.mxu0 %v2138_v18 }
  0x36   :  { %619 = vmatpush2.bf16.msra.mxu1 %v2139_v19  ;;  %567 = vmatprep.subr.bf16.mxu0 %v2140_v20  ;;  %v2166_v19 = vld [vmem:[%s3187_s3 + $0xc4] ss:$16 sps:$4 sm:$0xff]   ;;  %v2169_v20 = vld [vmem:[%s3187_s3 + $0xcc] ss:$16 sps:$4 sm:$0xff]  }
  0x37   :  { %620 = vmatprep.subr.bf16.mxu1 %v2142_v21 }
  0x39   :  { %568 = vmatpush2.bf16.msra.mxu0 %v2144_v22 }
  0x3a   :  { %621 = vmatpush2.bf16.msra.mxu1 %v2145_v23  ;;  %569 = vmatprep.subr.bf16.mxu0 %v2146_v24  ;;  %v2164_v24 = vld [vmem:[%s3187_s3 + $0xc0] ss:$16 sps:$4 sm:$0xff]  }
  0x3b   :  { %622 = vmatprep.subr.bf16.mxu1 %v2148_v25  ;;  %v2167_v25 = vld [vmem:[%s3187_s3 + $0xc8] ss:$16 sps:$4 sm:$0xff]  }
  0x3d   :  { %570 = vmatpush2.bf16.msra.mxu0 %v2150_v26  ;;  %v2172_v26 = vld [vmem:[%s3187_s3 + $0xa4] ss:$16 sps:$4 sm:$0xff]  }
  0x3e   :  { %623 = vmatpush2.bf16.msra.mxu1 %v2151_v27  ;;  %571 = vmatprep.subr.bf16.mxu0 %v2152_v28  ;;  %v2175_v27 = vld [vmem:[%s3187_s3 + $0xac] ss:$16 sps:$4 sm:$0xff]  }
  0x3f   :  { %624 = vmatprep.subr.bf16.mxu1 %v2154_v29  ;;  %v2170_v29 = vld [vmem:[%s3187_s3 + $0xa0] ss:$16 sps:$4 sm:$0xff]  }
  0x41   :  { %572 = vmatpush2.bf16.msra.mxu0 %v2156_v30  ;;  %v2173_v30 = vld [vmem:[%s3187_s3 + $0xa8] ss:$16 sps:$4 sm:$0xff]  }
  0x42   :  { %625 = vmatpush2.bf16.msra.mxu1 %v2157_v31  ;;  %1031 = vmatprep.subr.bf16.mxu0 %v2160_v32  ;;  %v2178_v31 = vld [vmem:[%s3187_s3 + $0x84] ss:$16 sps:$4 sm:$0xff]   ;;  %v2181_v32 = vld [vmem:[%s3187_s3 + $0x8c] ss:$16 sps:$4 sm:$0xff]  }
  0x43   :  { %1084 = vmatprep.subr.bf16.mxu1 %v2163_v33  ;;  %v2176_v33 = vld [vmem:[%s3187_s3 + $0x80] ss:$16 sps:$4 sm:$0xff]  }
  0x91   :  { %v54_v34 = vpop.xlane.xlu0 %53 }
  0x92   :  { %v65_v35 = vmul.f32 0.00390625, %v54_v34  ;;  %v60_v36 = vpop.xlane.xlu1 %59  ;;  %v2179_v34 = vld [vmem:[%s3187_s3 + $0x88] ss:$16 sps:$4 sm:$0xff]  }
  0x93   :  { %v67_v37 = vmul.f32 0.00390625, %v60_v36  ;;  %v2187_v36 = vld [vmem:[%s3187_s3 + $0x6c] ss:$16 sps:$4 sm:$0xff]  }
  0x94   :  { %v69_v38 = vadd.f32 1e-06, %v65_v35  ;;  %v2184_v35 = vld [vmem:[%s3187_s3 + $0x64] ss:$16 sps:$4 sm:$0xff]  }
  0x95   :  { %v57_v39 = vpop.xlane.xlu0 %56  ;;  %v71_v40 = vadd.f32 1e-06, %v67_v37  ;;  %v2182_v37 = vld [vmem:[%s3187_s3 + $0x60] ss:$16 sps:$4 sm:$0xff]  }
  0x96   :  { %2350 = vrsqrt.f32 %v69_v38  ;;  %v66_v41 = vmul.f32 0.00390625, %v57_v39  ;;  %v63_v42 = vpop.xlane.xlu1 %62  ;;  %v2185_v38 = vld [vmem:[%s3187_s3 + $0x68] ss:$16 sps:$4 sm:$0xff]   ;;  %v2190_v39 = vld [vmem:[%s3187_s3 + $0x44] ss:$16 sps:$4 sm:$0xff]  }
  0x97   :  { %2352 = vrsqrt.f32 %v71_v40  ;;  %v68_v43 = vmul.f32 0.00390625, %v63_v42  ;;  %v2193_v40 = vld [vmem:[%s3187_s3 + $0x4c] ss:$16 sps:$4 sm:$0xff]   ;;  %v2191_v42 = vld [vmem:[%s3187_s3 + $0x48] ss:$16 sps:$4 sm:$0xff]  }
  0x98   :  { %v70_v44 = vadd.f32 1e-06, %v66_v41  ;;  %v2188_v41 = vld [vmem:[%s3187_s3 + $0x40] ss:$16 sps:$4 sm:$0xff]  }
  0x99   :  { %v72_v45 = vadd.f32 1e-06, %v68_v43  ;;  %v2196_v43 = vld [vmem:[%s3187_s3 + $0x24] ss:$16 sps:$4 sm:$0xff]  }
  0x9a   :  { %2354 = vrsqrt.f32 %v70_v44  ;;  %v2199_v44 = vld [vmem:[%s3187_s3 + $0x2c] ss:$16 sps:$4 sm:$0xff]  }
  0x9b   :  { %2356 = vrsqrt.f32 %v72_v45  ;;  %v2194_v45 = vld [vmem:[%s3187_s3 + $0x20] ss:$16 sps:$4 sm:$0xff]  }
  0xa3   :  { %v2351_v51 = vpop.eup %2350 }
  0xa4   :  { %v2353_v52 = vpop.eup %2352  ;;  %v78_v53 = vmul.f32 %v2351_v51, %v2463_v4  ;;  %v77_v55 = vmul.f32 %v2351_v51, %v2461_v3  ;;  %v2208_v51 = vld [vmem:[%s3187_s3 + $0x1e4] ss:$16 sps:$4 sm:$0xff]  }
  0xa5   :  { %v82_v57 = vmul.f32 %v2353_v52, %v2474_v9  ;;  %v81_v13 = vmul.f32 %v2353_v52, %v2472_v8  ;;  %v2211_v52 = vld [vmem:[%s3187_s3 + $0x1ec] ss:$16 sps:$4 sm:$0xff]  }
  0xa6   :  { %v98_v62 = vmul.f32 %v94_v54, %v78_v53  ;;  %v97_v1 = vmul.f32 %v90_v56, %v77_v55  ;;  %v2206_v53 = vld [vmem:[%s3187_s3 + $0x1e0] ss:$16 sps:$4 sm:$0xff]   ;;  %v2214_v55 = vld [vmem:[%s3187_s3 + $0x1c4] ss:$16 sps:$4 sm:$0xff]  }
  0xa7   :  { %v2355_v58 = vpop.eup %2354  ;;  %v102_v7 = vmul.f32 %v94_v54, %v82_v57  ;;  %v101_v22 = vmul.f32 %v90_v56, %v81_v13  ;;  %v2212_v57 = vld [vmem:[%s3187_s3 + $0x1c0] ss:$16 sps:$4 sm:$0xff]  }
  0xa8   :  { %v2357_v59 = vpop.eup %2356  ;;  %v80_v60 = vmul.f32 %v2355_v58, %v2467_v6  ;;  %v79_v61 = vmul.f32 %v2355_v58, %v2465_v5  ;;  %v2215_v58 = vld [vmem:[%s3187_s3 + $0x1c8] ss:$16 sps:$4 sm:$0xff]   ;;  %v2230_v13 = vld [vmem:[%s3187_s3 + $0x160] ss:$16 sps:$4 sm:$0xff]  }
  0xa9   :  { %v84_v63 = vmul.f32 %v2357_v59, %v2478_v11  ;;  %v83_v14 = vmul.f32 %v2357_v59, %v2476_v10  ;;  %v2220_v59 = vld [vmem:[%s3187_s3 + $0x1a4] ss:$16 sps:$4 sm:$0xff]  }
  0xaa   :  { %v100_v0 = vmul.f32 %v94_v54, %v80_v60  ;;  %v99_v2 = vmul.f32 %v90_v56, %v79_v61  ;;  %v2223_v60 = vld [vmem:[%s3187_s3 + $0x1ac] ss:$16 sps:$4 sm:$0xff]   ;;  %v2218_v61 = vld [vmem:[%s3187_s3 + $0x1a0] ss:$16 sps:$4 sm:$0xff]  }
  0xab   :  { %v104_v12 = vmul.f32 %v94_v54, %v84_v63  ;;  %v103_v23 = vmul.f32 %v90_v56, %v83_v14  ;;  %v2209_v54 = vld [vmem:[%s3187_s3 + $0x1e8] ss:$16 sps:$4 sm:$0xff]   ;;  %v2217_v56 = vld [vmem:[%s3187_s3 + $0x1cc] ss:$16 sps:$4 sm:$0xff]   ;;  %v2226_v63 = vld [vmem:[%s3187_s3 + $0x184] ss:$16 sps:$4 sm:$0xff]  }
  0xac   :  { %v2059_v15 = vpack.c.bf16 %v100_v0, %v98_v62  ;;  %v2711_v18 = vpack.c.bf16 %v99_v2, %v97_v1  ;;  %v2221_v62 = vld [vmem:[%s3187_s3 + $0x1a8] ss:$16 sps:$4 sm:$0xff]   ;;  %v2229_v0 = vld [vmem:[%s3187_s3 + $0x18c] ss:$16 sps:$4 sm:$0xff]   ;;  %v2224_v1 = vld [vmem:[%s3187_s3 + $0x180] ss:$16 sps:$4 sm:$0xff]  }
  0xad   :  { %v2719_v21 = vpack.c.bf16 %v104_v12, %v102_v7  ;;  %v2737_v28 = vpack.c.bf16 %v103_v23, %v101_v22  ;;  %v2227_v2 = vld [vmem:[%s3187_s3 + $0x188] ss:$16 sps:$4 sm:$0xff]   ;;  %v2232_v7 = vld [vmem:[%s3187_s3 + $0x164] ss:$16 sps:$4 sm:$0xff]   ;;  %v2235_v12 = vld [vmem:[%s3187_s3 + $0x16c] ss:$16 sps:$4 sm:$0xff]  }
  0xae   :  { %573 = vmatprep.mubr.bf16.mxu0 %v2059_v15  ;;  %626 = vmatprep.mubr.bf16.mxu1 %v2059_v15  ;;  %v2233_v14 = vld [vmem:[%s3187_s3 + $0x168] ss:$16 sps:$4 sm:$0xff]   ;;  %v2247_v22 = vld [vmem:[%s3187_s3 + $0x12c] ss:$16 sps:$4 sm:$0xff]   ;;  %v2242_v23 = vld [vmem:[%s3187_s3 + $0x120] ss:$16 sps:$4 sm:$0xff]  }
  0xaf   :  { %574 = vmatmul.mubr.bf16.vlgmr.msra.gmra.mxu0 %v2711_v18  ;;  %627 = vmatmul.mubr.bf16.vlgmr.msra.gmra.mxu1 %v2711_v18 }
  0xb0   :  { %1032 = vmatpush1.bf16.msra.mxu0 %v2158_v16  ;;  %1085 = vmatpush1.bf16.msra.mxu1 %v2161_v17  ;;  %v2241_v16 = vld [vmem:[%s3187_s3 + $0x14c] ss:$16 sps:$4 sm:$0xff]   ;;  %v2236_v17 = vld [vmem:[%s3187_s3 + $0x140] ss:$16 sps:$4 sm:$0xff]  }
  0xb1   :  { %1033 = vmatprep.subr.bf16.mxu0 %v2166_v19  ;;  %1086 = vmatprep.subr.bf16.mxu1 %v2169_v20  ;;  %v2239_v19 = vld [vmem:[%s3187_s3 + $0x148] ss:$16 sps:$4 sm:$0xff]   ;;  %v2244_v20 = vld [vmem:[%s3187_s3 + $0x124] ss:$16 sps:$4 sm:$0xff]  }
  0xb2   :  { %583 = vmatprep.mubr.bf16.mxu0 %v2719_v21  ;;  %636 = vmatprep.mubr.bf16.mxu1 %v2719_v21 }
  0xb4   :  { %1034 = vmatpush1.bf16.msra.mxu0 %v2164_v24  ;;  %1087 = vmatpush1.bf16.msra.mxu1 %v2167_v25  ;;  %v2245_v24 = vld [vmem:[%s3187_s3 + $0x128] ss:$16 sps:$4 sm:$0xff]   ;;  %v2250_v25 = vld [vmem:[%s3187_s3 + $0x104] ss:$16 sps:$4 sm:$0xff]  }
  0xb5   :  { %1035 = vmatprep.subr.bf16.mxu0 %v2172_v26  ;;  %1088 = vmatprep.subr.bf16.mxu1 %v2175_v27  ;;  %v2253_v26 = vld [vmem:[%s3187_s3 + $0x10c] ss:$16 sps:$4 sm:$0xff]   ;;  %v2248_v27 = vld [vmem:[%s3187_s3 + $0x100] ss:$16 sps:$4 sm:$0xff]  }
  0xb7   :  { %584 = vmatmul.mubr.bf16.gmra.mxu0 %v2737_v28  ;;  %637 = vmatmul.mubr.bf16.gmra.mxu1 %v2737_v28 }
  0xb8   :  { %1036 = vmatpush1.bf16.msra.mxu0 %v2170_v29  ;;  %1089 = vmatpush1.bf16.msra.mxu1 %v2173_v30  ;;  %v2251_v29 = vld [vmem:[%s3187_s3 + $0x108] ss:$16 sps:$4 sm:$0xff]   ;;  %v2256_v30 = vld [vmem:[%s3189_s4 + $0x74] ss:$8 sps:$4 sm:$0xff]  }
  0xb9   :  { %1063 = vmatprep.mubr.bf16.mxu0 %v2059_v15  ;;  %1116 = vmatprep.mubr.bf16.mxu1 %v2059_v15  ;;  %v2238_v15 = vld [vmem:[%s3187_s3 + $0x144] ss:$16 sps:$4 sm:$0xff]  }
  0xba   :  { %1037 = vmatprep.subr.bf16.mxu0 %v2178_v31  ;;  %1090 = vmatprep.subr.bf16.mxu1 %v2181_v32  ;;  %v2254_v31 = vld [vmem:[%s3189_s4 + $0x70] ss:$8 sps:$4 sm:$0xff]   ;;  %v2265_v32 = vld [vmem:[%s3189_s4 + $0x164] ss:$8 sps:$4 sm:$0xff]  }
  0xbc   :  { %1038 = vmatpush1.bf16.msra.mxu0 %v2176_v33  ;;  %1091 = vmatpush1.bf16.msra.mxu1 %v2179_v34  ;;  %v2260_v33 = vld [vmem:[%s3189_s4 + $0x60] ss:$8 sps:$4 sm:$0xff]  }
  0xbd   :  { %1039 = vmatprep.subr.bf16.mxu0 %v2184_v35  ;;  %1092 = vmatprep.subr.bf16.mxu1 %v2187_v36  ;;  %v2263_v34 = vld [vmem:[%s3189_s4 + $0x160] ss:$8 sps:$4 sm:$0xff]   ;;  %v2268_v35 = vld [vmem:[%s3189_s4 + $0x54] ss:$8 sps:$4 sm:$0xff]  }
  0xbe   :  { %v2271_v36 = vld [vmem:[%s3189_s4 + $0x154] ss:$8 sps:$4 sm:$0xff]  }
  0xc0   :  { %1040 = vmatpush1.bf16.msra.mxu0 %v2182_v37  ;;  %1093 = vmatpush1.bf16.msra.mxu1 %v2185_v38  ;;  %v2266_v37 = vld [vmem:[%s3189_s4 + $0x50] ss:$8 sps:$4 sm:$0xff]  }
  0xc1   :  { %1041 = vmatprep.subr.bf16.mxu0 %v2190_v39  ;;  %1094 = vmatprep.subr.bf16.mxu1 %v2193_v40  ;;  %v2269_v38 = vld [vmem:[%s3189_s4 + $0x150] ss:$8 sps:$4 sm:$0xff]   ;;  %v2274_v39 = vld [vmem:[%s3189_s4 + $0x44] ss:$8 sps:$4 sm:$0xff]  }
  0xc2   :  { %v2277_v40 = vld [vmem:[%s3189_s4 + $0x144] ss:$8 sps:$4 sm:$0xff]  }
  0xc4   :  { %1042 = vmatpush1.bf16.msra.mxu0 %v2188_v41  ;;  %1095 = vmatpush1.bf16.msra.mxu1 %v2191_v42  ;;  %v2272_v41 = vld [vmem:[%s3189_s4 + $0x40] ss:$8 sps:$4 sm:$0xff]  }
  0xc5   :  { %1043 = vmatprep.subr.bf16.mxu0 %v2196_v43  ;;  %1096 = vmatprep.subr.bf16.mxu1 %v2199_v44  ;;  %v2275_v42 = vld [vmem:[%s3189_s4 + $0x140] ss:$8 sps:$4 sm:$0xff]   ;;  %v2280_v43 = vld [vmem:[%s3189_s4 + $0x34] ss:$8 sps:$4 sm:$0xff]  }
  0xc6   :  { %v2283_v44 = vld [vmem:[%s3189_s4 + $0x134] ss:$8 sps:$4 sm:$0xff]  }
  0xc8   :  { %1044 = vmatpush1.bf16.msra.mxu0 %v2194_v45  ;;  %1097 = vmatpush1.bf16.msra.mxu1 %v2197_v46  ;;  %v2278_v45 = vld [vmem:[%s3189_s4 + $0x30] ss:$8 sps:$4 sm:$0xff]  }
  0xc9   :  { %1045 = vmatprep.subr.bf16.mxu0 %v2202_v47  ;;  %1098 = vmatprep.subr.bf16.mxu1 %v2205_v48  ;;  %v2281_v46 = vld [vmem:[%s3189_s4 + $0x130] ss:$8 sps:$4 sm:$0xff]   ;;  %v2286_v47 = vld [vmem:[%s3189_s4 + $0x24] ss:$8 sps:$4 sm:$0xff]  }
  0xca   :  { %v2289_v48 = vld [vmem:[%s3189_s4 + $0x124] ss:$8 sps:$4 sm:$0xff]  }
  0xcc   :  { %1046 = vmatpush1.bf16.msra.mxu0 %v2200_v49  ;;  %1099 = vmatpush1.bf16.msra.mxu1 %v2203_v50  ;;  %v2284_v49 = vld [vmem:[%s3189_s4 + $0x20] ss:$8 sps:$4 sm:$0xff]  }
  0xcd   :  { %1047 = vmatprep.subr.bf16.mxu0 %v2208_v51  ;;  %1100 = vmatprep.subr.bf16.mxu1 %v2211_v52  ;;  %v2287_v50 = vld [vmem:[%s3189_s4 + $0x120] ss:$8 sps:$4 sm:$0xff]   ;;  %v2292_v51 = vld [vmem:[%s3189_s4 + $0x14] ss:$8 sps:$4 sm:$0xff]  }
  0xce   :  { %v2295_v52 = vld [vmem:[%s3189_s4 + $0x114] ss:$8 sps:$4 sm:$0xff]  }
  0xd0   :  { %1048 = vmatpush2.bf16.msra.mxu0 %v2206_v53  ;;  %1101 = vmatpush2.bf16.msra.mxu1 %v2209_v54  ;;  %v2290_v53 = vld [vmem:[%s3189_s4 + $0x10] ss:$8 sps:$4 sm:$0xff]  }
  0xd1   :  { %1049 = vmatprep.subr.bf16.mxu0 %v2214_v55  ;;  %1102 = vmatprep.subr.bf16.mxu1 %v2217_v56  ;;  %v2293_v54 = vld [vmem:[%s3189_s4 + $0x110] ss:$8 sps:$4 sm:$0xff]   ;;  %v2298_v55 = vld [vmem:[%s3189_s4 + $0x4] ss:$8 sps:$4 sm:$0xff]  }
  0xd2   :  { %v2301_v56 = vld [vmem:[%s3189_s4 + $0x104] ss:$8 sps:$4 sm:$0xff]  }
  0xd4   :  { %1050 = vmatpush2.bf16.msra.mxu0 %v2212_v57  ;;  %1103 = vmatpush2.bf16.msra.mxu1 %v2215_v58  ;;  %v2296_v57 = vld [vmem:[%s3189_s4] ss:$8 sps:$4 sm:$0xff]  }
  0xd5   :  { %1051 = vmatprep.subr.bf16.mxu0 %v2220_v59  ;;  %1104 = vmatprep.subr.bf16.mxu1 %v2223_v60  ;;  %v2299_v58 = vld [vmem:[%s3189_s4 + $0x100] ss:$8 sps:$4 sm:$0xff]   ;;  %v2304_v59 = vld [vmem:[%s3189_s4 + $0xf4] ss:$8 sps:$4 sm:$0xff]  }
  0xd6   :  { %v2307_v60 = vld [vmem:[%s3189_s4 + $0x1f4] ss:$8 sps:$4 sm:$0xff]  }
  0xd8   :  { %1052 = vmatpush2.bf16.msra.mxu0 %v2218_v61  ;;  %1105 = vmatpush2.bf16.msra.mxu1 %v2221_v62  ;;  %v2302_v61 = vld [vmem:[%s3189_s4 + $0xf0] ss:$8 sps:$4 sm:$0xff]  }
  0xd9   :  { %1053 = vmatprep.subr.bf16.mxu0 %v2226_v63  ;;  %1106 = vmatprep.subr.bf16.mxu1 %v2229_v0  ;;  %v2305_v62 = vld [vmem:[%s3189_s4 + $0x1f0] ss:$8 sps:$4 sm:$0xff]   ;;  %v2310_v63 = vld [vmem:[%s3189_s4 + $0xe4] ss:$8 sps:$4 sm:$0xff]  }
  0xda   :  { %v2313_v0 = vld [vmem:[%s3189_s4 + $0x1e4] ss:$8 sps:$4 sm:$0xff]  }
  0xdc   :  { %1054 = vmatpush2.bf16.msra.mxu0 %v2224_v1  ;;  %1107 = vmatpush2.bf16.msra.mxu1 %v2227_v2  ;;  %v2308_v1 = vld [vmem:[%s3189_s4 + $0xe0] ss:$8 sps:$4 sm:$0xff]  }
  0xdd   :  { %1055 = vmatprep.subr.bf16.mxu0 %v2232_v7  ;;  %1108 = vmatprep.subr.bf16.mxu1 %v2235_v12  ;;  %v2311_v2 = vld [vmem:[%s3189_s4 + $0x1e0] ss:$8 sps:$4 sm:$0xff]   ;;  %v2316_v7 = vld [vmem:[%s3189_s4 + $0xd4] ss:$8 sps:$4 sm:$0xff]   ;;  %v2314_v12 = vld [vmem:[%s3189_s4 + $0xd0] ss:$8 sps:$4 sm:$0xff]  }
  0xe0   :  { %1056 = vmatpush2.bf16.msra.mxu0 %v2230_v13  ;;  %1109 = vmatpush2.bf16.msra.mxu1 %v2233_v14  ;;  %v2319_v13 = vld [vmem:[%s3189_s4 + $0x1d4] ss:$8 sps:$4 sm:$0xff]   ;;  %v2322_v14 = vld [vmem:[%s3189_s4 + $0xc4] ss:$8 sps:$4 sm:$0xff]  }
  0xe1   :  { %1057 = vmatprep.subr.bf16.mxu0 %v2238_v15  ;;  %1110 = vmatprep.subr.bf16.mxu1 %v2241_v16  ;;  %v2317_v15 = vld [vmem:[%s3189_s4 + $0x1d0] ss:$8 sps:$4 sm:$0xff]   ;;  %v2325_v16 = vld [vmem:[%s3189_s4 + $0x1c4] ss:$8 sps:$4 sm:$0xff]  }
  0xe4   :  { %1058 = vmatpush2.bf16.msra.mxu0 %v2236_v17  ;;  %1111 = vmatpush2.bf16.msra.mxu1 %v2239_v19  ;;  %v2320_v17 = vld [vmem:[%s3189_s4 + $0xc0] ss:$8 sps:$4 sm:$0xff]   ;;  %v2328_v19 = vld [vmem:[%s3189_s4 + $0xb4] ss:$8 sps:$4 sm:$0xff]  }
  0xe5   :  { %1059 = vmatprep.subr.bf16.mxu0 %v2244_v20  ;;  %1112 = vmatprep.subr.bf16.mxu1 %v2247_v22  ;;  %v2323_v20 = vld [vmem:[%s3189_s4 + $0x1c0] ss:$8 sps:$4 sm:$0xff]   ;;  %v2331_v22 = vld [vmem:[%s3189_s4 + $0x1b4] ss:$8 sps:$4 sm:$0xff]  }
  0xe8   :  { %1060 = vmatpush2.bf16.msra.mxu0 %v2242_v23  ;;  %1113 = vmatpush2.bf16.msra.mxu1 %v2245_v24  ;;  %v2326_v23 = vld [vmem:[%s3189_s4 + $0xb0] ss:$8 sps:$4 sm:$0xff]  }
  0xe9   :  { %1061 = vmatprep.subr.bf16.mxu0 %v2250_v25  ;;  %1114 = vmatprep.subr.bf16.mxu1 %v2253_v26  ;;  %v2329_v24 = vld [vmem:[%s3189_s4 + $0x1b0] ss:$8 sps:$4 sm:$0xff]   ;;  %v2334_v25 = vld [vmem:[%s3189_s4 + $0xa4] ss:$8 sps:$4 sm:$0xff]  }
  0xea   :  { %v2337_v26 = vld [vmem:[%s3189_s4 + $0x1a4] ss:$8 sps:$4 sm:$0xff]  }
  0xec   :  { %1062 = vmatpush2.bf16.msra.mxu0 %v2248_v27  ;;  %1115 = vmatpush2.bf16.msra.mxu1 %v2251_v29  ;;  %v2332_v27 = vld [vmem:[%s3189_s4 + $0xa0] ss:$8 sps:$4 sm:$0xff]  }
  0xed   :  { %1665 = vmatprep.subr.bf16.mxu0 %v2256_v30  ;;  %v2335_v29 = vld [vmem:[%s3189_s4 + $0x1a0] ss:$8 sps:$4 sm:$0xff]   ;;  %v2340_v30 = vld [vmem:[%s3189_s4 + $0x94] ss:$8 sps:$4 sm:$0xff]  }
  0xef   :  { %1064 = vmatmul.mubr.bf16.vlgmr.msra.gmra.mxu0 %v2711_v18  ;;  %1117 = vmatmul.mubr.bf16.vlgmr.msra.gmra.mxu1 %v2711_v18  ;;  %v2257_v18 = vld [vmem:[%s3189_s4 + $0x170] ss:$8 sps:$4 sm:$0xff]  }
  0xf0   :  { %1073 = vmatprep.mubr.bf16.mxu0 %v2719_v21  ;;  %1126 = vmatprep.mubr.bf16.mxu1 %v2719_v21  ;;  %v2259_v21 = vld [vmem:[%s3189_s4 + $0x174] ss:$8 sps:$4 sm:$0xff]  }
  0xf1   :  { %1666 = vmatpush1.bf16.msra.mxu0 %v2254_v31  ;;  %1718 = vmatprep.subr.bf16.mxu1 %v2259_v21  ;;  %v2343_v31 = vld [vmem:[%s3189_s4 + $0x194] ss:$8 sps:$4 sm:$0xff]   ;;  %v2341_v21 = vld [vmem:[%s3189_s4 + $0x190] ss:$8 sps:$4 sm:$0xff]  }
  0xf2   :  { %1719 = vmatpush1.bf16.msra.mxu1 %v2257_v18  ;;  %v2338_v18 = vld [vmem:[%s3189_s4 + $0x90] ss:$8 sps:$4 sm:$0xff]  }
  0xf3   :  { %1720 = vmatprep.subr.bf16.mxu1 %v2265_v32  ;;  %v2349_v32 = vld [vmem:[%s3189_s4 + $0x184] ss:$8 sps:$4 sm:$0xff]  }
  0xf6   :  { %1721 = vmatpush1.bf16.msra.mxu1 %v2263_v34  ;;  %v2347_v34 = vld [vmem:[%s3189_s4 + $0x180] ss:$8 sps:$4 sm:$0xff]  }
  0xf7   :  { %1074 = vmatmul.mubr.bf16.gmra.mxu0 %v2737_v28  ;;  %1127 = vmatmul.mubr.bf16.gmra.mxu1 %v2737_v28  ;;  %v2262_v28 = vld [vmem:[%s3189_s4 + $0x64] ss:$8 sps:$4 sm:$0xff]  }
  0xf8   :  { %1667 = vmatprep.subr.bf16.mxu0 %v2262_v28  ;;  %1722 = vmatprep.subr.bf16.mxu1 %v2271_v36  ;;  %v2346_v28 = vld [vmem:[%s3189_s4 + $0x84] ss:$8 sps:$4 sm:$0xff]  }
  0xf9   :  { %1668 = vmatpush1.bf16.msra.mxu0 %v2260_v33  ;;  %v2344_v33 = vld [vmem:[%s3189_s4 + $0x80] ss:$8 sps:$4 sm:$0xff]  }
  0xfa   :  { %1669 = vmatprep.subr.bf16.mxu0 %v2268_v35  ;;  %1723 = vmatpush1.bf16.msra.mxu1 %v2269_v38 }
  0xfb   :  { %1724 = vmatprep.subr.bf16.mxu1 %v2277_v40 }
  0xfd   :  { %1670 = vmatpush1.bf16.msra.mxu0 %v2266_v37 }
  0xfe   :  { %1671 = vmatprep.subr.bf16.mxu0 %v2274_v39  ;;  %1725 = vmatpush1.bf16.msra.mxu1 %v2275_v42 }
  0xff   :  { %1726 = vmatprep.subr.bf16.mxu1 %v2283_v44 }
 0x101   :  { %1672 = vmatpush1.bf16.msra.mxu0 %v2272_v41 }
 0x102   :  { %1673 = vmatprep.subr.bf16.mxu0 %v2280_v43  ;;  %1727 = vmatpush1.bf16.msra.mxu1 %v2281_v46 }
 0x103   :  { %1728 = vmatprep.subr.bf16.mxu1 %v2289_v48 }
 0x105   :  { %1674 = vmatpush1.bf16.msra.mxu0 %v2278_v45 }
 0x106   :  { %1675 = vmatprep.subr.bf16.mxu0 %v2286_v47  ;;  %1729 = vmatpush1.bf16.msra.mxu1 %v2287_v50 }
 0x107   :  { %1730 = vmatprep.subr.bf16.mxu1 %v2295_v52 }
 0x109   :  { %1676 = vmatpush1.bf16.msra.mxu0 %v2284_v49 }
 0x10a   :  { %1677 = vmatprep.subr.bf16.mxu0 %v2292_v51  ;;  %1731 = vmatpush1.bf16.msra.mxu1 %v2293_v54 }
 0x10b   :  { %1732 = vmatprep.subr.bf16.mxu1 %v2301_v56 }
 0x10d   :  { %1678 = vmatpush1.bf16.msra.mxu0 %v2290_v53 }
 0x10e   :  { %1679 = vmatprep.subr.bf16.mxu0 %v2298_v55  ;;  %1733 = vmatpush1.bf16.msra.mxu1 %v2299_v58 }
 0x10f   :  { %1734 = vmatprep.subr.bf16.mxu1 %v2307_v60 }
 0x111   :  { %1680 = vmatpush1.bf16.msra.mxu0 %v2296_v57 }
 0x112   :  { %1681 = vmatprep.subr.bf16.mxu0 %v2304_v59  ;;  %1735 = vmatpush2.bf16.msra.mxu1 %v2305_v62 }
 0x113   :  { %1736 = vmatprep.subr.bf16.mxu1 %v2313_v0 }
 0x115   :  { %1682 = vmatpush2.bf16.msra.mxu0 %v2302_v61 }
 0x116   :  { %1683 = vmatprep.subr.bf16.mxu0 %v2310_v63  ;;  %1737 = vmatpush2.bf16.msra.mxu1 %v2311_v2 }
 0x117   :  { %1738 = vmatprep.subr.bf16.mxu1 %v2319_v13 }
 0x119   :  { %1684 = vmatpush2.bf16.msra.mxu0 %v2308_v1 }
 0x11a   :  { %1685 = vmatprep.subr.bf16.mxu0 %v2316_v7  ;;  %1739 = vmatpush2.bf16.msra.mxu1 %v2317_v15 }
 0x11b   :  { %1740 = vmatprep.subr.bf16.mxu1 %v2325_v16 }
 0x11d   :  { %1686 = vmatpush2.bf16.msra.mxu0 %v2314_v12 }
 0x11e   :  { %1687 = vmatprep.subr.bf16.mxu0 %v2322_v14  ;;  %1741 = vmatpush2.bf16.msra.mxu1 %v2323_v20 }
 0x11f   :  { %1742 = vmatprep.subr.bf16.mxu1 %v2331_v22 }
 0x121   :  { %1688 = vmatpush2.bf16.msra.mxu0 %v2320_v17 }
 0x122   :  { %1689 = vmatprep.subr.bf16.mxu0 %v2328_v19  ;;  %1743 = vmatpush2.bf16.msra.mxu1 %v2329_v24 }
 0x123   :  { %1744 = vmatprep.subr.bf16.mxu1 %v2337_v26 }
 0x125   :  { %1690 = vmatpush2.bf16.msra.mxu0 %v2326_v23 }
 0x126   :  { %1691 = vmatprep.subr.bf16.mxu0 %v2334_v25  ;;  %1745 = vmatpush2.bf16.msra.mxu1 %v2335_v29 }
 0x127   :  { %1746 = vmatprep.subr.bf16.mxu1 %v2343_v31 }
 0x129   :  { %1692 = vmatpush2.bf16.msra.mxu0 %v2332_v27 }
 0x12a   :  { %1693 = vmatprep.subr.bf16.mxu0 %v2340_v30  ;;  %1747 = vmatpush2.bf16.msra.mxu1 %v2341_v21 }
 0x12b   :  { %1748 = vmatprep.subr.bf16.mxu1 %v2349_v32 }
 0x12d   :  { %1694 = vmatpush2.bf16.msra.mxu0 %v2338_v18 }
 0x12e   :  { %1695 = vmatprep.subr.bf16.mxu0 %v2346_v28  ;;  %1749 = vmatpush2.bf16.msra.mxu1 %v2347_v34 }
 0x131   :  { %1696 = vmatpush2.bf16.msra.mxu0 %v2344_v33 }
 0x16f   :  { %v3101_v35 = vpop.f32.mrf.mxu0  ;;  %v3103_v36 = vpop.f32.mrf.mxu1 }
 0x170   :  { %v1966_v45 = vmul.f32 -1.442695, %v3101_v35  ;;  %v1968_v55 = vmul.f32 -1.442695, %v3103_v36 }
 0x171   :  { %v3105_v37 = vpop.f32.mrf.mxu0  ;;  %v3107_v38 = vpop.f32.mrf.mxu1 }
 0x172   :  { %v1967_v46 = vmul.f32 -1.442695, %v3105_v37  ;;  %v1969_v47 = vmul.f32 -1.442695, %v3107_v38  ;;  %2358 = vpow2.f32 %v1966_v45 }
 0x173   :  { %v3109_v39 = vpop.f32.mrf.mxu0  ;;  %v3111_v40 = vpop.f32.mrf.mxu1 }
 0x174   :  { %v1970_v49 = vmul.f32 -1.442695, %v3109_v39  ;;  %v1972_v51 = vmul.f32 -1.442695, %v3111_v40  ;;  %2360 = vpow2.f32 %v1967_v46 }
 0x175   :  { %v3113_v41 = vpop.f32.mrf.mxu0  ;;  %v3115_v42 = vpop.f32.mrf.mxu1  ;;  %2362 = vpow2.f32 %v1969_v47 }
 0x176   :  { %v1971_v52 = vmul.f32 -1.442695, %v3113_v41  ;;  %v1973_v53 = vmul.f32 -1.442695, %v3115_v42  ;;  %2364 = vpow2.f32 %v1970_v49 }
 0x177   :  { %v3117_v43 = vpop.f32.mrf.mxu0  ;;  %v3119_v44 = vpop.f32.mrf.mxu1  ;;  %2366 = vpow2.f32 %v1972_v51 }
 0x178   :  { %v1974_v57 = vmul.f32 -1.442695, %v3117_v43  ;;  %2368 = vpow2.f32 %v1971_v52  ;;  %v1976_v2 = vmul.f32 -1.442695, %v3119_v44 }
 0x179   :  { %v3124_v48 = vpop.f32.mrf.mxu0  ;;  %v3127_v50 = vpop.f32.mrf.mxu1  ;;  %2370 = vpow2.f32 %v1973_v53 }
 0x17a   :  { %v1975_v58 = vmul.f32 -1.442695, %v3124_v48  ;;  %v1977_v59 = vmul.f32 -1.442695, %v3127_v50  ;;  %2372 = vpow2.f32 %v1968_v55 }
 0x17b   :  { %v3132_v54 = vpop.f32.mrf.mxu0  ;;  %v3135_v56 = vpop.f32.mrf.mxu1  ;;  %2374 = vpow2.f32 %v1974_v57 }
 0x17c   :  { %v1978_v61 = vmul.f32 -1.442695, %v3132_v54  ;;  %v1980_v63 = vmul.f32 -1.442695, %v3135_v56  ;;  %2376 = vpow2.f32 %v1975_v58 }
 0x17d   :  { %v3140_v60 = vpop.f32.mrf.mxu0  ;;  %v3143_v62 = vpop.f32.mrf.mxu1  ;;  %2378 = vpow2.f32 %v1977_v59 }
 0x17e   :  { %v1979_v0 = vmul.f32 -1.442695, %v3140_v60  ;;  %v1981_v1 = vmul.f32 -1.442695, %v3143_v62  ;;  %2380 = vpow2.f32 %v1978_v61 }
 0x17f   :  { %2382 = vpow2.f32 %v1980_v63  ;;  %v2359_v7 = vpop.eup %2358 }
 0x180   :  { %2384 = vpow2.f32 %v1979_v0  ;;  %v1185_v15 = vadd.f32 1.0, %v2359_v7 }
 0x181   :  { %v2361_v12 = vpop.eup %2360  ;;  %2386 = vpow2.f32 %v1981_v1 }
 0x182   :  { %v2363_v13 = vpop.eup %2362  ;;  %2388 = vpow2.f32 %v1976_v2  ;;  %v1186_v17 = vadd.f32 1.0, %v2361_v12 }
 0x183   :  { %v2365_v14 = vpop.eup %2364  ;;  %v1188_v20 = vadd.f32 1.0, %v2363_v13  ;;  %2390 = vrcp.f32 %v1185_v15 }
 0x184   :  { %v2367_v16 = vpop.eup %2366  ;;  %v1189_v23 = vadd.f32 1.0, %v2365_v14  ;;  %2392 = vrcp.f32 %v1186_v17 }
 0x185   :  { %v2369_v19 = vpop.eup %2368  ;;  %v1191_v25 = vadd.f32 1.0, %v2367_v16  ;;  %2394 = vrcp.f32 %v1188_v20 }
 0x186   :  { %v2371_v22 = vpop.eup %2370  ;;  %v1190_v27 = vadd.f32 1.0, %v2369_v19  ;;  %2396 = vrcp.f32 %v1189_v23 }
 0x187   :  { %v2373_v24 = vpop.eup %2372  ;;  %v1192_v30 = vadd.f32 1.0, %v2371_v22  ;;  %2398 = vrcp.f32 %v1191_v25 }
 0x188   :  { %v2375_v26 = vpop.eup %2374  ;;  %v1187_v18 = vadd.f32 1.0, %v2373_v24  ;;  %2400 = vrcp.f32 %v1190_v27 }
 0x189   :  { %v2377_v29 = vpop.eup %2376  ;;  %v1193_v28 = vadd.f32 1.0, %v2375_v26  ;;  %2402 = vrcp.f32 %v1192_v30 }
 0x18a   :  { %v2379_v31 = vpop.eup %2378  ;;  %v1194_v33 = vadd.f32 1.0, %v2377_v29  ;;  %2404 = vrcp.f32 %v1187_v18 }
 0x18b   :  { %v2381_v21 = vpop.eup %2380  ;;  %v1196_v45 = vadd.f32 1.0, %v2379_v31  ;;  %2406 = vrcp.f32 %v1193_v28 }
 0x18c   :  { %v2383_v32 = vpop.eup %2382  ;;  %v1197_v47 = vadd.f32 1.0, %v2381_v21  ;;  %2408 = vrcp.f32 %v1194_v33 }
 0x18d   :  { %v2385_v34 = vpop.eup %2384  ;;  %v1199_v51 = vadd.f32 1.0, %v2383_v32  ;;  %2410 = vrcp.f32 %v1196_v45 }
 0x18e   :  { %v2387_v46 = vpop.eup %2386  ;;  %v1198_v52 = vadd.f32 1.0, %v2385_v34  ;;  %2412 = vrcp.f32 %v1197_v47 }
 0x18f   :  { %v2389_v49 = vpop.eup %2388  ;;  %v1200_v53 = vadd.f32 1.0, %v2387_v46  ;;  %2414 = vrcp.f32 %v1199_v51 }
 0x190   :  { %v1195_v55 = vadd.f32 1.0, %v2389_v49  ;;  %v2391_v57 = vpop.eup %2390  ;;  %2416 = vrcp.f32 %v1198_v52 }
 0x191   :  { %v2393_v58 = vpop.eup %2392  ;;  %2418 = vrcp.f32 %v1200_v53  ;;  %v1233_v29 = vmul.f32 %v2391_v57, %v3101_v35 }
 0x192   :  { %v2395_v59 = vpop.eup %2394  ;;  %2420 = vrcp.f32 %v1195_v55  ;;  %v1234_v23 = vmul.f32 %v2393_v58, %v3105_v37 }
 0x193   :  { %v2397_v61 = vpop.eup %2396  ;;  %v1236_v24 = vmul.f32 %v2395_v59, %v3107_v38 }
 0x194   :  { %v2399_v63 = vpop.eup %2398  ;;  %v1237_v16 = vmul.f32 %v2397_v61, %v3109_v39 }
 0x195   :  { %v2401_v2 = vpop.eup %2400  ;;  %v1239_v17 = vmul.f32 %v2399_v63, %v3111_v40 }
 0x196   :  { %v2403_v7 = vpop.eup %2402  ;;  %v1238_v25 = vmul.f32 %v2401_v2, %v3113_v41 }
 0x197   :  { %v2405_v14 = vpop.eup %2404  ;;  %v1240_v26 = vmul.f32 %v2403_v7, %v3115_v42 }
 0x198   :  { %v2407_v15 = vpop.eup %2406  ;;  %v1235_v30 = vmul.f32 %v2405_v14, %v3103_v36 }
 0x199   :  { %v2409_v22 = vpop.eup %2408  ;;  %v1241_v7 = vmul.f32 %v2407_v15, %v3117_v43 }
 0x19a   :  { %v2411_v27 = vpop.eup %2410  ;;  %v1242_v63 = vmul.f32 %v2409_v22, %v3124_v48 }
 0x19b   :  { %v2413_v21 = vpop.eup %2412 }
 0x19c   :  { %v2415_v34 = vpop.eup %2414  ;;  %v1245_v57 = vmul.f32 %v2413_v21, %v3132_v54 }
 0x19d   :  { %v2417_v42 = vpop.eup %2416  ;;  %v1247_v58 = vmul.f32 %v2415_v34, %v3135_v56 }
 0x19e   :  { %v2419_v35 = vpop.eup %2418 }
 0x19f   :  { %v2421_v55 = vpop.eup %2420  ;;  %v1248_v2 = vmul.f32 %v2419_v35, %v3143_v62 }
 0x1af   :  { %v1065_v0 = vpop.f32.mrf.mxu0  ;;  %v1118_v1 = vpop.f32.mrf.mxu1 }
 0x1b0   :  { %v1249_v38 = vmul.f32 %v1233_v29, %v1065_v0  ;;  %v1251_v45 = vmul.f32 %v1235_v30, %v1118_v1  ;;  %v1244_v0 = vmul.f32 %v2411_v27, %v3127_v50  ;;  %v1246_v1 = vmul.f32 %v2417_v42, %v3140_v60 }
 0x1b1   :  { %v1067_v12 = vpop.f32.mrf.mxu0  ;;  %v1120_v13 = vpop.f32.mrf.mxu1 }
 0x1b2   :  { %v1250_v28 = vmul.f32 %v1234_v23, %v1067_v12  ;;  %v1252_v32 = vmul.f32 %v1236_v24, %v1120_v13  ;;  %v1243_v12 = vmul.f32 %v2421_v55, %v3119_v44 }
 0x1b3   :  { %v1069_v19 = vpop.f32.mrf.mxu0  ;;  %v1122_v20 = vpop.f32.mrf.mxu1 }
 0x1b4   :  { %v1253_v31 = vmul.f32 %v1237_v16, %v1069_v19  ;;  %v1255_v39 = vmul.f32 %v1239_v17, %v1122_v20 }
 0x1b5   :  { %v1071_v18 = vpop.f32.mrf.mxu0  ;;  %v1124_v40 = vpop.f32.mrf.mxu1 }
 0x1b6   :  { %v1254_v33 = vmul.f32 %v1238_v25, %v1071_v18  ;;  %v1256_v37 = vmul.f32 %v1240_v26, %v1124_v40  ;;  %v1265_v51 = vpack.c.bf16 %v1253_v31, %v1249_v38  ;;  %v1267_v36 = vpack.c.bf16 %v1255_v39, %v1251_v45 }
 0x1b7   :  { %v1075_v41 = vpop.f32.mrf.mxu0  ;;  %v1128_v46 = vpop.f32.mrf.mxu1 }
 0x1b8   :  { %v1266_v47 = vpack.c.bf16 %v1254_v33, %v1250_v28  ;;  %v1268_v49 = vpack.c.bf16 %v1256_v37, %v1252_v32  ;;  %v1257_v23 = vmul.f32 %v1241_v7, %v1075_v41  ;;  %v1259_v48 = vmul.f32 %v1243_v12, %v1128_v46 }
 0x1b9   :  { %v1077_v52 = vpop.f32.mrf.mxu0  ;;  %v1130_v53 = vpop.f32.mrf.mxu1 }
 0x1ba   :  { %1697 = vmatprep.mubr.bf16.mxu0 %v1266_v47  ;;  %1750 = vmatprep.mubr.bf16.mxu1 %v1268_v49  ;;  %v1258_v16 = vmul.f32 %v1242_v63, %v1077_v52  ;;  %v1260_v17 = vmul.f32 %v1244_v0, %v1130_v53 }
 0x1bb   :  { %v1079_v59 = vpop.f32.mrf.mxu0  ;;  %v1132_v61 = vpop.f32.mrf.mxu1  ;;  %1698 = vmatmul.mubr.bf16.vlgmr.msra.gmra.mxu0 %v1265_v51  ;;  %1751 = vmatmul.mubr.bf16.vlgmr.msra.gmra.mxu1 %v1267_v36 }
 0x1bc   :  { %v1261_v13 = vmul.f32 %v1245_v57, %v1079_v59  ;;  %v1263_v54 = vmul.f32 %v1247_v58, %v1132_v61 }
 0x1bd   :  { %v1081_v14 = vpop.f32.mrf.mxu0  ;;  %v1134_v56 = vpop.f32.mrf.mxu1 }
 0x1be   :  { %v1262_v19 = vmul.f32 %v1246_v1, %v1081_v14  ;;  %v1264_v20 = vmul.f32 %v1248_v2, %v1134_v56  ;;  %v1269_v24 = vpack.c.bf16 %v1261_v13, %v1257_v23  ;;  %v1271_v60 = vpack.c.bf16 %v1263_v54, %v1259_v48 }
 0x1c0   :  { %v1270_v22 = vpack.c.bf16 %v1262_v19, %v1258_v16  ;;  %v1272_v50 = vpack.c.bf16 %v1264_v20, %v1260_v17 }
 0x1c2   :  { %1707 = vmatprep.mubr.bf16.mxu0 %v1270_v22  ;;  %1760 = vmatprep.mubr.bf16.mxu1 %v1272_v50 }
 0x1c3   :  { %1708 = vmatmul.mubr.bf16.gmra.mxu0 %v1269_v24  ;;  %1761 = vmatmul.mubr.bf16.gmra.mxu1 %v1271_v60 }
 0x27b   :  { %v1699_v43 = vpop.f32.mrf.mxu0  ;;  %v1752_v44 = vpop.f32.mrf.mxu1 }
 0x27c   :  { %v1753_v62 = vadd.f32 %v1752_v44, %v1699_v43 }
 0x27d   :  { %v1701_v15 = vpop.f32.mrf.mxu0  ;;  %v1754_v25 = vpop.f32.mrf.mxu1 }
 0x27e   :  { %v1755_v26 = vadd.f32 %v1754_v25, %v1701_v15  ;;  %v1771_v30 = vadd.f32 %v1753_v62, %v2461_v3 }
 0x27f   :  { %v1703_v27 = vpop.f32.mrf.mxu0  ;;  %v1756_v29 = vpop.f32.mrf.mxu1 }
 0x280   :  { %v1772_v31 = vadd.f32 %v1755_v26, %v2463_v4  ;;  %v1757_v39 = vadd.f32 %v1756_v29, %v1703_v27 }
 0x281   :  { %v1705_v18 = vpop.f32.mrf.mxu0  ;;  %v1758_v40 = vpop.f32.mrf.mxu1 }
 0x282   :  { %v2054_v21 = vpack.c.bf16 %v1772_v31, %v1771_v30  ;;  %v1759_v28 = vadd.f32 %v1758_v40, %v1705_v18  ;;  %v1773_v37 = vadd.f32 %v1757_v39, %v2465_v5 }
 0x283   :  { %v1709_v32 = vpop.f32.mrf.mxu0  ;;  %v1762_v33 = vpop.f32.mrf.mxu1 }
 0x284   :  { %1822 = vst [vmem:[%s3190_s5] sm:$0xff] %v2054_v21  ;;  %v1774_v34 = vadd.f32 %v1759_v28, %v2467_v6  ;;  %v1763_v38 = vadd.f32 %v1762_v33, %v1709_v32 }
 0x285   :  { %v1711_v45 = vpop.f32.mrf.mxu0  ;;  %v1764_v3 = vpop.f32.mrf.mxu1 }
 0x286   :  { %v2055_v41 = vpack.c.bf16 %v1774_v34, %v1773_v37  ;;  %v1765_v4 = vadd.f32 %v1764_v3, %v1711_v45  ;;  %v1775_v47 = vadd.f32 %v1763_v38, %v2472_v8 }
 0x287   :  { %v1713_v46 = vpop.f32.mrf.mxu0  ;;  %v1766_v42 = vpop.f32.mrf.mxu1 }
 0x288   :  { %1823 = vst [vmem:[%s3190_s5 + $0x8] sm:$0xff] %v2055_v41  ;;  %v1776_v49 = vadd.f32 %v1765_v4, %v2474_v9  ;;  %v1767_v35 = vadd.f32 %v1766_v42, %v1713_v46 }
 0x289   :  { %v1715_v51 = vpop.f32.mrf.mxu0  ;;  %v1768_v5 = vpop.f32.mrf.mxu1 }
 0x28a   :  { %v2056_v36 = vpack.c.bf16 %v1776_v49, %v1775_v47  ;;  %v1769_v6 = vadd.f32 %v1768_v5, %v1715_v51  ;;  %v1777_v52 = vadd.f32 %v1767_v35, %v2476_v10 }
 0x28c   :  { %1824 = vst [vmem:[%s3190_s5 + $0x10] sm:$0xff] %v2056_v36  ;;  %v1778_v53 = vadd.f32 %v1769_v6, %v2478_v11 }
 0x28e   :  { %v2057_v55 = vpack.c.bf16 %v1778_v53, %v1777_v52 }
 0x290   :  { %1825 = vst [vmem:[%s3190_s5 + $0x18] sm:$0xff] %v2057_v55 }

// kernel: llm_forward.17
= control target key start
LH: loop header
LB: loop body
LE: loop exit
PB: predicated region body
PF: predicated region fallthrough
CT: control target
= control target key end

     0   :  { %s802_s0 = inlined_call_operand.vmem [shape: bf16[32,256], index: 0, kind: input, shape index: {}]   ;;  %s803_s1 = inlined_call_operand.vmem [shape: f32[1,256], index: 1, kind: input, shape index: {}]   ;;  %s804_s2 = inlined_call_operand.vmem [shape: bf16[256,256], index: 2, kind: input, shape index: {}]   ;;  %s805_s3 = inlined_call_operand.vmem [shape: f32[1,256], index: 3, kind: input, shape index: {}]   ;;  %s806_s4 = inlined_call_operand.hbm [shape: bf16[32,256], index: 4, kind: output, shape index: {}]  }
   0x1   :  { %v24_v0 = vld [vmem:[%s802_s0 + $0x10] sm:$0xff]  ;;  %v22_v1 = vld [vmem:[%s802_s0] sm:$0xff]  ;;  %v25_v2 = vld [vmem:[%s802_s0 + $0x18] sm:$0xff] }
   0x2   :  { %v654_v3 = vunpack.c.l.bf16 %v24_v0  ;;  %v656_v4 = vunpack.c.h.bf16 %v24_v0  ;;  %v658_v5 = vunpack.c.l.bf16 %v22_v1  ;;  %v660_v6 = vunpack.c.h.bf16 %v22_v1  ;;  %v23_v7 = vld [vmem:[%s802_s0 + $0x8] sm:$0xff]  ;;  %v539_v12 = vld [vmem:[%s804_s2 + $0x74] ss:$8 sps:$4 sm:$0xff]   ;;  %v541_v13 = vld [vmem:[%s804_s2 + $0x70] ss:$8 sps:$4 sm:$0xff]  }
   0x3   :  { %v665_v8 = vunpack.c.l.bf16 %v25_v2  ;;  %v667_v9 = vunpack.c.h.bf16 %v25_v2  ;;  %v669_v10 = vunpack.c.l.bf16 %v23_v7  ;;  %v671_v11 = vunpack.c.h.bf16 %v23_v7  ;;  %v542_v18 = vld [vmem:[%s804_s2 + $0x64] ss:$8 sps:$4 sm:$0xff]   ;;  %351 = vmatprep.subr.bf16.mxu0 %v539_v12  ;;  %504 = vmatprep.subr.bf16.mxu1 %v539_v12  ;;  %v544_v27 = vld [vmem:[%s804_s2 + $0x60] ss:$8 sps:$4 sm:$0xff]   ;;  %v545_v28 = vld [vmem:[%s804_s2 + $0x54] ss:$8 sps:$4 sm:$0xff]  }
   0x4   :  { %v38_v14 = vmul.f32 %v654_v3, %v654_v3  ;;  %v39_v15 = vmul.f32 %v656_v4, %v656_v4  ;;  %v34_v16 = vmul.f32 %v658_v5, %v658_v5  ;;  %v35_v17 = vmul.f32 %v660_v6, %v660_v6  ;;  %352 = vmatpush1.bf16.xpose.msra.mxu0 %v541_v13  ;;  %v547_v29 = vld [vmem:[%s804_s2 + $0x50] ss:$8 sps:$4 sm:$0xff]   ;;  %v548_v30 = vld [vmem:[%s804_s2 + $0x44] ss:$8 sps:$4 sm:$0xff]  }
   0x5   :  { %v40_v19 = vmul.f32 %v665_v8, %v665_v8  ;;  %v41_v20 = vmul.f32 %v667_v9, %v667_v9  ;;  %v36_v21 = vmul.f32 %v669_v10, %v669_v10  ;;  %v37_v22 = vmul.f32 %v671_v11, %v671_v11  ;;  %520 = vmatpush1.bf16.xpose.msra.mxu1 %v541_v13 }
   0x6   :  { %v48_v23 = vadd.f32 %v39_v15, %v38_v14  ;;  %v42_v24 = vadd.f32 %v35_v17, %v34_v16  ;;  %353 = vmatprep.subr.bf16.mxu0 %v542_v18  ;;  %505 = vmatprep.subr.bf16.mxu1 %v542_v18 }
   0x7   :  { %v51_v25 = vadd.f32 %v41_v20, %v40_v19  ;;  %v45_v26 = vadd.f32 %v37_v22, %v36_v21 }
   0x8   :  { %49 = vadd.xlane.f32.xlu1 %v48_v23  ;;  %43 = vadd.xlane.f32.xlu0 %v42_v24 }
   0xc   :  { %52 = vadd.xlane.f32.xlu1 %v51_v25  ;;  %46 = vadd.xlane.f32.xlu0 %v45_v26 }
   0xd   :  { %354 = vmatpush1.bf16.xpose.msra.mxu0 %v544_v27  ;;  %521 = vmatpush1.bf16.xpose.msra.mxu1 %v544_v27 }
   0xe   :  { %355 = vmatprep.subr.bf16.mxu0 %v545_v28  ;;  %506 = vmatprep.subr.bf16.mxu1 %v545_v28 }
   0xf   :  { %9 = vsyncpa [#allocation4], 0  ;;  %v550_v31 = vld [vmem:[%s804_s2 + $0x40] ss:$8 sps:$4 sm:$0xff]   ;;  %v551_v32 = vld [vmem:[%s804_s2 + $0x34] ss:$8 sps:$4 sm:$0xff]   ;;  %v77_v12 = vlaneseq }
  0x10   :  { %v553_v33 = vld [vmem:[%s804_s2 + $0x30] ss:$8 sps:$4 sm:$0xff]   ;;  %v554_v34 = vld [vmem:[%s804_s2 + $0x24] ss:$8 sps:$4 sm:$0xff]   ;;  %v556_v35 = vld [vmem:[%s804_s2 + $0x20] ss:$8 sps:$4 sm:$0xff]  }
  0x11   :  { %v557_v36 = vld [vmem:[%s804_s2 + $0x14] ss:$8 sps:$4 sm:$0xff]   ;;  %v559_v37 = vld [vmem:[%s804_s2 + $0x10] ss:$8 sps:$4 sm:$0xff]   ;;  %v560_v38 = vld [vmem:[%s804_s2 + $0x4] ss:$8 sps:$4 sm:$0xff]  }
  0x12   :  { %v562_v39 = vld [vmem:[%s804_s2] ss:$8 sps:$4 sm:$0xff]   ;;  %v563_v40 = vld [vmem:[%s804_s2 + $0xf4] ss:$8 sps:$4 sm:$0xff]   ;;  %v565_v41 = vld [vmem:[%s804_s2 + $0xf0] ss:$8 sps:$4 sm:$0xff]  }
  0x13   :  { %v566_v42 = vld [vmem:[%s804_s2 + $0xe4] ss:$8 sps:$4 sm:$0xff]   ;;  %v568_v43 = vld [vmem:[%s804_s2 + $0xe0] ss:$8 sps:$4 sm:$0xff]   ;;  %v569_v44 = vld [vmem:[%s804_s2 + $0xd4] ss:$8 sps:$4 sm:$0xff]  }
  0x14   :  { %v571_v45 = vld [vmem:[%s804_s2 + $0xd0] ss:$8 sps:$4 sm:$0xff]   ;;  %v572_v46 = vld [vmem:[%s804_s2 + $0xc4] ss:$8 sps:$4 sm:$0xff]   ;;  %v574_v47 = vld [vmem:[%s804_s2 + $0xc0] ss:$8 sps:$4 sm:$0xff]  }
  0x15   :  { %356 = vmatpush1.bf16.xpose.msra.mxu0 %v547_v29  ;;  %522 = vmatpush1.bf16.xpose.msra.mxu1 %v547_v29  ;;  %v575_v48 = vld [vmem:[%s804_s2 + $0xb4] ss:$8 sps:$4 sm:$0xff]   ;;  %v577_v49 = vld [vmem:[%s804_s2 + $0xb0] ss:$8 sps:$4 sm:$0xff]   ;;  %v578_v50 = vld [vmem:[%s804_s2 + $0xa4] ss:$8 sps:$4 sm:$0xff]  }
  0x16   :  { %357 = vmatprep.subr.bf16.mxu0 %v548_v30  ;;  %507 = vmatprep.subr.bf16.mxu1 %v548_v30  ;;  %v580_v51 = vld [vmem:[%s804_s2 + $0xa0] ss:$8 sps:$4 sm:$0xff]   ;;  %v581_v52 = vld [vmem:[%s804_s2 + $0x94] ss:$8 sps:$4 sm:$0xff]   ;;  %v583_v53 = vld [vmem:[%s804_s2 + $0x90] ss:$8 sps:$4 sm:$0xff]  }
  0x17   :  { %v584_v54 = vld [vmem:[%s804_s2 + $0x84] ss:$8 sps:$4 sm:$0xff]   ;;  %v586_v55 = vld [vmem:[%s804_s2 + $0x80] ss:$8 sps:$4 sm:$0xff]   ;;  %v78_v13 = vshrl.u32 %v77_v12, 7  ;;  %s617_s8 = smov [#allocation3]  }
  0x18   :  { %v75_v17 = vld [vmem:[%s803_s1] sm:$0x3]  ;;  %s437_s9 = sshll.u32 %s617_s8, 4  ;;  %s438_s9 = int_to_ptr.vmem [resolvable:$true] %s437_s9 }
  0x19   :  { %v79_v14 = vsub.s32 0, %v78_v13  ;;  %v83_v15 = vsub.s32 1, %v78_v13  ;;  %p600_p1 = scmp.lt.s32.totalorder %s438_s9, %s438_s9 }
  0x1b   :  { %v80_v19 = vrot.slane %v75_v17, %v79_v14  ;;  %v84_v20 = vrot.slane %v75_v17, %v83_v15 }
  0x1d   :  { %358 = vmatpush1.bf16.xpose.msra.mxu0 %v550_v31  ;;  %523 = vmatpush1.bf16.xpose.msra.mxu1 %v550_v31 }
  0x1e   :  { %359 = vmatprep.subr.bf16.mxu0 %v551_v32  ;;  %508 = vmatprep.subr.bf16.mxu1 %v551_v32 }
  0x25   :  { %360 = vmatpush1.bf16.xpose.msra.mxu0 %v553_v33  ;;  %524 = vmatpush1.bf16.xpose.msra.mxu1 %v553_v33 }
  0x26   :  { %361 = vmatprep.subr.bf16.mxu0 %v554_v34  ;;  %509 = vmatprep.subr.bf16.mxu1 %v554_v34 }
  0x2d   :  { %362 = vmatpush1.bf16.xpose.msra.mxu0 %v556_v35  ;;  %525 = vmatpush1.bf16.xpose.msra.mxu1 %v556_v35 }
  0x2e   :  { %363 = vmatprep.subr.bf16.mxu0 %v557_v36  ;;  %510 = vmatprep.subr.bf16.mxu1 %v557_v36 }
  0x35   :  { %364 = vmatpush1.bf16.xpose.msra.mxu0 %v559_v37  ;;  %526 = vmatpush1.bf16.xpose.msra.mxu1 %v559_v37 }
  0x36   :  { %365 = vmatprep.subr.bf16.mxu0 %v560_v38  ;;  %511 = vmatprep.subr.bf16.mxu1 %v560_v38 }
  0x3d   :  { %366 = vmatpush1.bf16.xpose.msra.mxu0 %v562_v39  ;;  %527 = vmatpush1.bf16.xpose.msra.mxu1 %v562_v39 }
  0x3e   :  { %367 = vmatprep.subr.bf16.mxu0 %v563_v40  ;;  %512 = vmatprep.subr.bf16.mxu1 %v563_v40 }
  0x45   :  { %368 = vmatpush2.bf16.xpose.msra.mxu0 %v565_v41  ;;  %528 = vmatpush2.bf16.xpose.msra.mxu1 %v565_v41 }
  0x46   :  { %369 = vmatprep.subr.bf16.mxu0 %v566_v42  ;;  %513 = vmatprep.subr.bf16.mxu1 %v566_v42 }
  0x4d   :  { %370 = vmatpush2.bf16.xpose.msra.mxu0 %v568_v43  ;;  %529 = vmatpush2.bf16.xpose.msra.mxu1 %v568_v43 }
  0x4e   :  { %371 = vmatprep.subr.bf16.mxu0 %v569_v44  ;;  %514 = vmatprep.subr.bf16.mxu1 %v569_v44 }
  0x55   :  { %372 = vmatpush2.bf16.xpose.msra.mxu0 %v571_v45  ;;  %530 = vmatpush2.bf16.xpose.msra.mxu1 %v571_v45 }
  0x56   :  { %373 = vmatprep.subr.bf16.mxu0 %v572_v46  ;;  %515 = vmatprep.subr.bf16.mxu1 %v572_v46 }
  0x5d   :  { %374 = vmatpush2.bf16.xpose.msra.mxu0 %v574_v47  ;;  %531 = vmatpush2.bf16.xpose.msra.mxu1 %v574_v47 }
  0x5e   :  { %375 = vmatprep.subr.bf16.mxu0 %v575_v48  ;;  %516 = vmatprep.subr.bf16.mxu1 %v575_v48 }
  0x65   :  { %376 = vmatpush2.bf16.xpose.msra.mxu0 %v577_v49  ;;  %532 = vmatpush2.bf16.xpose.msra.mxu1 %v577_v49 }
  0x66   :  { %377 = vmatprep.subr.bf16.mxu0 %v578_v50  ;;  %517 = vmatprep.subr.bf16.mxu1 %v578_v50 }
  0x6d   :  { %378 = vmatpush2.bf16.xpose.msra.mxu0 %v580_v51  ;;  %533 = vmatpush2.bf16.xpose.msra.mxu1 %v580_v51 }
  0x6e   :  { %379 = vmatprep.subr.bf16.mxu0 %v581_v52  ;;  %518 = vmatprep.subr.bf16.mxu1 %v581_v52 }
  0x75   :  { %380 = vmatpush2.bf16.xpose.msra.mxu0 %v583_v53  ;;  %534 = vmatpush2.bf16.xpose.msra.mxu1 %v583_v53 }
  0x76   :  { %381 = vmatprep.subr.bf16.mxu0 %v584_v54  ;;  %519 = vmatprep.subr.bf16.mxu1 %v584_v54 }
  0x7d   :  { %382 = vmatpush2.bf16.xpose.msra.mxu0 %v586_v55  ;;  %535 = vmatpush2.bf16.xpose.msra.mxu1 %v586_v55 }
  0x91   :  { %v50_v56 = vpop.xlane.xlu1 %49  ;;  %v44_v57 = vpop.xlane.xlu0 %43 }
  0x92   :  { %v57_v58 = vmul.f32 0.00390625, %v50_v56  ;;  %v55_v59 = vmul.f32 0.00390625, %v44_v57 }
  0x94   :  { %v61_v60 = vadd.f32 1e-06, %v57_v58  ;;  %v59_v61 = vadd.f32 1e-06, %v55_v59 }
  0x95   :  { %v53_v62 = vpop.xlane.xlu1 %52  ;;  %v47_v63 = vpop.xlane.xlu0 %46 }
  0x96   :  { %587 = vrsqrt.f32 %v61_v60  ;;  %v58_v0 = vmul.f32 0.00390625, %v53_v62  ;;  %v56_v1 = vmul.f32 0.00390625, %v47_v63 }
  0x97   :  { %589 = vrsqrt.f32 %v59_v61 }
  0x98   :  { %v62_v2 = vadd.f32 1e-06, %v58_v0  ;;  %v60_v7 = vadd.f32 1e-06, %v56_v1 }
  0x9a   :  { %591 = vrsqrt.f32 %v62_v2 }
  0x9b   :  { %593 = vrsqrt.f32 %v60_v7 }
  0xa3   :  { %v588_v16 = vpop.eup %587 }
  0xa4   :  { %v590_v18 = vpop.eup %589  ;;  %v72_v21 = vmul.f32 %v588_v16, %v656_v4  ;;  %v71_v22 = vmul.f32 %v588_v16, %v654_v3 }
  0xa5   :  { %v68_v24 = vmul.f32 %v590_v18, %v660_v6  ;;  %v67_v25 = vmul.f32 %v590_v18, %v658_v5 }
  0xa6   :  { %v92_v31 = vmul.f32 %v84_v20, %v72_v21  ;;  %v91_v33 = vmul.f32 %v80_v19, %v71_v22 }
  0xa7   :  { %v592_v23 = vpop.eup %591  ;;  %v88_v34 = vmul.f32 %v84_v20, %v68_v24  ;;  %v87_v35 = vmul.f32 %v80_v19, %v67_v25 }
  0xa8   :  { %v594_v26 = vpop.eup %593  ;;  %v74_v27 = vmul.f32 %v592_v23, %v667_v9  ;;  %v73_v28 = vmul.f32 %v592_v23, %v665_v8  ;;  %v159_v8 = vld [vmem:[%s805_s3] sm:$0x3]  ;;  %s595_s3 = scalar_lea.vmem %s438_s9, 512 }
  0xa9   :  { %v70_v29 = vmul.f32 %v594_v26, %v671_v11  ;;  %v69_v30 = vmul.f32 %v594_v26, %v669_v10  ;;  %v164_v9 = vrot.slane %v159_v8, %v79_v14  ;;  %v168_v10 = vrot.slane %v159_v8, %v83_v15  ;;  %p596_p0 = scmp.ne.s32.totalorder %s438_s9, %s595_s3  ;;  %p601_p2 = scmp.lt.s32.totalorder %s595_s3, %s595_s3 }
  0xaa   :  { %v94_v32 = vmul.f32 %v84_v20, %v74_v27  ;;  %v93_v4 = vmul.f32 %v80_v19, %v73_v28 }
  0xab   :  { %v90_v3 = vmul.f32 %v84_v20, %v70_v29  ;;  %v89_v36 = vmul.f32 %v80_v19, %v69_v30  ;;  %p602_p3 = por %p601_p2, %p600_p1 }
  0xac   :  { %v503_v6 = vpack.c.bf16 %v94_v32, %v92_v31  ;;  %v502_v37 = vpack.c.bf16 %v93_v4, %v91_v33 }
  0xad   :  { %v501_v5 = vpack.c.bf16 %v90_v3, %v88_v34  ;;  %v500_v38 = vpack.c.bf16 %v89_v36, %v87_v35  ;;  %p603_p4 = pnand %p602_p3, %p596_p0 }
  0xae   :  { %393 = vmatprep.mubr.bf16.mxu1 %v503_v6 }
  0xaf   :  { %383 = vmatprep.mubr.bf16.mxu0 %v501_v5  ;;  %394 = vmatmul.mubr.bf16.vlgmr.msra.gmra.mxu1 %v502_v37 }
  0xb0   :  { %384 = vmatmul.mubr.bf16.vlgmr.msra.gmra.mxu0 %v500_v38 }
 0x16f   :  { %v395_v11 = vpop.f32.mrf.mxu1 }
 0x170   :  { %v385_v39 = vpop.f32.mrf.mxu0  ;;  %v396_v41 = vadd.f32 %v395_v11, %v164_v9 }
 0x171   :  { %v397_v40 = vpop.f32.mrf.mxu1  ;;  %v386_v44 = vadd.f32 %v385_v39, %v164_v9 }
 0x172   :  { %v387_v42 = vpop.f32.mrf.mxu0  ;;  %v398_v43 = vadd.f32 %v397_v40, %v168_v10 }
 0x173   :  { %v388_v45 = vadd.f32 %v387_v42, %v168_v10  ;;  %v399_v46 = vpop.f32.mrf.mxu1 }
 0x174   :  { %v498_v47 = vpack.c.bf16 %v398_v43, %v396_v41  ;;  %v389_v48 = vpop.f32.mrf.mxu0  ;;  %v400_v51 = vadd.f32 %v399_v46, %v164_v9 }
 0x175   :  { %v496_v49 = vpack.c.bf16 %v388_v45, %v386_v44  ;;  %v401_v50 = vpop.f32.mrf.mxu1  ;;  %v390_v54 = vadd.f32 %v389_v48, %v164_v9 }
 0x176   :  { %430 = vst [vmem:[#allocation3 + $0x10] sm:$0xff] %v498_v47  ;;  %v391_v52 = vpop.f32.mrf.mxu0  ;;  %v402_v53 = vadd.f32 %v401_v50, %v168_v10 }
 0x177   :  { %428 = vst [vmem:[#allocation3] sm:$0xff] %v496_v49  ;;  %v392_v55 = vadd.f32 %v391_v52, %v168_v10 }
 0x178   :  { %v499_v56 = vpack.c.bf16 %v402_v53, %v400_v51 }
 0x179   :  { %v497_v57 = vpack.c.bf16 %v392_v55, %v390_v54 }
 0x17a   :  { %431 = vst [vmem:[#allocation3 + $0x18] sm:$0xff] %v499_v56 }
 0x17b   :  { %429 = vst [vmem:[#allocation3 + $0x8] sm:$0xff] %v497_v57 }
 0x17c   :  { %606 = shalt.err (!%p603_p4)
}
 0x17d   :  { %s618_s10 = smov 128   ;;  %s619_s11 = smov 8  }
 0x17e   :  { %443 = dma.vmem_to_hbm [thread:$0]  %s438_s9, 512, %s806_s4, [#allocation4], %s618_s10, %s618_s10, %s619_s11  }
 0x17f   :  { %615 = dma.done.wait [#allocation4], 512  }
 0x180   :  { %616 = vsyncadd [#allocation4], 4294966784 }
 0x181   :  { %447 = vsyncpa [#allocation4], 1 }

</bundles_post_ra>
